<compile_context>
chip_gen: v6e
topology: v6e:2x2x1
jax: 0.10.0
libtpu: 0.0.40
codegen_flags: <defaults>
</compile_context>

<pallas_src>
import functools
import math

import jax
import jax.numpy as jnp
from jax.experimental import pallas as pl
from jax.experimental.pallas import tpu as pltpu


def _mha_kernel(*refs, h, d_k, mask_mode):
    # mask_mode: "dense" (mask_ref present), "causal" (in-kernel iota mask),
    #            "none" (no masking at all).
    if mask_mode == "dense":
        q_ref, k_ref, v_ref, mask_ref, w_ref, b_ref, o_ref = refs
    else:
        q_ref, k_ref, v_ref, w_ref, b_ref, o_ref = refs
        mask_ref = None

    f32 = jnp.float32
    bf16 = jnp.bfloat16
    S = q_ref.shape[1]
    D = q_ref.shape[2]
    neg_big = jnp.float32(-1000000000.0)
    inv_sqrt_dk = jnp.float32(1.0 / math.sqrt(d_k))

    # ---- Hoisted, loop-invariant work (once per grid step) -----------------
    # W arrives bf16 from the wrapper; fold 1/sqrt(d_k) into Wq and bq so the
    # per-head query scale disappears.
    wq = (w_ref[0].astype(f32) * inv_sqrt_dk).astype(bf16)   # (D, D)
    wk = w_ref[1]                                            # bf16 (D, D)
    wv = w_ref[2]
    wo = w_ref[3]
    bq = b_ref[0] * inv_sqrt_dk                              # f32 (1, D)
    bk = b_ref[1]
    bv = b_ref[2]
    bo = b_ref[3]

    if mask_mode == "dense":
        mask = mask_ref[0].astype(f32)                       # (S, S)
        mask_zero = mask == 0.0                              # hoisted compare
    elif mask_mode == "causal":
        row = jax.lax.broadcasted_iota(jnp.int32, (S, S), 0)
        col = jax.lax.broadcasted_iota(jnp.int32, (S, S), 1)
        keep = row >= col                                    # lower-triangular

    xq = q_ref[0]                                            # bf16 (S, D)
    xk = k_ref[0]
    xv = v_ref[0]

    # QKV projections: bf16 MXU inputs, f32 accumulation. Q is pre-scaled.
    q = jnp.dot(xq, wq, preferred_element_type=f32) + bq     # (S, D) f32
    k = jnp.dot(xk, wk, preferred_element_type=f32) + bk
    v = jnp.dot(xv, wv, preferred_element_type=f32) + bv

    # ---- Per-head attention with fused output projection --------------------
    # acc accumulates  sum_h ctx_h @ Wo[h*d_k:(h+1)*d_k, :]  in f32; seeded with bo.
    acc = jnp.broadcast_to(bo, (S, D)).astype(f32)
    for hh in range(h):
        sl = slice(hh * d_k, (hh + 1) * d_k)
        qh = q[:, sl].astype(bf16)                           # (S, d_k)
        kh = k[:, sl].astype(bf16)
        vh = v[:, sl].astype(bf16)

        # scores = qh @ kh^T (contract over d_k), lane-dense (S, S) f32.
        scores = jax.lax.dot_general(
            qh, kh, (((1,), (1,)), ((), ())), preferred_element_type=f32)

        if mask_mode == "dense":
            scores = jnp.where(mask_zero, neg_big, scores * mask)
        elif mask_mode == "causal":
            scores = jnp.where(keep, scores, neg_big)

        # Softmax in f32; reciprocal on the EUP slot.
        m = jnp.max(scores, axis=-1, keepdims=True)
        e = jnp.exp(scores - m)
        denom = jnp.sum(e, axis=-1, keepdims=True)
        p = e * pl.reciprocal(denom, approx=True)

        ctx_h = jnp.dot(p.astype(bf16), vh, preferred_element_type=f32)   # (S, d_k)
        acc = acc + jnp.dot(ctx_h.astype(bf16), wo[sl, :],
                            preferred_element_type=f32)

    o_ref[0] = acc.astype(o_ref.dtype)


def mha_know_forward(query, key, value, W, bias, mask=None, *, h):
    """query/key/value: (B, S, D).  W: (4, D, D) = [Wq,Wk,Wv,Wo] in (in,out) layout.
    bias: (4, 1, D).  mask: None (no masking), the string "causal" (mask generated
    in-kernel, no HBM traffic), or a dense (B, S, S) array."""
    B, S, D = query.shape
    assert D % h == 0
    d_k = D // h
    out_dtype = query.dtype

    # bf16 inputs to the kernel (halves Q/K/V and W DMA); numerics unchanged since
    # the kernel already fed the MXU bf16. Bias / mask / softmax stay f32.
    qb = query.astype(jnp.bfloat16)
    kb = key.astype(jnp.bfloat16)
    vb = value.astype(jnp.bfloat16)
    wb = W.astype(jnp.bfloat16)
    bf = bias.astype(jnp.float32)

    if mask is None:
        mask_mode = "none"
    elif isinstance(mask, str) and mask == "causal":
        mask_mode = "causal"
    else:
        mask_mode = "dense"

    kernel = functools.partial(_mha_kernel, h=h, d_k=d_k, mask_mode=mask_mode)

    qkv_spec = pl.BlockSpec((1, S, D), lambda b: (b, 0, 0))
    # W / bias block indices are constant across the grid -> the pipeliner fetches
    # them once and reuses the buffer.
    w_spec = pl.BlockSpec((4, D, D), lambda b: (0, 0, 0))
    b_spec = pl.BlockSpec((4, 1, D), lambda b: (0, 0, 0))

    if mask_mode == "dense":
        in_specs = [qkv_spec, qkv_spec, qkv_spec,
                    pl.BlockSpec((1, S, S), lambda b: (b, 0, 0)), w_spec, b_spec]
        args = (qb, kb, vb, mask.astype(jnp.float32), wb, bf)
    else:
        in_specs = [qkv_spec, qkv_spec, qkv_spec, w_spec, b_spec]
        args = (qb, kb, vb, wb, bf)

    return pl.pallas_call(
        kernel,
        out_shape=jax.ShapeDtypeStruct((B, S, D), out_dtype),
        grid_spec=pltpu.PrefetchScalarGridSpec(
            num_scalar_prefetch=0,
            grid=(B,),
            in_specs=in_specs,
            out_specs=pl.BlockSpec((1, S, D), lambda b: (b, 0, 0)),
        ),
        compiler_params=pltpu.CompilerParams(
            dimension_semantics=("parallel",),
            vmem_limit_bytes=16 * 1024 * 1024,
        ),
    )(*args)


def mha_know_reference(query, key, value, W, bias, mask, h):
    """Pure-JAX f32 reference mirroring the PyTorch forward exactly."""
    B, S, D = query.shape
    d_k = D // h

    def lin(x, i):
        return x @ W[i] + bias[i, 0]

    def split_heads(x):
        return x.reshape(B, S, h, d_k).transpose(0, 2, 1, 3)     # (B, h, S, d_k)

    Q = split_heads(lin(query, 0))
    K = split_heads(lin(key, 1))
    V = split_heads(lin(value, 2))

    scores = jnp.einsum("bhqd,bhkd->bhqk", Q, K) / math.sqrt(d_k)
    if mask is not None:
        m = mask[:, None]                                        # unsqueeze(1)
        scores = scores * m
        scores = jnp.where(m == 0, -1000000000.0, scores)
    p = jax.nn.softmax(scores, axis=-1)
    ctx = jnp.einsum("bhqk,bhkd->bhqd", p, V)
    ctx = ctx.transpose(0, 2, 1, 3).reshape(B, S, D)
    return lin(ctx, 3)


if __name__ == "__main__":
    key = jax.random.PRNGKey(0)
    B, S, D, H = 2, 128, 128, 4     # batch, seq, d_model (lane-dense), heads

    kq, kk, kv, kw, kb = jax.random.split(key, 5)
    query = jax.random.normal(kq, (B, S, D), dtype=jnp.float32)
    key_in = jax.random.normal(kk, (B, S, D), dtype=jnp.float32)
    value = jax.random.normal(kv, (B, S, D), dtype=jnp.float32)

    # nn.Linear-style init; weights stored in (in, out) layout (a PyTorch weight
    # matrix maps into W[i] transposed).
    bound = 1.0 / math.sqrt(D)
    W = jax.random.uniform(kw, (4, D, D), minval=-bound, maxval=bound,
                           dtype=jnp.float32)
    bias = jax.random.uniform(kb, (4, 1, D), minval=-bound, maxval=bound,
                              dtype=jnp.float32)

    causal_mask = jnp.broadcast_to(jnp.tril(jnp.ones((S, S), jnp.float32)),
                                   (B, S, S))

    ref_causal = mha_know_reference(query, key_in, value, W, bias, causal_mask, H)
    ref_nomask = mha_know_reference(query, key_in, value, W, bias, None, H)

    # 1) causal mask generated in-kernel (no mask DMA), 2) dense mask array path,
    # 3) mask=None path.
    out_causal = jax.block_until_ready(
        mha_know_forward(query, key_in, value, W, bias, mask="causal", h=H))
    out_dense = jax.block_until_ready(
        mha_know_forward(query, key_in, value, W, bias, mask=causal_mask, h=H))
    out_nomask = jax.block_until_ready(
        mha_know_forward(query, key_in, value, W, bias, mask=None, h=H))

    # bf16 MXU inputs (f32 accumulation) -> looser tolerance than a pure-f32 path.
    for out, ref in ((out_causal, ref_causal),
                     (out_dense, ref_causal),
                     (out_nomask, ref_nomask)):
        assert out.shape == (B, S, D)
        assert jnp.allclose(out, ref, atol=2e-2, rtol=2e-2), "mismatch vs reference"

    print("KERNEL_OK")
</pallas_src>

<mosaic_0001>
module attributes {stable_mosaic.version = 11 : i64} {
  func.func @_mha_kernel(%arg0: i32, %arg1: memref<1x128x128xbf16, #tpu.memory_space<vmem>>, %arg2: memref<1x128x128xbf16, #tpu.memory_space<vmem>>, %arg3: memref<1x128x128xbf16, #tpu.memory_space<vmem>>, %arg4: memref<4x128x128xbf16, #tpu.memory_space<vmem>>, %arg5: memref<4x1x128xf32, #tpu.memory_space<vmem>>, %arg6: memref<1x128x128xf32, #tpu.memory_space<vmem>>) attributes {dimension_semantics = [#tpu.dimension_semantics<parallel>], iteration_bounds = array<i64: 2>, scalar_prefetch = 0 : i64, scratch_operands = 0 : i64, tpu.core_type = #tpu.core_type<tc>, window_params = [{transform_indices = @transform_0, window_bounds = array<i64: 1, 128, 128>}, {transform_indices = @transform_1, window_bounds = array<i64: 1, 128, 128>}, {transform_indices = @transform_2, window_bounds = array<i64: 1, 128, 128>}, {pipeline_mode = #tpu.pipeline_mode<synchronous>, transform_indices = @transform_3, window_bounds = array<i64: 4, 128, 128>}, {pipeline_mode = #tpu.pipeline_mode<synchronous>, transform_indices = @transform_4, window_bounds = array<i64: 4, 1, 128>}, {transform_indices = @transform_5, window_bounds = array<i64: 1, 128, 128>}]} {
    %c0 = arith.constant 0 : index
    %c0_0 = arith.constant 0 : index
    %c0_1 = arith.constant 0 : index
    %0 = vector.load %arg4[%c0, %c0_0, %c0_1] : memref<4x128x128xbf16, #tpu.memory_space<vmem>>, vector<1x128x128xbf16>
    %1 = vector.shape_cast %0 : vector<1x128x128xbf16> to vector<128x128xbf16>
    %2 = arith.extf %1 : vector<128x128xbf16> to vector<128x128xf32>
    %cst = arith.constant 0.176776692 : f32
    %3 = vector.broadcast %cst : f32 to vector<128x128xf32>
    %4 = arith.mulf %2, %3 : vector<128x128xf32>
    %5 = arith.truncf %4 : vector<128x128xf32> to vector<128x128xbf16>
    %c1 = arith.constant 1 : index
    %c0_2 = arith.constant 0 : index
    %c0_3 = arith.constant 0 : index
    %6 = vector.load %arg4[%c1, %c0_2, %c0_3] : memref<4x128x128xbf16, #tpu.memory_space<vmem>>, vector<1x128x128xbf16>
    %7 = vector.shape_cast %6 : vector<1x128x128xbf16> to vector<128x128xbf16>
    %c2 = arith.constant 2 : index
    %c0_4 = arith.constant 0 : index
    %c0_5 = arith.constant 0 : index
    %8 = vector.load %arg4[%c2, %c0_4, %c0_5] : memref<4x128x128xbf16, #tpu.memory_space<vmem>>, vector<1x128x128xbf16>
    %9 = vector.shape_cast %8 : vector<1x128x128xbf16> to vector<128x128xbf16>
    %c3 = arith.constant 3 : index
    %c0_6 = arith.constant 0 : index
    %c0_7 = arith.constant 0 : index
    %10 = vector.load %arg4[%c3, %c0_6, %c0_7] : memref<4x128x128xbf16, #tpu.memory_space<vmem>>, vector<1x128x128xbf16>
    %11 = vector.shape_cast %10 : vector<1x128x128xbf16> to vector<128x128xbf16>
    %c0_8 = arith.constant 0 : index
    %c0_9 = arith.constant 0 : index
    %c0_10 = arith.constant 0 : index
    %12 = vector.load %arg5[%c0_8, %c0_9, %c0_10] : memref<4x1x128xf32, #tpu.memory_space<vmem>>, vector<1x1x128xf32>
    %13 = vector.shape_cast %12 : vector<1x1x128xf32> to vector<1x128xf32>
    %cst_11 = arith.constant 0.176776692 : f32
    %14 = vector.broadcast %cst_11 : f32 to vector<1x128xf32>
    %15 = arith.mulf %13, %14 : vector<1x128xf32>
    %c1_12 = arith.constant 1 : index
    %c0_13 = arith.constant 0 : index
    %c0_14 = arith.constant 0 : index
    %16 = vector.load %arg5[%c1_12, %c0_13, %c0_14] : memref<4x1x128xf32, #tpu.memory_space<vmem>>, vector<1x1x128xf32>
    %17 = vector.shape_cast %16 : vector<1x1x128xf32> to vector<1x128xf32>
    %c2_15 = arith.constant 2 : index
    %c0_16 = arith.constant 0 : index
    %c0_17 = arith.constant 0 : index
    %18 = vector.load %arg5[%c2_15, %c0_16, %c0_17] : memref<4x1x128xf32, #tpu.memory_space<vmem>>, vector<1x1x128xf32>
    %19 = vector.shape_cast %18 : vector<1x1x128xf32> to vector<1x128xf32>
    %c3_18 = arith.constant 3 : index
    %c0_19 = arith.constant 0 : index
    %c0_20 = arith.constant 0 : index
    %20 = vector.load %arg5[%c3_18, %c0_19, %c0_20] : memref<4x1x128xf32, #tpu.memory_space<vmem>>, vector<1x1x128xf32>
    %21 = vector.shape_cast %20 : vector<1x1x128xf32> to vector<1x128xf32>
    %22 = tpu.iota {dimensions = array<i32: 0>} : vector<128x128xi32>
    %23 = tpu.iota {dimensions = array<i32: 1>} : vector<128x128xi32>
    %24 = arith.cmpi sge, %22, %23 : vector<128x128xi32>
    %c0_21 = arith.constant 0 : index
    %c0_22 = arith.constant 0 : index
    %c0_23 = arith.constant 0 : index
    %25 = vector.load %arg1[%c0_21, %c0_22, %c0_23] : memref<1x128x128xbf16, #tpu.memory_space<vmem>>, vector<1x128x128xbf16>
    %26 = vector.shape_cast %25 : vector<1x128x128xbf16> to vector<128x128xbf16>
    %c0_24 = arith.constant 0 : index
    %c0_25 = arith.constant 0 : index
    %c0_26 = arith.constant 0 : index
    %27 = vector.load %arg2[%c0_24, %c0_25, %c0_26] : memref<1x128x128xbf16, #tpu.memory_space<vmem>>, vector<1x128x128xbf16>
    %28 = vector.shape_cast %27 : vector<1x128x128xbf16> to vector<128x128xbf16>
    %c0_27 = arith.constant 0 : index
    %c0_28 = arith.constant 0 : index
    %c0_29 = arith.constant 0 : index
    %29 = vector.load %arg3[%c0_27, %c0_28, %c0_29] : memref<1x128x128xbf16, #tpu.memory_space<vmem>>, vector<1x128x128xbf16>
    %30 = vector.shape_cast %29 : vector<1x128x128xbf16> to vector<128x128xbf16>
    %cst_30 = arith.constant dense<0.000000e+00> : vector<128x128xf32>
    %31 = tpu.matmul %26, %5, %cst_30 {dimension_numbers = #tpu.dot_dimension_numbers<[1], [0], [0], [1], [0, 0, 1, 1], [], []>} : vector<128x128xbf16>, vector<128x128xbf16>, vector<128x128xf32> -> vector<128x128xf32>
    %32 = vector.broadcast %15 : vector<1x128xf32> to vector<128x128xf32>
    %33 = arith.addf %31, %32 : vector<128x128xf32>
    %cst_31 = arith.constant dense<0.000000e+00> : vector<128x128xf32>
    %34 = tpu.matmul %28, %7, %cst_31 {dimension_numbers = #tpu.dot_dimension_numbers<[1], [0], [0], [1], [0, 0, 1, 1], [], []>} : vector<128x128xbf16>, vector<128x128xbf16>, vector<128x128xf32> -> vector<128x128xf32>
    %35 = vector.broadcast %17 : vector<1x128xf32> to vector<128x128xf32>
    %36 = arith.addf %34, %35 : vector<128x128xf32>
    %cst_32 = arith.constant dense<0.000000e+00> : vector<128x128xf32>
    %37 = tpu.matmul %30, %9, %cst_32 {dimension_numbers = #tpu.dot_dimension_numbers<[1], [0], [0], [1], [0, 0, 1, 1], [], []>} : vector<128x128xbf16>, vector<128x128xbf16>, vector<128x128xf32> -> vector<128x128xf32>
    %38 = vector.broadcast %19 : vector<1x128xf32> to vector<128x128xf32>
    %39 = arith.addf %37, %38 : vector<128x128xf32>
    %40 = vector.shape_cast %21 : vector<1x128xf32> to vector<1x128xf32>
    %41 = vector.broadcast %40 : vector<1x128xf32> to vector<128x128xf32>
    %42 = vector.extract_strided_slice %33 {offsets = [0, 0], sizes = [128, 32], strides = [1, 1]} : vector<128x128xf32> to vector<128x32xf32>
    %43 = arith.truncf %42 : vector<128x32xf32> to vector<128x32xbf16>
    %44 = vector.extract_strided_slice %36 {offsets = [0, 0], sizes = [128, 32], strides = [1, 1]} : vector<128x128xf32> to vector<128x32xf32>
    %45 = arith.truncf %44 : vector<128x32xf32> to vector<128x32xbf16>
    %46 = vector.extract_strided_slice %39 {offsets = [0, 0], sizes = [128, 32], strides = [1, 1]} : vector<128x128xf32> to vector<128x32xf32>
    %47 = arith.truncf %46 : vector<128x32xf32> to vector<128x32xbf16>
    %cst_33 = arith.constant dense<0.000000e+00> : vector<128x128xf32>
    %48 = tpu.matmul %43, %45, %cst_33 {dimension_numbers = #tpu.dot_dimension_numbers<[1], [1], [0], [0], [0, 0, 1, 0], [], []>} : vector<128x32xbf16>, vector<128x32xbf16>, vector<128x128xf32> -> vector<128x128xf32>
    %cst_34 = arith.constant -1.000000e+09 : f32
    %49 = vector.broadcast %cst_34 : f32 to vector<128x128xf32>
    %50 = arith.select %24, %48, %49 : vector<128x128xi1>, vector<128x128xf32>
    %cst_35 = arith.constant dense<0xFF800000> : vector<128xf32>
    %51 = vector.multi_reduction <maximumf>, %50, %cst_35 [1] : vector<128x128xf32> to vector<128xf32>
    %52 = vector.shape_cast %51 : vector<128xf32> to vector<128x1xf32>
    %53 = vector.broadcast %52 : vector<128x1xf32> to vector<128x128xf32>
    %54 = arith.subf %50, %53 : vector<128x128xf32>
    %55 = math.exp %54 : vector<128x128xf32>
    %cst_36 = arith.constant dense<0.000000e+00> : vector<128xf32>
    %56 = vector.multi_reduction <add>, %55, %cst_36 [1] : vector<128x128xf32> to vector<128xf32>
    %57 = vector.shape_cast %56 : vector<128xf32> to vector<128x1xf32>
    %58 = tpu.reciprocal %57 {approx = true} : vector<128x1xf32> -> vector<128x1xf32>
    %59 = vector.broadcast %58 : vector<128x1xf32> to vector<128x128xf32>
    %60 = arith.mulf %55, %59 : vector<128x128xf32>
    %61 = arith.truncf %60 : vector<128x128xf32> to vector<128x128xbf16>
    %cst_37 = arith.constant dense<0.000000e+00> : vector<128x32xf32>
    %62 = tpu.matmul %61, %47, %cst_37 {dimension_numbers = #tpu.dot_dimension_numbers<[1], [0], [0], [1], [0, 0, 1, 1], [], []>} : vector<128x128xbf16>, vector<128x32xbf16>, vector<128x32xf32> -> vector<128x32xf32>
    %63 = arith.truncf %62 : vector<128x32xf32> to vector<128x32xbf16>
    %64 = vector.extract_strided_slice %11 {offsets = [0, 0], sizes = [32, 128], strides = [1, 1]} : vector<128x128xbf16> to vector<32x128xbf16>
    %cst_38 = arith.constant dense<0.000000e+00> : vector<128x128xf32>
    %65 = tpu.matmul %63, %64, %cst_38 {dimension_numbers = #tpu.dot_dimension_numbers<[1], [0], [0], [1], [0, 0, 1, 1], [], []>} : vector<128x32xbf16>, vector<32x128xbf16>, vector<128x128xf32> -> vector<128x128xf32>
    %66 = arith.addf %41, %65 : vector<128x128xf32>
    %67 = vector.extract_strided_slice %33 {offsets = [0, 32], sizes = [128, 32], strides = [1, 1]} : vector<128x128xf32> to vector<128x32xf32>
    %68 = arith.truncf %67 : vector<128x32xf32> to vector<128x32xbf16>
    %69 = vector.extract_strided_slice %36 {offsets = [0, 32], sizes = [128, 32], strides = [1, 1]} : vector<128x128xf32> to vector<128x32xf32>
    %70 = arith.truncf %69 : vector<128x32xf32> to vector<128x32xbf16>
    %71 = vector.extract_strided_slice %39 {offsets = [0, 32], sizes = [128, 32], strides = [1, 1]} : vector<128x128xf32> to vector<128x32xf32>
    %72 = arith.truncf %71 : vector<128x32xf32> to vector<128x32xbf16>
    %cst_39 = arith.constant dense<0.000000e+00> : vector<128x128xf32>
    %73 = tpu.matmul %68, %70, %cst_39 {dimension_numbers = #tpu.dot_dimension_numbers<[1], [1], [0], [0], [0, 0, 1, 0], [], []>} : vector<128x32xbf16>, vector<128x32xbf16>, vector<128x128xf32> -> vector<128x128xf32>
    %cst_40 = arith.constant -1.000000e+09 : f32
    %74 = vector.broadcast %cst_40 : f32 to vector<128x128xf32>
    %75 = arith.select %24, %73, %74 : vector<128x128xi1>, vector<128x128xf32>
    %cst_41 = arith.constant dense<0xFF800000> : vector<128xf32>
    %76 = vector.multi_reduction <maximumf>, %75, %cst_41 [1] : vector<128x128xf32> to vector<128xf32>
    %77 = vector.shape_cast %76 : vector<128xf32> to vector<128x1xf32>
    %78 = vector.broadcast %77 : vector<128x1xf32> to vector<128x128xf32>
    %79 = arith.subf %75, %78 : vector<128x128xf32>
    %80 = math.exp %79 : vector<128x128xf32>
    %cst_42 = arith.constant dense<0.000000e+00> : vector<128xf32>
    %81 = vector.multi_reduction <add>, %80, %cst_42 [1] : vector<128x128xf32> to vector<128xf32>
    %82 = vector.shape_cast %81 : vector<128xf32> to vector<128x1xf32>
    %83 = tpu.reciprocal %82 {approx = true} : vector<128x1xf32> -> vector<128x1xf32>
    %84 = vector.broadcast %83 : vector<128x1xf32> to vector<128x128xf32>
    %85 = arith.mulf %80, %84 : vector<128x128xf32>
    %86 = arith.truncf %85 : vector<128x128xf32> to vector<128x128xbf16>
    %cst_43 = arith.constant dense<0.000000e+00> : vector<128x32xf32>
    %87 = tpu.matmul %86, %72, %cst_43 {dimension_numbers = #tpu.dot_dimension_numbers<[1], [0], [0], [1], [0, 0, 1, 1], [], []>} : vector<128x128xbf16>, vector<128x32xbf16>, vector<128x32xf32> -> vector<128x32xf32>
    %88 = arith.truncf %87 : vector<128x32xf32> to vector<128x32xbf16>
    %89 = vector.extract_strided_slice %11 {offsets = [32, 0], sizes = [32, 128], strides = [1, 1]} : vector<128x128xbf16> to vector<32x128xbf16>
    %cst_44 = arith.constant dense<0.000000e+00> : vector<128x128xf32>
    %90 = tpu.matmul %88, %89, %cst_44 {dimension_numbers = #tpu.dot_dimension_numbers<[1], [0], [0], [1], [0, 0, 1, 1], [], []>} : vector<128x32xbf16>, vector<32x128xbf16>, vector<128x128xf32> -> vector<128x128xf32>
    %91 = arith.addf %66, %90 : vector<128x128xf32>
    %92 = vector.extract_strided_slice %33 {offsets = [0, 64], sizes = [128, 32], strides = [1, 1]} : vector<128x128xf32> to vector<128x32xf32>
    %93 = arith.truncf %92 : vector<128x32xf32> to vector<128x32xbf16>
    %94 = vector.extract_strided_slice %36 {offsets = [0, 64], sizes = [128, 32], strides = [1, 1]} : vector<128x128xf32> to vector<128x32xf32>
    %95 = arith.truncf %94 : vector<128x32xf32> to vector<128x32xbf16>
    %96 = vector.extract_strided_slice %39 {offsets = [0, 64], sizes = [128, 32], strides = [1, 1]} : vector<128x128xf32> to vector<128x32xf32>
    %97 = arith.truncf %96 : vector<128x32xf32> to vector<128x32xbf16>
    %cst_45 = arith.constant dense<0.000000e+00> : vector<128x128xf32>
    %98 = tpu.matmul %93, %95, %cst_45 {dimension_numbers = #tpu.dot_dimension_numbers<[1], [1], [0], [0], [0, 0, 1, 0], [], []>} : vector<128x32xbf16>, vector<128x32xbf16>, vector<128x128xf32> -> vector<128x128xf32>
    %cst_46 = arith.constant -1.000000e+09 : f32
    %99 = vector.broadcast %cst_46 : f32 to vector<128x128xf32>
    %100 = arith.select %24, %98, %99 : vector<128x128xi1>, vector<128x128xf32>
    %cst_47 = arith.constant dense<0xFF800000> : vector<128xf32>
    %101 = vector.multi_reduction <maximumf>, %100, %cst_47 [1] : vector<128x128xf32> to vector<128xf32>
    %102 = vector.shape_cast %101 : vector<128xf32> to vector<128x1xf32>
    %103 = vector.broadcast %102 : vector<128x1xf32> to vector<128x128xf32>
    %104 = arith.subf %100, %103 : vector<128x128xf32>
    %105 = math.exp %104 : vector<128x128xf32>
    %cst_48 = arith.constant dense<0.000000e+00> : vector<128xf32>
    %106 = vector.multi_reduction <add>, %105, %cst_48 [1] : vector<128x128xf32> to vector<128xf32>
    %107 = vector.shape_cast %106 : vector<128xf32> to vector<128x1xf32>
    %108 = tpu.reciprocal %107 {approx = true} : vector<128x1xf32> -> vector<128x1xf32>
    %109 = vector.broadcast %108 : vector<128x1xf32> to vector<128x128xf32>
    %110 = arith.mulf %105, %109 : vector<128x128xf32>
    %111 = arith.truncf %110 : vector<128x128xf32> to vector<128x128xbf16>
    %cst_49 = arith.constant dense<0.000000e+00> : vector<128x32xf32>
    %112 = tpu.matmul %111, %97, %cst_49 {dimension_numbers = #tpu.dot_dimension_numbers<[1], [0], [0], [1], [0, 0, 1, 1], [], []>} : vector<128x128xbf16>, vector<128x32xbf16>, vector<128x32xf32> -> vector<128x32xf32>
    %113 = arith.truncf %112 : vector<128x32xf32> to vector<128x32xbf16>
    %114 = vector.extract_strided_slice %11 {offsets = [64, 0], sizes = [32, 128], strides = [1, 1]} : vector<128x128xbf16> to vector<32x128xbf16>
    %cst_50 = arith.constant dense<0.000000e+00> : vector<128x128xf32>
    %115 = tpu.matmul %113, %114, %cst_50 {dimension_numbers = #tpu.dot_dimension_numbers<[1], [0], [0], [1], [0, 0, 1, 1], [], []>} : vector<128x32xbf16>, vector<32x128xbf16>, vector<128x128xf32> -> vector<128x128xf32>
    %116 = arith.addf %91, %115 : vector<128x128xf32>
    %117 = vector.extract_strided_slice %33 {offsets = [0, 96], sizes = [128, 32], strides = [1, 1]} : vector<128x128xf32> to vector<128x32xf32>
    %118 = arith.truncf %117 : vector<128x32xf32> to vector<128x32xbf16>
    %119 = vector.extract_strided_slice %36 {offsets = [0, 96], sizes = [128, 32], strides = [1, 1]} : vector<128x128xf32> to vector<128x32xf32>
    %120 = arith.truncf %119 : vector<128x32xf32> to vector<128x32xbf16>
    %121 = vector.extract_strided_slice %39 {offsets = [0, 96], sizes = [128, 32], strides = [1, 1]} : vector<128x128xf32> to vector<128x32xf32>
    %122 = arith.truncf %121 : vector<128x32xf32> to vector<128x32xbf16>
    %cst_51 = arith.constant dense<0.000000e+00> : vector<128x128xf32>
    %123 = tpu.matmul %118, %120, %cst_51 {dimension_numbers = #tpu.dot_dimension_numbers<[1], [1], [0], [0], [0, 0, 1, 0], [], []>} : vector<128x32xbf16>, vector<128x32xbf16>, vector<128x128xf32> -> vector<128x128xf32>
    %cst_52 = arith.constant -1.000000e+09 : f32
    %124 = vector.broadcast %cst_52 : f32 to vector<128x128xf32>
    %125 = arith.select %24, %123, %124 : vector<128x128xi1>, vector<128x128xf32>
    %cst_53 = arith.constant dense<0xFF800000> : vector<128xf32>
    %126 = vector.multi_reduction <maximumf>, %125, %cst_53 [1] : vector<128x128xf32> to vector<128xf32>
    %127 = vector.shape_cast %126 : vector<128xf32> to vector<128x1xf32>
    %128 = vector.broadcast %127 : vector<128x1xf32> to vector<128x128xf32>
    %129 = arith.subf %125, %128 : vector<128x128xf32>
    %130 = math.exp %129 : vector<128x128xf32>
    %cst_54 = arith.constant dense<0.000000e+00> : vector<128xf32>
    %131 = vector.multi_reduction <add>, %130, %cst_54 [1] : vector<128x128xf32> to vector<128xf32>
    %132 = vector.shape_cast %131 : vector<128xf32> to vector<128x1xf32>
    %133 = tpu.reciprocal %132 {approx = true} : vector<128x1xf32> -> vector<128x1xf32>
    %134 = vector.broadcast %133 : vector<128x1xf32> to vector<128x128xf32>
    %135 = arith.mulf %130, %134 : vector<128x128xf32>
    %136 = arith.truncf %135 : vector<128x128xf32> to vector<128x128xbf16>
    %cst_55 = arith.constant dense<0.000000e+00> : vector<128x32xf32>
    %137 = tpu.matmul %136, %122, %cst_55 {dimension_numbers = #tpu.dot_dimension_numbers<[1], [0], [0], [1], [0, 0, 1, 1], [], []>} : vector<128x128xbf16>, vector<128x32xbf16>, vector<128x32xf32> -> vector<128x32xf32>
    %138 = arith.truncf %137 : vector<128x32xf32> to vector<128x32xbf16>
    %139 = vector.extract_strided_slice %11 {offsets = [96, 0], sizes = [32, 128], strides = [1, 1]} : vector<128x128xbf16> to vector<32x128xbf16>
    %cst_56 = arith.constant dense<0.000000e+00> : vector<128x128xf32>
    %140 = tpu.matmul %138, %139, %cst_56 {dimension_numbers = #tpu.dot_dimension_numbers<[1], [0], [0], [1], [0, 0, 1, 1], [], []>} : vector<128x32xbf16>, vector<32x128xbf16>, vector<128x128xf32> -> vector<128x128xf32>
    %141 = arith.addf %116, %140 : vector<128x128xf32>
    %c0_57 = arith.constant 0 : index
    %c0_58 = arith.constant 0 : index
    %c0_59 = arith.constant 0 : index
    %142 = vector.load %arg6[%c0_57, %c0_58, %c0_59] : memref<1x128x128xf32, #tpu.memory_space<vmem>>, vector<1x128x128xf32>
    %143 = vector.shape_cast %142 : vector<1x128x128xf32> to vector<128x128xf32>
    %144 = vector.shape_cast %141 : vector<128x128xf32> to vector<1x128x128xf32>
    tpu.vector_store %arg6[%c0_57, %c0_58, %c0_59], %144 {strides = array<i32>} : memref<1x128x128xf32, #tpu.memory_space<vmem>>, vector<1x128x128xf32>,
    return
  }
  func.func @transform_0(%arg0: i32) -> (i32, i32, i32) {
    %c0_i32 = arith.constant 0 : i32
    %c0_i32_0 = arith.constant 0 : i32
    %c0_i32_1 = arith.constant 0 : i32
    return %arg0, %c0_i32, %c0_i32_0 : i32, i32, i32
  }
  func.func @transform_1(%arg0: i32) -> (i32, i32, i32) {
    %c0_i32 = arith.constant 0 : i32
    %c0_i32_0 = arith.constant 0 : i32
    %c0_i32_1 = arith.constant 0 : i32
    return %arg0, %c0_i32, %c0_i32_0 : i32, i32, i32
  }
  func.func @transform_2(%arg0: i32) -> (i32, i32, i32) {
    %c0_i32 = arith.constant 0 : i32
    %c0_i32_0 = arith.constant 0 : i32
    %c0_i32_1 = arith.constant 0 : i32
    return %arg0, %c0_i32, %c0_i32_0 : i32, i32, i32
  }
  func.func @transform_3(%arg0: i32) -> (i32, i32, i32) {
    %c0_i32 = arith.constant 0 : i32
    %c0_i32_0 = arith.constant 0 : i32
    %c0_i32_1 = arith.constant 0 : i32
    %c0_i32_2 = arith.constant 0 : i32
    return %c0_i32, %c0_i32_0, %c0_i32_1 : i32, i32, i32
  }
  func.func @transform_4(%arg0: i32) -> (i32, i32, i32) {
    %c0_i32 = arith.constant 0 : i32
    %c0_i32_0 = arith.constant 0 : i32
    %c0_i32_1 = arith.constant 0 : i32
    %c0_i32_2 = arith.constant 0 : i32
    return %c0_i32, %c0_i32_0, %c0_i32_1 : i32, i32, i32
  }
  func.func @transform_5(%arg0: i32) -> (i32, i32, i32) {
    %c0_i32 = arith.constant 0 : i32
    %c0_i32_0 = arith.constant 0 : i32
    %c0_i32_1 = arith.constant 0 : i32
    return %arg0, %c0_i32, %c0_i32_0 : i32, i32, i32
  }
}

</mosaic_0001>

<bundles_post_ra>
// kernel: tpu_custom_call.1
= control target key start
LH: loop header
LB: loop body
LE: loop exit
PB: predicated region body
PF: predicated region fallthrough
CT: control target
= control target key end

     0   :  { %s6981_s0 = inlined_call_operand.hbm [shape: bf16[2,128,128], index: 0, kind: input, shape index: {}]   ;;  %s6982_s1 = inlined_call_operand.hbm [shape: bf16[2,128,128], index: 1, kind: input, shape index: {}]   ;;  %s6983_s2 = inlined_call_operand.hbm [shape: bf16[2,128,128], index: 2, kind: input, shape index: {}]   ;;  %s6984_s3 = inlined_call_operand.hbm [shape: bf16[4,128,128], index: 3, kind: input, shape index: {}]   ;;  %s6985_s4 = inlined_call_operand.vmem [shape: f32[4,1,128], index: 4, kind: input, shape index: {}]   ;;  %s6986_s5 = inlined_call_operand.hbm [shape: f32[2,128,128], index: 5, kind: output, shape index: {}]  }
   0x1   :  { %7043 = sst [smem:[#allocation47_spill]] %s6982_s1 }
   0x2   :  { %10 = vsyncpa [#allocation3], 0 }
   0x3   :  { %12 = vsyncpa [#allocation3 + $0x1], 0 }
   0x4   :  { %13 = vsyncpa [#allocation6], 0 }
   0x5   :  { %15 = vsyncpa [#allocation6 + $0x1], 0 }
   0x6   :  { %16 = vsyncpa [#allocation9], 0 }
   0x7   :  { %17 = vsyncpa [#allocation4], 0 }
   0x8   :  { %19 = vsyncpa [#allocation4 + $0x1], 0  ;;  %s5215_s18 = smov 0   ;;  %s5217_s19 = smov 0  }
   0x9   :  { %s5219_s20 = smov 0   ;;  %s5221_s21 = smov 0  }
   0xa LB: > { %7044 = sst [smem:[#allocation15_spill]] %s5167_s20  ;;  %s5236_s22 = sadd.s32 1, %s5171_s21   ;;  %s5171_s21 = sphi %s5221_s21, %s7144_s21   ;;  %s5167_s20 = sphi %s5219_s20, %s7146_s20   ;;  %s5163_s19 = sphi %s5217_s19, %s7148_s19   ;;  %s5159_s18 = sphi %s5215_s18, %s7147_s18  }
   0xb   : > { %7045 = sst [smem:[#allocation16_spill]] %s5236_s22  ;;  %s32_s23 = sadd.s32 1, %s5167_s20 }
   0xc   : > { %s29_s24 = ssub.s32 %s5171_s21, %s5236_s22  ;;  %p6987_p0 = scmp.ne.s32.totalorder %s5167_s20, %s5163_s19 }
   0xd   : > { %p30_p1 = scmp.eq.s32.totalorder %s29_s24, 0  ;;  %p40_p2 = scmp.eq.s32.totalorder %s5171_s21, 0 }
   0xe   : > { %p4642_p5 = scmp.lt.s32.totalorder %s5171_s21, 2  ;;  %s205_s26 = sand.u32 1, %s5167_s20  }
   0xf   : > { %s5245_s25 = scalar_select %p30_p1, %s5167_s20, %s32_s23  }
  0x10   : > { %p41_p3 = por %p40_p2, %p6987_p0  ;;  %s5255_s27 = sshll.u32 %s205_s26, 6 }
  0x11   : > { %7046 = sst [smem:[#allocation17_spill]] %s5245_s25  ;;  %s5258_s28 = sshll.u32 %s5171_s21, 10 }
  0x12   : > { %p5260_p6 = pnand %p4642_p5, %p41_p3  ;;  %s226_s30 = sand.u32 1, %s5171_s21  }
  0x13   : > { %s7048_s1 = sld [smem:[#allocation47_spill]]  ;;  %s230_s9 = scalar_lea.vmem [#allocation5], %s5255_s27 }
  0x14   : > { %s237_s10 = sshll.u32 %s230_s9, 4  ;;  %s5274_s11 = scalar_lea.sflag [#allocation6], %s226_s30  ;;  %s5272_s10 = int_to_ptr.vmem [resolvable:$true] %s237_s10 }
  0x15   : > { %p5280_p8 = pneg %p5260_p6 }
  0x19   : > { %s5269_s8 = scalar_lea.hbm %s7048_s1, %s5258_s28  ;;  %s4994_s16 = scalar_lea.hbm %s7048_s1, 2048 }
  0x1a   : > { %s4989_s12 = scalar_lea.hbm %s5269_s8, 1024  ;;  %p4995_p11 = scmp.lt.s32.totalorder %s5269_s8, %s7048_s1 }
  0x1b   : > { %p4990_p7 = scmp.ne.s32.totalorder %s5269_s8, %s4989_s12  ;;  %p4996_p12 = scmp.lt.s32.totalorder %s4994_s16, %s4989_s12 }
  0x1d   : > { %p4992_p9 = pnand %p5280_p8, %p4990_p7  ;;  %p4997_p13 = por %p4996_p12, %p4995_p11 }
  0x1f   : > { %p4993_p10 = pneg %p4992_p9 }
  0x21   : > { %p4998_p1 = pnand %p4997_p13, %p4993_p10 }
  0x23   : > { %5001 = shalt.err (!%p4998_p1)
}
  0x24   : > { %s5002_s24 = scalar_lea.vmem %s5272_s10, 1024  ;;  %s5173_s30 = smov [#allocation5]  }
  0x25   : > { %p5003_p2 = scmp.ne.s32.totalorder %s5272_s10, %s5002_s24  ;;  %s5007_s6 = sshll.u32 %s5173_s30, 4  ;;  %s5008_s6 = int_to_ptr.vmem [resolvable:$false] %s5007_s6 }
  0x26   : > { %s5009_s7 = scalar_lea.vmem %s5008_s6, 2048  ;;  %p5010_p7 = scmp.lt.s32.totalorder %s5272_s10, %s5008_s6 }
  0x27   : > { %p5005_p3 = pnand %p5003_p2, %p5280_p8  ;;  %p5011_p9 = scmp.lt.s32.totalorder %s5009_s7, %s5002_s24 }
  0x29   : > { %p5006_p5 = pneg %p5005_p3  ;;  %p5012_p4 = por %p5011_p9, %p5010_p7 }
  0x2b   : > { %p5013_p0 = pnand %p5012_p4, %p5006_p5 }
  0x2d   : > { %5016 = shalt.err (!%p5013_p0)
}
  0x2e   : > { %s6988_s9 = smov 64   ;;  %s6990_s12 = smov 4  }
  0x2f   : > { %4633 = dma.hbm_to_vmem [thread:$0]  (!%p5260_p6), %s5269_s8, 1024, %s5272_s10, %s5274_s11, %s6988_s9, %s6988_s9, %s6990_s12  }
  0x30   : > { %s5307_s14 = sadd.s32 4294967295, %s5171_s21   ;;  %s3730_s15 = sadd.s32 4294967294, %s5171_s21  }
  0x31   : > { %p45_p0 = scmp.ne.s32.totalorder %s5163_s19, %s5159_s18  ;;  %p6994_p4 = scmp.eq.s32.totalorder %s5307_s14, 0 }
  0x32   : > { %p163_p10 = scmp.eq.s32.totalorder %s5307_s14, 1  ;;  %p169_p11 = scmp.eq.s32.totalorder %s3730_s15, 1 }
  0x33   : > { %p5316_p12 = por %p6994_p4, %p45_p0  ;;  %p3731_p13 = scmp.ge.s32.totalorder %s5171_s21, 1 }
  0x34   : > { %p7051_p1 = scmp.ne.s32.totalorder %s5167_s20, %s5163_s19  ;;  %p5328_p3 = por %p169_p11, %p45_p0 }
  0x35   : > { %s7050_s16 = scalar_select %p5316_p12, 1, 0 }
  0x36   : > { %p5324_p2 = por %p163_p10, %p7051_p1  ;;  %p176_p5 = scmp.lt.s32.totalorder %s5171_s21, 3 }
  0x37   : > { %s7053_s10 = scalar_select %p5328_p3, 1, 0 }
  0x38   : > { %s7052_s8 = scalar_select %p5324_p2, 1, 0 }
  0x39   : > { %p5333_p7 = pnand %p3731_p13, %p176_p5  ;;  %s5176_s23 = smov [#allocation8]  }
  0x3a   : > { %s188_s24 = sshll.u32 %s5176_s23, 4  ;;  %s5345_s7 = scalar_lea.hbm %s6981_s0, %s5258_s28  ;;  %s5337_s24 = int_to_ptr.vmem [resolvable:$true] %s188_s24 }
  0x3b   : > { %s7054_s17 = scalar_select %p5333_p7, 1, 0 }
  0x3c   : > { %p4623_p9 = pneg %p5333_p7  ;;  %s209_s15 = scalar_lea.vmem [#allocation2], %s5255_s27 }
  0x3d   : > { %s216_s9 = sshll.u32 %s209_s15, 4  ;;  %s206_s23 = scalar_lea.sflag [#allocation3], %s205_s26  ;;  %s5354_s9 = int_to_ptr.vmem [resolvable:$true] %s216_s9 }
  0x3e   : > { %p5350_p0 = pnand %p4623_p9, %p6994_p4  ;;  %s5017_s1 = scalar_lea.hbm %s5345_s7, 1024 }
  0x3f   : > { %p5018_p10 = scmp.ne.s32.totalorder %s5345_s7, %s5017_s1  ;;  %s5022_s25 = scalar_lea.hbm %s6981_s0, 2048 }
  0x40   : > { %s7055_s12 = scalar_select %p5350_p0, 1, 0 }
  0x41   : > { %p5020_p11 = pnand %p5018_p10, %p5280_p8  ;;  %p5023_p1 = scmp.lt.s32.totalorder %s5345_s7, %s6981_s0 }
  0x42   : > { %p5024_p5 = scmp.lt.s32.totalorder %s5022_s25, %s5017_s1 }
  0x43   : > { %p5021_p13 = pneg %p5020_p11 }
  0x44   : > { %p5025_p9 = por %p5024_p5, %p5023_p1 }
  0x46   : > { %p5026_p4 = pnand %p5025_p9, %p5021_p13 }
  0x48   : > { %5029 = shalt.err (!%p5026_p4)
}
  0x49   : > { %s5030_s26 = scalar_lea.vmem %s5354_s9, 1024  ;;  %s5177_s20 = smov [#allocation2]  }
  0x4a   : > { %p5031_p3 = scmp.ne.s32.totalorder %s5354_s9, %s5030_s26  ;;  %s5035_s30 = sshll.u32 %s5177_s20, 4  ;;  %s5036_s30 = int_to_ptr.vmem [resolvable:$false] %s5035_s30 }
  0x4b   : > { %s5037_s6 = scalar_lea.vmem %s5036_s30, 2048  ;;  %p5038_p2 = scmp.lt.s32.totalorder %s5354_s9, %s5036_s30 }
  0x4c   : > { %p5033_p10 = pnand %p5031_p3, %p5280_p8  ;;  %p5039_p12 = scmp.lt.s32.totalorder %s5037_s6, %s5030_s26 }
  0x4e   : > { %p5034_p11 = pneg %p5033_p10  ;;  %p5040_p7 = por %p5039_p12, %p5038_p2 }
  0x50   : > { %p5041_p0 = pnand %p5040_p7, %p5034_p11 }
  0x52   : > { %5044 = shalt.err (!%p5041_p0)
}
  0x53   : > { %s7056_s1 = smov 4   ;;  %s7057_s22 = smov 64  }
  0x54   : > { %4630 = dma.hbm_to_vmem [thread:$0]  (!%p5260_p6), %s5345_s7, 1024, %s5354_s9, %s206_s23, %s7057_s22, %s7057_s22, %s7056_s1  }
  0x55   : > { %s5385_s15 = scalar_lea.hbm %s6983_s2, %s5258_s28  ;;  %p7058_p4 = scmp.ne.s32.totalorder %s7055_s12, 0 }
  0x56   : > { %s5056_s26 = scalar_lea.vmem %s5337_s24, 4096  ;;  %p5064_p0 = scmp.lt.s32.totalorder %s5337_s24, %s5337_s24 }
  0x57   : > { %p5047_p12 = pneg %p7058_p4  ;;  %p5057_p2 = scmp.ne.s32.totalorder %s5337_s24, %s5056_s26 }
  0x58   : > { %p5065_p13 = scmp.lt.s32.totalorder %s5056_s26, %s5056_s26 }
  0x59   : > { %p5059_p3 = pnand %p5057_p2, %p5047_p12 }
  0x5a   : > { %p5066_p1 = por %p5065_p13, %p5064_p0 }
  0x5b   : > { %p5060_p7 = pneg %p5059_p3 }
  0x5d   : > { %p5067_p5 = pnand %p5066_p1, %p5060_p7 }
  0x5f   : > { %5070 = shalt.err (!%p5067_p5)
}
  0x60   : > { %4626 = dma.hbm_to_vmem [thread:$0]  (!%p7058_p4), %s6984_s3, 4096, %s5337_s24, [#allocation9], %s7057_s22, %s7057_s22, %s7056_s1  }
  0x61   : > { %s251_s7 = scalar_lea.vmem [#allocation7], %s5255_s27  ;;  %s5071_s30 = scalar_lea.hbm %s5385_s15, 1024 }
  0x62   : > { %s258_s23 = sshll.u32 %s251_s7, 4  ;;  %p5072_p9 = scmp.ne.s32.totalorder %s5385_s15, %s5071_s30  ;;  %s259_s23 = int_to_ptr.vmem [resolvable:$true] %s258_s23 }
  0x63   : > { %s5076_s20 = scalar_lea.hbm %s6983_s2, 2048  ;;  %p5077_p12 = scmp.lt.s32.totalorder %s5385_s15, %s6983_s2 }
  0x64   : > { %p5074_p10 = pnand %p5072_p9, %p5280_p8  ;;  %p5078_p2 = scmp.lt.s32.totalorder %s5076_s20, %s5071_s30 }
  0x66   : > { %p5075_p11 = pneg %p5074_p10  ;;  %p5079_p3 = por %p5078_p2, %p5077_p12 }
  0x68   : > { %p5080_p7 = pnand %p5079_p3, %p5075_p11 }
  0x6a   : > { %5083 = shalt.err (!%p5080_p7)
}
  0x6b   : > { %s5084_s27 = scalar_lea.vmem %s259_s23, 1024  ;;  %s5178_s24 = smov [#allocation7]  }
  0x6c   : > { %p5085_p4 = scmp.ne.s32.totalorder %s259_s23, %s5084_s27  ;;  %s5089_s28 = sshll.u32 %s5178_s24, 4  ;;  %s5090_s28 = int_to_ptr.vmem [resolvable:$false] %s5089_s28 }
  0x6d   : > { %s5091_s9 = scalar_lea.vmem %s5090_s28, 2048  ;;  %p5092_p1 = scmp.lt.s32.totalorder %s259_s23, %s5090_s28 }
  0x6e   : > { %p5087_p0 = pnand %p5085_p4, %p5280_p8  ;;  %p5093_p5 = scmp.lt.s32.totalorder %s5091_s9, %s5084_s27 }
  0x70   : > { %p5088_p13 = pneg %p5087_p0  ;;  %p5094_p9 = por %p5093_p5, %p5092_p1 }
  0x72   : > { %p5095_p10 = pnand %p5094_p9, %p5088_p13 }
  0x74   : > { %5098 = shalt.err (!%p5095_p10)
}
  0x75   : > { %4636 = dma.hbm_to_vmem [thread:$0]  (!%p5260_p6), %s5385_s15, 1024, %s259_s23, %s5274_s11, %s7057_s22, %s7057_s22, %s7056_s1  }
  0x76   : > { %p7059_p8 = scmp.ne.s32.totalorder %s7054_s17, 0 }
  0x78   : > { %270 = sbr.rel (%p7059_p8) target bundleno = 2372 (0x944), region = 40 }
  0x7d   : > { %s5426_s13 = sand.u32 1, %s5163_s19   ;;  %p7060_p11 = scmp.ne.s32.totalorder %s7050_s16, 0 }
  0x7e   : > { %s3744_s7 = sshll.u32 %s5426_s13, 6  ;;  %s273_s30 = scalar_lea.sflag [#allocation3], %s5426_s13 }
  0x7f   : > { %s5430_s12 = scalar_lea.vmem [#allocation2], %s3744_s7 }
  0x80   : > { %5142 = dma.done.wait (%p7060_p11), %s273_s30, 1024  }
  0x81   : > { %5144 = vsyncadd (%p7060_p11), %s273_s30, 4294966272  ;;  %s281_s29 = sand.u32 1, %s5307_s14   ;;  %s5437_s17 = scalar_lea.vmem [#allocation5], %s3744_s7 }
  0x82   : > { %s282_s11 = scalar_lea.sflag [#allocation6], %s281_s29 }
  0x83   : > { %5146 = dma.done.wait (%p7060_p11), %s282_s11, 2048  }
  0x84   : > { %5148 = vsyncadd (%p7060_p11), %s282_s11, 4294965248  ;;  %s5443_s1 = scalar_lea.vmem [#allocation7], %s3744_s7  ;;  %p7061_p6 = scmp.eq.s32.totalorder %s5307_s14, 0 }
  0x86   : > { %5150 = dma.done.wait (%p7061_p6), [#allocation9], 4096   ;;  %p7062_p12 = pmov %p7061_p6 }
  0x87   : > { %v4685_v0 = vld [vmem:[#allocation8 + $0x78] sm:$0xff]   ;;  %v4686_v1 = vld [vmem:[#allocation8 + $0x70] sm:$0xff]   ;;  %v4687_v2 = vld [vmem:[#allocation8 + $0x68] sm:$0xff]   ;;  %vm1113_vm0 = vcmask 261120   ;;  %s5179_s6 = smov 96   ;;  %s5180_s20 = smov 64  }
  0x88   : > { %5152 = vsyncadd (%p7062_p12), [#allocation9], 4294963200  ;;  %4163 = vmatprep.subr.bf16.mxu1 %v4685_v0  ;;  %v3914_v3 = vld [vmem:[#allocation8 + $0x38] sm:$0xff]   ;;  %v3913_v6 = vld [vmem:[#allocation8 + $0x30] sm:$0xff]   ;;  %s5181_s27 = smov 32   ;;  %s3748_s9 = sshll.u32 %s5426_s13, 7 }
  0x89   : > { %4164 = vmatpush3.bf16.msra.mxu1 %v4685_v0  ;;  %v3906_v4 = vunpack.c.l.bf16 %v3914_v3  ;;  %v3907_v5 = vunpack.c.h.bf16 %v3914_v3  ;;  %v4688_v7 = vld [vmem:[#allocation8 + $0x60] sm:$0xff]   ;;  %v3902_v8 = vunpack.c.l.bf16 %v3913_v6  ;;  %v3903_v9 = vunpack.c.h.bf16 %v3913_v6  ;;  %v3912_v15 = vld [vmem:[#allocation8 + $0x28] sm:$0xff]   ;;  %v4689_v16 = vld [vmem:[#allocation8 + $0x58] sm:$0xff]   ;;  %s6897_s7 = scalar_lea.vmem [#allocation10], %s3748_s9  ;;  %s3875_s30 = sshll.u32 %s5307_s14, 11 }
  0x8a   : > { %4165 = vmatprep.subr.bf16.mxu1 %v4686_v1  ;;  %v4693_v14 = vld [vmem:[%s5437_s17] sm:$0xff]   ;;  %v3898_v18 = vunpack.c.l.bf16 %v3912_v15  ;;  %v3899_v19 = vunpack.c.h.bf16 %v3912_v15  ;;  %v3910_v26 = vld [vmem:[#allocation8 + $0x18] sm:$0xff]   ;;  %v3909_v32 = vld [vmem:[#allocation8 + $0x10] sm:$0xff]   ;;  %s3591_s14 = scalar_lea.sflag [#allocation4], %s5426_s13  ;;  %p7141_p3 = scmp.ne.s32.totalorder %s7052_s8, 0 }
  0x8b   : > { %v382_v10 = vmul.f32 0.17677669, %v3906_v4  ;;  %v383_v11 = vmul.f32 0.17677669, %v3907_v5  ;;  %v380_v12 = vmul.f32 0.17677669, %v3902_v8  ;;  %4179 = vmatprep.mubr.bf16.mxu1 %v4693_v14  ;;  %v3890_v27 = vunpack.c.l.bf16 %v3910_v26 }
  0x8c   : > { %v381_v13 = vmul.f32 0.17677669, %v3903_v9  ;;  %v3911_v21 = vld [vmem:[#allocation8 + $0x20] sm:$0xff]   ;;  %v378_v22 = vmul.f32 0.17677669, %v3898_v18  ;;  %v3891_v31 = vunpack.c.h.bf16 %v3910_v26  ;;  %v4690_v33 = vld [vmem:[#allocation8 + $0x50] sm:$0xff]   ;;  %v3886_v35 = vunpack.c.l.bf16 %v3909_v32 }
  0x8d   : > { %4166 = vmatpush3.bf16.msra.mxu1 %v4686_v1  ;;  %v391_v17 = vpack.c.bf16 %v383_v11, %v382_v10  ;;  %v379_v23 = vmul.f32 0.17677669, %v3899_v19  ;;  %v3894_v24 = vunpack.c.l.bf16 %v3911_v21  ;;  %v3895_v25 = vunpack.c.h.bf16 %v3911_v21  ;;  %v3908_v39 = vld [vmem:[#allocation8 + $0x8] sm:$0xff]   ;;  %v4699_v41 = vld [vmem:[%s5430_s12] sm:$0xff]   ;;  %v4695_v55 = vld [vmem:[%s5437_s17 + $0x10] sm:$0xff]   ;;  %s5182_s16 = smov [#allocation10]  }
  0x8e   : > { %4167 = vmatprep.subr.bf16.mxu1 %v4687_v2  ;;  %v390_v20 = vpack.c.bf16 %v381_v13, %v380_v12  ;;  %v374_v34 = vmul.f32 0.17677669, %v3890_v27  ;;  %v375_v37 = vmul.f32 0.17677669, %v3891_v31  ;;  %v3887_v38 = vunpack.c.h.bf16 %v3909_v32  ;;  %v4691_v40 = vld [vmem:[#allocation8 + $0x48] sm:$0xff]   ;;  %v3877_v44 = vld [vmem:[#allocation8] sm:$0xff]   ;;  %4147 = vmatprep.mubr.bf16.mxu0 %v4699_v41 }
  0x8f   : > { %4131 = vmatprep.subr.bf16.mxu0 %v391_v17  ;;  %v389_v28 = vpack.c.bf16 %v379_v23, %v378_v22  ;;  %v376_v29 = vmul.f32 0.17677669, %v3894_v24  ;;  %v377_v30 = vmul.f32 0.17677669, %v3895_v25  ;;  %v372_v42 = vmul.f32 0.17677669, %v3886_v35 }
  0x90   : > { %4132 = vmatpush3.bf16.msra.mxu0 %v391_v17  ;;  %v3882_v43 = vunpack.c.l.bf16 %v3908_v39  ;;  %v387_v45 = vpack.c.bf16 %v375_v37, %v374_v34  ;;  %v373_v46 = vmul.f32 0.17677669, %v3887_v38  ;;  %v3883_v47 = vunpack.c.h.bf16 %v3908_v39  ;;  %v4692_v48 = vld [vmem:[#allocation8 + $0x40] sm:$0xff]   ;;  %v4694_v54 = vld [vmem:[%s5437_s17 + $0x8] sm:$0xff]   ;;  %v4696_v60 = vld [vmem:[%s5437_s17 + $0x18] sm:$0xff]   ;;  %s5103_s22 = sshll.u32 %s5182_s16, 4  ;;  %s5104_s22 = int_to_ptr.vmem [resolvable:$false] %s5103_s22 }
  0x91   : > { %4168 = vmatpush3.bf16.msra.mxu1 %v4687_v2  ;;  %4133 = vmatprep.subr.bf16.mxu0 %v390_v20  ;;  %v388_v36 = vpack.c.bf16 %v377_v30, %v376_v29  ;;  %v3878_v49 = vunpack.c.l.bf16 %v3877_v44  ;;  %v3879_v51 = vunpack.c.h.bf16 %v3877_v44  ;;  %v4697_v61 = vld [vmem:[%s5437_s17 + $0x20] sm:$0xff]   ;;  %v4701_v62 = vld [vmem:[%s5430_s12 + $0x8] sm:$0xff]   ;;  %v4703_v63 = vld [vmem:[%s5430_s12 + $0x10] sm:$0xff]   ;;  %v451_v10 = vlaneseq  ;;  %s5105_s15 = scalar_lea.vmem %s5104_s22, 4096 }
  0x92   : > { %4169 = vmatprep.subr.bf16.mxu1 %v4688_v7  ;;  %v370_v50 = vmul.f32 0.17677669, %v3882_v43  ;;  %v386_v52 = vpack.c.bf16 %v373_v46, %v372_v42  ;;  %v371_v53 = vmul.f32 0.17677669, %v3883_v47  ;;  %v4698_v0 = vld [vmem:[%s5437_s17 + $0x28] sm:$0xff]   ;;  %v4700_v1 = vld [vmem:[%s5437_s17 + $0x30] sm:$0xff]  }
  0x93   : > { %v368_v56 = vmul.f32 0.17677669, %v3878_v49  ;;  %v369_v57 = vmul.f32 0.17677669, %v3879_v51  ;;  %v4704_v2 = vld [vmem:[%s5430_s12 + $0x18] sm:$0xff]   ;;  %v4705_v3 = vld [vmem:[%s5430_s12 + $0x20] sm:$0xff]  }
  0x94   : > { %4134 = vmatpush3.bf16.msra.mxu0 %v390_v20  ;;  %v385_v58 = vpack.c.bf16 %v371_v53, %v370_v50  ;;  %v4702_v4 = vld [vmem:[%s5437_s17 + $0x38] sm:$0xff]   ;;  %v4706_v5 = vld [vmem:[%s5430_s12 + $0x28] sm:$0xff]   ;;  %v4707_v6 = vld [vmem:[%s5430_s12 + $0x30] sm:$0xff]   ;;  %v5470_v13 = vshrl.u32 %v451_v10, 7  ;;  %s6934_s17 = scalar_lea.hbm %s6986_s5, %s3875_s30 }
  0x95   : > { %4170 = vmatpush3.bf16.msra.mxu1 %v4688_v7  ;;  %4135 = vmatprep.subr.bf16.mxu0 %v389_v28  ;;  %v384_v59 = vpack.c.bf16 %v369_v57, %v368_v56  ;;  %v4708_v7 = vld [vmem:[%s5430_s12 + $0x38] sm:$0xff]   ;;  %v443_v14 = vld [vmem:[%s6985_s4] sm:$0x1]  ;;  %v3760_v31 = vld [vmem:[%s6985_s4 + $0x1] ss:$0 sm:$0xff]  ;;  %s3604_s12 = sshll.u32 %s6897_s7, 4  ;;  %s6936_s12 = int_to_ptr.vmem [resolvable:$true] %s3604_s12 }
  0x96   : > { %4171 = vmatprep.subr.bf16.mxu1 %v4689_v16  ;;  %7063 = vst [vmem:[#allocation18_spill] sm:$0xff] %v5470_v13  ;;  %v444_v17 = vmul.f32 0.17677669, %v443_v14  ;;  %v537_v18 = vsub.s32 0, %v5470_v13  ;;  %p5106_p0 = scmp.lt.s32.totalorder %s6936_s12, %s5104_s22 }
  0x98   : > { %4136 = vmatpush3.bf16.msra.mxu0 %v389_v28  ;;  %v5476_v23 = vrot.slane %v444_v17, %v537_v18 }
  0x99   : > { %4172 = vmatpush3.bf16.msra.mxu1 %v4689_v16  ;;  %4137 = vmatprep.subr.bf16.mxu0 %v388_v36 }
  0x9a   : > { %4173 = vmatprep.subr.bf16.mxu1 %v4690_v33 }
  0x9c   : > { %4138 = vmatpush3.bf16.msra.mxu0 %v388_v36 }
  0x9d   : > { %4174 = vmatpush3.bf16.msra.mxu1 %v4690_v33  ;;  %4139 = vmatprep.subr.bf16.mxu0 %v387_v45 }
  0x9e   : > { %4175 = vmatprep.subr.bf16.mxu1 %v4691_v40 }
  0xa0   : > { %4140 = vmatpush3.bf16.msra.mxu0 %v387_v45 }
  0xa1   : > { %4176 = vmatpush3.bf16.msra.mxu1 %v4691_v40  ;;  %4141 = vmatprep.subr.bf16.mxu0 %v386_v52 }
  0xa2   : > { %4177 = vmatprep.subr.bf16.mxu1 %v4692_v48 }
  0xa4   : > { %4142 = vmatpush3.bf16.msra.mxu0 %v386_v52 }
  0xa5   : > { %4178 = vmatpush3.bf16.msra.mxu1 %v4692_v48  ;;  %4143 = vmatprep.subr.bf16.mxu0 %v385_v58 }
  0xa8   : > { %4180 = vmatmul.mubr.bf16.vlgmr.msra.gmra.mxu1 %v4694_v54  ;;  %4144 = vmatpush3.bf16.msra.mxu0 %v385_v58 }
  0xa9   : > { %4183 = vmatprep.mubr.bf16.mxu1 %v4695_v55  ;;  %4145 = vmatprep.subr.bf16.mxu0 %v384_v59 }
  0xac   : > { %4146 = vmatpush3.bf16.msra.mxu0 %v384_v59 }
  0xaf   : > { %4148 = vmatmul.mubr.bf16.vlgmr.msra.gmra.mxu0 %v4701_v62 }
  0xb0   : > { %4184 = vmatmul.mubr.bf16.gmra.mxu1 %v4696_v60  ;;  %4151 = vmatprep.mubr.bf16.mxu0 %v4703_v63 }
  0xb1   : > { %4187 = vmatprep.mubr.bf16.mxu1 %v4697_v61 }
  0xb7   : > { %4152 = vmatmul.mubr.bf16.gmra.mxu0 %v4704_v2 }
  0xb8   : > { %4188 = vmatmul.mubr.bf16.gmra.mxu1 %v4698_v0  ;;  %4155 = vmatprep.mubr.bf16.mxu0 %v4705_v3 }
  0xb9   : > { %4191 = vmatprep.mubr.bf16.mxu1 %v4700_v1 }
  0xbf   : > { %4156 = vmatmul.mubr.bf16.gmra.mxu0 %v4706_v5 }
  0xc0   : > { %4192 = vmatmul.mubr.bf16.gmra.mxu1 %v4702_v4  ;;  %4159 = vmatprep.mubr.bf16.mxu0 %v4707_v6 }
  0xc7   : > { %4160 = vmatmul.mubr.bf16.gmra.mxu0 %v4708_v7 }
 0x168   : > { %v5465_v8 = vpop.f32.mrf.mxu1 }
 0x16a   : > { %v821_v9 = vpop.f32.mrf.mxu1 }
 0x16b   : > { %v822_v60 = vadd.f32 %v3760_v31, %v821_v9 }
 0x16c   : > { %v5467_v11 = vpop.f32.mrf.mxu1 }
 0x16d   : > { %v833_v6 = vadd.f32 %v5467_v11, %v3760_v31 }
 0x16e   : > { %v824_v12 = vpop.f32.mrf.mxu1 }
 0x16f   : > { %v4149_v19 = vpop.f32.mrf.mxu0  ;;  %v825_v56 = vadd.f32 %v3760_v31, %v824_v12  ;;  %v830_v12 = vadd.f32 %v5465_v8, %v3760_v31 }
 0x170   : > { %v4185_v15 = vpop.f32.mrf.mxu1  ;;  %v631_v61 = vadd.f32 %v4149_v19, %v5476_v23 }
 0x171   : > { %v622_v21 = vpop.f32.mrf.mxu0  ;;  %v5513_v1 = vpack.c.bf16 %v825_v56, %v822_v60  ;;  %v846_v2 = vadd.f32 %v4185_v15, %v3760_v31  ;;  %v5537_v17 = vpack.c.bf16 %v833_v6, %v830_v12  ;;  %v4710_v6 = vld [vmem:[#allocation8 + $0xb0] sm:$0xff]   ;;  %v4711_v12 = vld [vmem:[#allocation8 + $0xa8] sm:$0xff]  }
 0x172   : > { %v837_v16 = vpop.f32.mrf.mxu1  ;;  %v623_v26 = vadd.f32 %v622_v21, %v5476_v23 }
 0x173   : > { %v4150_v24 = vpop.f32.mrf.mxu0  ;;  %v838_v50 = vadd.f32 %v3760_v31, %v837_v16  ;;  %7070 = vst [vmem:[#allocation25_spill] sm:$0xff] %v5513_v1  ;;  %7074 = vst [vmem:[#allocation29_spill] sm:$0xff] %v5537_v17 }
 0x174   : > { %v4186_v20 = vpop.f32.mrf.mxu1  ;;  %v634_v62 = vadd.f32 %v4150_v24, %v5476_v23 }
 0x175   : > { %v625_v27 = vpop.f32.mrf.mxu0  ;;  %v849_v63 = vadd.f32 %v4186_v20, %v3760_v31 }
 0x176   : > { %v840_v22 = vpop.f32.mrf.mxu1  ;;  %v626_v29 = vadd.f32 %v625_v27, %v5476_v23  ;;  %v5517_v3 = vpack.c.bf16 %v634_v62, %v631_v61 }
 0x177   : > { %v4153_v30 = vpop.f32.mrf.mxu0  ;;  %v841_v46 = vadd.f32 %v3760_v31, %v840_v22  ;;  %v5524_v7 = vpack.c.bf16 %v849_v63, %v846_v2  ;;  %v4709_v2 = vld [vmem:[#allocation8 + $0xb8] sm:$0xff]  }
 0x178   : > { %v4189_v25 = vpop.f32.mrf.mxu1  ;;  %v5483_v33 = vpack.c.bf16 %v626_v29, %v623_v26  ;;  %7071 = vst [vmem:[#allocation26_spill] sm:$0xff] %v5517_v3  ;;  %v647_v4 = vadd.f32 %v4153_v30, %v5476_v23  ;;  %4195 = vmatprep.subr.bf16.mxu0 %v4709_v2 }
 0x179   : > { %v862_v34 = vadd.f32 %v4189_v25, %v3760_v31  ;;  %v638_v36 = vpop.f32.mrf.mxu0  ;;  %v5497_v57 = vpack.c.bf16 %v841_v46, %v838_v50  ;;  %7072 = vst [vmem:[#allocation27_spill] sm:$0xff] %v5524_v7  ;;  %4196 = vmatpush3.bf16.msra.mxu0 %v4709_v2 }
 0x17a   : > { %v853_v28 = vpop.f32.mrf.mxu1  ;;  %7064 = vst [vmem:[#allocation19_spill] sm:$0xff] %v5483_v33  ;;  %4243 = vmatprep.mubr.msk.bf16.mxu1 %vm1113_vm0, %v5483_v33  ;;  %v639_v18 = vadd.f32 %v638_v36, %v5476_v23  ;;  %4197 = vmatprep.subr.bf16.mxu0 %v4710_v6 }
 0x17b   : > { %v4154_v40 = vpop.f32.mrf.mxu0  ;;  %v854_v42 = vadd.f32 %v3760_v31, %v853_v28  ;;  %7068 = vst [vmem:[#allocation23_spill] sm:$0xff] %v5497_v57 }
 0x17c   : > { %v4190_v32 = vpop.f32.mrf.mxu1  ;;  %v650_v5 = vadd.f32 %v4154_v40, %v5476_v23 }
 0x17d   : > { %v865_v35 = vadd.f32 %v4190_v32, %v3760_v31  ;;  %v641_v45 = vpop.f32.mrf.mxu0  ;;  %4198 = vmatpush3.bf16.msra.mxu0 %v4710_v6 }
 0x17e   : > { %v856_v37 = vpop.f32.mrf.mxu1  ;;  %v5531_v15 = vpack.c.bf16 %v650_v5, %v647_v4  ;;  %v642_v19 = vadd.f32 %v641_v45, %v5476_v23  ;;  %4199 = vmatprep.subr.bf16.mxu0 %v4711_v12 }
 0x17f   : > { %v5487_v38 = vpack.c.bf16 %v865_v35, %v862_v34  ;;  %v857_v39 = vadd.f32 %v3760_v31, %v856_v37  ;;  %v4157_v55 = vpop.f32.mrf.mxu0 }
 0x180   : > { %v4193_v41 = vpop.f32.mrf.mxu1  ;;  %7073 = vst [vmem:[#allocation28_spill] sm:$0xff] %v5531_v15  ;;  %v663_v16 = vadd.f32 %v4157_v55, %v5476_v23  ;;  %v5549_v22 = vpack.c.bf16 %v642_v19, %v639_v18  ;;  %v4713_v18 = vld [vmem:[#allocation8 + $0x98] sm:$0xff]  }
 0x181   : > { %7065 = vst [vmem:[#allocation20_spill] sm:$0xff] %v5487_v38  ;;  %1723 = vrot.lane.b32.xlu1 %v5487_v38, %s5179_s6  ;;  %v5491_v44 = vpack.c.bf16 %v857_v39, %v854_v42  ;;  %v878_v48 = vadd.f32 %v4193_v41, %v3760_v31  ;;  %v654_v0 = vpop.f32.mrf.mxu0  ;;  %v1154_v25 = vsel %vm1113_vm0, %v5487_v38, 0  ;;  %v1148_v39 = vsel %vm1113_vm0, %v5524_v7, 0  ;;  %4200 = vmatpush3.bf16.msra.mxu0 %v4711_v12 }
 0x182   : > { %v869_v43 = vpop.f32.mrf.mxu1  ;;  %v655_v24 = vadd.f32 %v654_v0, %v5476_v23  ;;  %v1145_v41 = vsel %vm1113_vm0, %v5497_v57, 0  ;;  %v1139_v42 = vsel %vm1113_vm0, %v5513_v1, 0  ;;  %v5732_v12 = vadd.s32 40, %v5470_v13 }
 0x183   : > { %7066 = vst [vmem:[#allocation21_spill] sm:$0xff] %v5491_v44  ;;  %v870_v52 = vadd.f32 %v3760_v31, %v869_v43  ;;  %v4158_v9 = vpop.f32.mrf.mxu0  ;;  %v1151_v30 = vsel %vm1113_vm0, %v5491_v44, 0 }
 0x184   : > { %v4194_v47 = vpop.f32.mrf.mxu1  ;;  %v666_v11 = vadd.f32 %v4158_v9, %v5476_v23  ;;  %7080 = vst [vmem:[#allocation35_spill] sm:$0xff] %v5732_v12 }
 0x185   : > { %v881_v49 = vadd.f32 %v4194_v47, %v3760_v31  ;;  %1721 = vrot.lane.b32.xlu1 %v5491_v44, %s5179_s6  ;;  %v657_v8 = vpop.f32.mrf.mxu0 }
 0x186   : > { %v872_v51 = vpop.f32.mrf.mxu1  ;;  %v5545_v20 = vpack.c.bf16 %v666_v11, %v663_v16  ;;  %v658_v26 = vadd.f32 %v657_v8, %v5476_v23  ;;  %v4712_v8 = vld [vmem:[#allocation8 + $0xa0] sm:$0xff]  }
 0x187   : > { %v5495_v53 = vpack.c.bf16 %v881_v49, %v878_v48  ;;  %v873_v54 = vadd.f32 %v3760_v31, %v872_v51  ;;  %v4161_v21 = vpop.f32.mrf.mxu0  ;;  %4201 = vmatprep.subr.bf16.mxu0 %v4712_v8 }
 0x188   : > { %7075 = vst [vmem:[#allocation30_spill] sm:$0xff] %v5545_v20  ;;  %v5561_v28 = vpack.c.bf16 %v658_v26, %v655_v24  ;;  %v679_v31 = vadd.f32 %v4161_v21, %v5476_v23  ;;  %4202 = vmatpush3.bf16.msra.mxu0 %v4712_v8  ;;  %v4714_v24 = vld [vmem:[#allocation8 + $0x90] sm:$0xff]   ;;  %v4717_v26 = vld [vmem:[%s5443_s1] sm:$0xff]  }
 0x189   : > { %7067 = vst [vmem:[#allocation22_spill] sm:$0xff] %v5495_v53  ;;  %v5499_v58 = vpack.c.bf16 %v873_v54, %v870_v52  ;;  %1727 = vrot.lane.b32.xlu0 %v5495_v53, %s5179_s6  ;;  %4579 = vmatprep.subr.msk.bf16.mxu1 %vm1113_vm0, %v5495_v53  ;;  %v1160_v59 = vsel %vm1113_vm0, %v5495_v53, 0  ;;  %v670_v27 = vpop.f32.mrf.mxu0 }
 0x18a   : > { %1717 = vrot.lane.b32.xlu1 %v5497_v57, %s5179_s6  ;;  %4228 = vmatpush3.bf16.xpose.msra.mxu1 %v1160_v59  ;;  %v671_v35 = vadd.f32 %v670_v27, %v5476_v23 }
 0x18b   : > { %7069 = vst [vmem:[#allocation24_spill] sm:$0xff] %v5499_v58  ;;  %4580 = vmatprep.subr.msk.bf16.mxu1 %vm1113_vm0, %v5499_v58  ;;  %v1157_v14 = vsel %vm1113_vm0, %v5499_v58, 0  ;;  %v4162_v29 = vpop.f32.mrf.mxu0  ;;  %4203 = vmatprep.subr.bf16.mxu0 %v4713_v18 }
 0x18c   : > { %v682_v32 = vadd.f32 %v4162_v29, %v5476_v23  ;;  %4204 = vmatpush3.bf16.msra.mxu0 %v4713_v18  ;;  %4211 = vmatprep.mubr.bf16.mxu0 %v4717_v26  ;;  %v5760_v18 = vadd.s32 88, %v5470_v13 }
 0x18d   : > { %1725 = vrot.lane.b32.xlu0 %v5499_v58, %s5179_s6  ;;  %v673_v34 = vpop.f32.mrf.mxu0  ;;  %4205 = vmatprep.subr.bf16.mxu0 %v4714_v24 }
 0x18e   : > { %1713 = vrot.lane.b32.xlu1 %v5513_v1, %s5179_s6  ;;  %v5580_v36 = vpack.c.bf16 %v682_v32, %v679_v31  ;;  %v674_v37 = vadd.f32 %v673_v34, %v5476_v23  ;;  %v1142_v23 = vsel %vm1113_vm0, %v5537_v17, 0  ;;  %v4718_v32 = vld [vmem:[%s5443_s1 + $0x8] sm:$0xff]   ;;  %7082 = vst [vmem:[#allocation37_spill] sm:$0xff] %v5760_v18 }
 0x190   : > { %7076 = vst [vmem:[#allocation31_spill] sm:$0xff] %v5580_v36  ;;  %v5585_v40 = vpack.c.bf16 %v674_v37, %v671_v35  ;;  %4206 = vmatpush3.bf16.msra.mxu0 %v4714_v24  ;;  %v4719_v35 = vld [vmem:[%s5443_s1 + $0x10] sm:$0xff]   ;;  %v4720_v37 = vld [vmem:[%s5443_s1 + $0x18] sm:$0xff]   ;;  %v5771_v24 = vadd.s32 72, %v5470_v13 }
 0x191   : > { %1719 = vrot.lane.b32.xlu0 %v5524_v7, %s5179_s6 }
 0x192   : > { %1691 = vrot.lane.b32.xlu1 %v5517_v3, %s5179_s6  ;;  %4230 = vmatpush3.bf16.xpose.msra.mxu1 %v1157_v14  ;;  %7083 = vst [vmem:[#allocation38_spill] sm:$0xff] %v5771_v24 }
 0x193   : > { %4581 = vmatprep.subr.msk.bf16.mxu1 %vm1113_vm0, %v5487_v38 }
 0x195   : > { %1715 = vrot.lane.b32.xlu0 %v5537_v17, %s5179_s6 }
 0x196   : > { %1695 = vrot.lane.b32.xlu1 %v5531_v15, %s5179_s6 }
 0x199   : > { %1689 = vrot.lane.b32.xlu0 %v5483_v33, %s5179_s6 }
 0x19a   : > { %1699 = vrot.lane.b32.xlu1 %v5545_v20, %s5179_s6  ;;  %4232 = vmatpush3.bf16.xpose.msra.mxu1 %v1154_v25  ;;  %v4715_v25 = vld [vmem:[#allocation8 + $0x88] sm:$0xff]  }
 0x19b   : > { %4582 = vmatprep.subr.msk.bf16.mxu1 %vm1113_vm0, %v5491_v44  ;;  %4207 = vmatprep.subr.bf16.mxu0 %v4715_v25 }
 0x19c   : > { %4208 = vmatpush3.bf16.msra.mxu0 %v4715_v25 }
 0x19d   : > { %1693 = vrot.lane.b32.xlu0 %v5549_v22, %s5179_s6 }
 0x19e   : > { %2354 = vrot.lane.b32.xlu1 %v5487_v38, %s5180_s20 }
 0x1a1   : > { %1697 = vrot.lane.b32.xlu0 %v5561_v28, %s5179_s6 }
 0x1a2   : > { %2356 = vrot.lane.b32.xlu1 %v5499_v58, %s5180_s20  ;;  %4234 = vmatpush3.bf16.xpose.msra.mxu1 %v1151_v30  ;;  %v4716_v30 = vld [vmem:[#allocation8 + $0x80] sm:$0xff]  }
 0x1a3   : > { %4583 = vmatprep.subr.msk.bf16.mxu1 %vm1113_vm0, %v5524_v7  ;;  %4209 = vmatprep.subr.bf16.mxu0 %v4716_v30 }
 0x1a4   : > { %4210 = vmatpush3.bf16.msra.mxu0 %v4716_v30 }
 0x1a5   : > { %2358 = vrot.lane.b32.xlu0 %v5495_v53, %s5180_s20 }
 0x1a7   : > { %4212 = vmatmul.mubr.bf16.vlgmr.msra.gmra.mxu0 %v4718_v32 }
 0x1a8   : > { %4215 = vmatprep.mubr.bf16.mxu0 %v4719_v35  ;;  %v5806_v35 = vadd.s32 120, %v5470_v13 }
 0x1a9   : > { %1703 = vrot.lane.b32.xlu0 %v5580_v36, %s5179_s6 }
 0x1aa   : > { %4236 = vmatpush3.bf16.xpose.msra.mxu1 %v1148_v39  ;;  %v4721_v39 = vld [vmem:[%s5443_s1 + $0x20] sm:$0xff]   ;;  %7086 = vst [vmem:[#allocation41_spill] sm:$0xff] %v5806_v35 }
 0x1ab   : > { %4584 = vmatprep.subr.msk.bf16.mxu1 %vm1113_vm0, %v5497_v57 }
 0x1ad   : > { %1701 = vrot.lane.b32.xlu0 %v5585_v40, %s5179_s6 }
 0x1af   : > { %4216 = vmatmul.mubr.bf16.gmra.mxu0 %v4720_v37 }
 0x1b0   : > { %4219 = vmatprep.mubr.bf16.mxu0 %v4721_v39 }
 0x1b2   : > { %4238 = vmatpush3.bf16.xpose.msra.mxu1 %v1145_v41  ;;  %v4722_v41 = vld [vmem:[%s5443_s1 + $0x28] sm:$0xff]  }
 0x1b3   : > { %4585 = vmatprep.subr.msk.bf16.mxu1 %vm1113_vm0, %v5537_v17 }
 0x1b7   : > { %4220 = vmatmul.mubr.bf16.gmra.mxu0 %v4722_v41  ;;  %v5819_v41 = vadd.s32 104, %v5470_v13 }
 0x1b9   : > { %7087 = vst [vmem:[#allocation42_spill] sm:$0xff] %v5819_v41 }
 0x1ba   : > { %4240 = vmatpush3.bf16.xpose.msra.mxu1 %v1142_v23  ;;  %v4723_v23 = vld [vmem:[%s5443_s1 + $0x30] sm:$0xff]  }
 0x1bb   : > { %4586 = vmatprep.subr.msk.bf16.mxu1 %vm1113_vm0, %v5513_v1  ;;  %4223 = vmatprep.mubr.bf16.mxu0 %v4723_v23 }
 0x1c2   : > { %4242 = vmatpush3.bf16.xpose.msra.mxu1 %v1139_v42  ;;  %v4724_v42 = vld [vmem:[%s5443_s1 + $0x38] sm:$0xff]   ;;  %s5099_s1 = scalar_lea.vmem %s6936_s12, 2048 }
 0x1c3   : > { %4224 = vmatmul.mubr.bf16.gmra.mxu0 %v4724_v42  ;;  %p5100_p2 = scmp.ne.s32.totalorder %s6936_s12, %s5099_s1  ;;  %p5107_p13 = scmp.lt.s32.totalorder %s5105_s15, %s5099_s1 }
 0x1c5   : > { %p5101_p7 = pnand %p5100_p2, %p7141_p3  ;;  %p5108_p1 = por %p5107_p13, %p5106_p0 }
 0x1c7   : > { %p5102_p4 = pneg %p5101_p7 }
 0x1c9   : > { %4244 = vmatmul.mubr.msk.bf16.vlgmr.msra.gmra.mxu1 %vm1113_vm0, %v5517_v3  ;;  %p5109_p5 = pnand %p5108_p1, %p5102_p4 }
 0x1ca   : > { %4247 = vmatprep.mubr.msk.bf16.mxu1 %vm1113_vm0, %v5549_v22 }
 0x1d1   : > { %4248 = vmatmul.mubr.msk.bf16.gmra.mxu1 %vm1113_vm0, %v5531_v15 }
 0x1d2   : > { %4251 = vmatprep.mubr.msk.bf16.mxu1 %vm1113_vm0, %v5561_v28 }
 0x1d9   : > { %4252 = vmatmul.mubr.msk.bf16.gmra.mxu1 %vm1113_vm0, %v5545_v20 }
 0x1da   : > { %4255 = vmatprep.mubr.msk.bf16.mxu1 %vm1113_vm0, %v5585_v40 }
 0x1e1   : > { %4256 = vmatmul.mubr.msk.bf16.gmra.mxu1 %vm1113_vm0, %v5580_v36 }
 0x1f3   : > { %v1724_v49 = vpop.permute.xlu1 %1723 }
 0x1f4   : > { %v1769_v52 = vsel %vm1113_vm0, %v1724_v49, 0 }
 0x1f7   : > { %v1722_v54 = vpop.permute.xlu1 %1721 }
 0x1f8   : > { %v1766_v55 = vsel %vm1113_vm0, %v1722_v54, 0 }
 0x1fb   : > { %v1728_v43 = vpop.permute.xlu0 %1727 }
 0x1fc   : > { %4587 = vmatprep.subr.msk.bf16.mxu1 %vm1113_vm0, %v1728_v43  ;;  %v1775_v45 = vsel %vm1113_vm0, %v1728_v43, 0  ;;  %v1718_v56 = vpop.permute.xlu1 %1717  ;;  %v5656_v43 = vadd.s32 16, %v5470_v13 }
 0x1fd   : > { %4312 = vmatpush3.bf16.xpose.msra.mxu1 %v1775_v45  ;;  %v1760_v61 = vsel %vm1113_vm0, %v1718_v56, 0  ;;  %v5659_v45 = vand.u32 127, %v451_v10  ;;  %v5675_v10 = vadd.s32 24, %v5470_v13 }
 0x1ff   : > { %v1726_v46 = vpop.permute.xlu0 %1725  ;;  %vm472_vm1 = vcmp.ge.s32.totalorder %v5656_v43, %v5659_v45  ;;  %vm470_vm2 = vcmp.ge.s32.totalorder %v5470_v13, %v5659_v45  ;;  %vm473_vm4 = vcmp.ge.s32.totalorder %v5675_v10, %v5659_v45  ;;  %vm475_vm9 = vcmp.ge.s32.totalorder %v5732_v12, %v5659_v45 }
 0x200   : > { %4588 = vmatprep.subr.msk.bf16.mxu1 %vm1113_vm0, %v1726_v46  ;;  %v1772_v48 = vsel %vm1113_vm0, %v1726_v46, 0  ;;  %v1714_v60 = vpop.permute.xlu1 %1713  ;;  %vm481_vm11 = vcmp.ge.s32.totalorder %v5760_v18, %v5659_v45  ;;  %vm479_vm12 = vcmp.ge.s32.totalorder %v5771_v24, %v5659_v45  ;;  %vm485_vm15 = vcmp.ge.s32.totalorder %v5806_v35, %v5659_v45 }
 0x201   : > { %v1754_v14 = vsel %vm1113_vm0, %v1714_v60, 0 }
 0x203   : > { %v1720_v47 = vpop.permute.xlu0 %1719 }
 0x204   : > { %v1763_v59 = vsel %vm1113_vm0, %v1720_v47, 0  ;;  %v1692_v62 = vpop.permute.xlu1 %1691 }
 0x205   : > { %4314 = vmatpush3.bf16.xpose.msra.mxu1 %v1772_v48 }
 0x206   : > { %4589 = vmatprep.subr.msk.bf16.mxu1 %vm1113_vm0, %v1724_v49 }
 0x207   : > { %v1716_v50 = vpop.permute.xlu0 %1715 }
 0x208   : > { %v1696_v0 = vpop.permute.xlu1 %1695  ;;  %v1757_v4 = vsel %vm1113_vm0, %v1716_v50, 0 }
 0x20b   : > { %v1690_v51 = vpop.permute.xlu0 %1689 }
 0x20c   : > { %4327 = vmatprep.mubr.msk.bf16.mxu1 %vm1113_vm0, %v1690_v51  ;;  %v1700_v9 = vpop.permute.xlu1 %1699 }
 0x20d   : > { %4316 = vmatpush3.bf16.xpose.msra.mxu1 %v1769_v52 }
 0x20e   : > { %4590 = vmatprep.subr.msk.bf16.mxu1 %vm1113_vm0, %v1722_v54  ;;  %v5688_v54 = vadd.s32 48, %v5470_v13 }
 0x20f   : > { %v1694_v63 = vpop.permute.xlu0 %1693 }
 0x210   : > { %v2355_v11 = vpop.permute.xlu1 %2354  ;;  %7077 = vst [vmem:[#allocation32_spill] sm:$0xff] %v5688_v54  ;;  %vm7021_vm5 = vcmp.ge.s32.totalorder %v5688_v54, %v5659_v45 }
 0x211   : > { %v2400_v34 = vsel %vm1113_vm0, %v2355_v11, 0 }
 0x213   : > { %v1698_v5 = vpop.permute.xlu0 %1697 }
 0x214   : > { %v2357_v21 = vpop.permute.xlu1 %2356 }
 0x215   : > { %4318 = vmatpush3.bf16.xpose.msra.mxu1 %v1766_v55  ;;  %v2403_v27 = vsel %vm1113_vm0, %v2357_v21, 0 }
 0x216   : > { %4591 = vmatprep.subr.msk.bf16.mxu1 %vm1113_vm0, %v1720_v47  ;;  %v5664_v47 = vadd.s32 8, %v5470_v13 }
 0x217   : > { %v2359_v16 = vpop.permute.xlu0 %2358 }
 0x218   : > { %v2406_v19 = vsel %vm1113_vm0, %v2359_v16, 0  ;;  %vm471_vm3 = vcmp.ge.s32.totalorder %v5664_v47, %v5659_v45 }
 0x21b   : > { %v1704_v29 = vpop.permute.xlu0 %1703 }
 0x21d   : > { %4320 = vmatpush3.bf16.xpose.msra.mxu1 %v1763_v59 }
 0x21e   : > { %4592 = vmatprep.subr.msk.bf16.mxu1 %vm1113_vm0, %v1718_v56 }
 0x21f   : > { %v1702_v31 = vpop.permute.xlu0 %1701 }
 0x225   : > { %4322 = vmatpush3.bf16.xpose.msra.mxu1 %v1760_v61  ;;  %v5705_v61 = vadd.s32 32, %v5470_v13 }
 0x226   : > { %4593 = vmatprep.subr.msk.bf16.mxu1 %vm1113_vm0, %v1716_v50 }
 0x227   : > { %vm474_vm6 = vcmp.ge.s32.totalorder %v5705_v61, %v5659_v45 }
 0x22d   : > { %4324 = vmatpush3.bf16.xpose.msra.mxu1 %v1757_v4  ;;  %v5719_v4 = vadd.s32 56, %v5470_v13 }
 0x22e   : > { %4594 = vmatprep.subr.msk.bf16.mxu1 %vm1113_vm0, %v1714_v60 }
 0x22f   : > { %7079 = vst [vmem:[#allocation34_spill] sm:$0xff] %v5719_v4  ;;  %vm477_vm8 = vcmp.ge.s32.totalorder %v5719_v4, %v5659_v45 }
 0x235   : > { %4326 = vmatpush3.bf16.xpose.msra.mxu1 %v1754_v14 }
 0x236   : > { %4595 = vmatprep.subr.msk.bf16.mxu1 %vm1113_vm0, %v2359_v16 }
 0x23c   : > { %4328 = vmatmul.mubr.msk.bf16.vlgmr.msra.gmra.mxu1 %vm1113_vm0, %v1692_v62 }
 0x23d   : > { %4396 = vmatpush3.bf16.xpose.msra.mxu1 %v2406_v19  ;;  %4331 = vmatprep.mubr.msk.bf16.mxu1 %vm1113_vm0, %v1694_v63  ;;  %v5708_v63 = vadd.s32 64, %v5470_v13 }
 0x23e   : > { %4596 = vmatprep.subr.msk.bf16.mxu1 %vm1113_vm0, %v2357_v21 }
 0x23f   : > { %7078 = vst [vmem:[#allocation33_spill] sm:$0xff] %v5708_v63  ;;  %vm478_vm7 = vcmp.ge.s32.totalorder %v5708_v63, %v5659_v45 }
 0x244   : > { %4332 = vmatmul.mubr.msk.bf16.gmra.mxu1 %vm1113_vm0, %v1696_v0 }
 0x245   : > { %4398 = vmatpush3.bf16.xpose.msra.mxu1 %v2403_v27  ;;  %4335 = vmatprep.mubr.msk.bf16.mxu1 %vm1113_vm0, %v1698_v5  ;;  %v5782_v27 = vadd.s32 112, %v5470_v13 }
 0x246   : > { %4597 = vmatprep.subr.msk.bf16.mxu1 %vm1113_vm0, %v2355_v11  ;;  %v5749_v11 = vadd.s32 80, %v5470_v13 }
 0x247   : > { %7084 = vst [vmem:[#allocation39_spill] sm:$0xff] %v5782_v27  ;;  %vm7000_vm13 = vcmp.ge.s32.totalorder %v5782_v27, %v5659_v45 }
 0x248   : > { %7081 = vst [vmem:[#allocation36_spill] sm:$0xff] %v5749_v11  ;;  %vm480_vm10 = vcmp.ge.s32.totalorder %v5749_v11, %v5659_v45 }
 0x24c   : > { %4336 = vmatmul.mubr.msk.bf16.gmra.mxu1 %vm1113_vm0, %v1700_v9 }
 0x24d   : > { %4400 = vmatpush3.bf16.xpose.msra.mxu1 %v2400_v34  ;;  %4339 = vmatprep.mubr.msk.bf16.mxu1 %vm1113_vm0, %v1702_v31  ;;  %v5793_v31 = vadd.s32 96, %v5470_v13 }
 0x24f   : > { %7085 = vst [vmem:[#allocation40_spill] sm:$0xff] %v5793_v31  ;;  %vm482_vm14 = vcmp.ge.s32.totalorder %v5793_v31, %v5659_v45 }
 0x254   : > { %4340 = vmatmul.mubr.msk.bf16.gmra.mxu1 %vm1113_vm0, %v1704_v29 }
 0x289   : > { %v4245_v46 = vpop.f32.mrf.mxu1 }
 0x28a   : > { %v5669_v48 = vsel %vm472_vm1, %v4245_v46, -1e+09 }
 0x28b   : > { %1279 = vmax.xlane.f32.xlu1 %v5669_v48  ;;  %v1196_v49 = vpop.f32.mrf.mxu1 }
 0x28c   : > { %v5682_v51 = vsel %vm470_vm2, %v1196_v49, -1e+09  ;;  %v5843_v49 = vpop.f32.mrf.mxu0 }
 0x28d   : > { %v4246_v50 = vpop.f32.mrf.mxu1 }
 0x28e   : > { %v5699_v59 = vsel %vm473_vm4, %v4246_v50, -1e+09  ;;  %v5845_v50 = vpop.f32.mrf.mxu0 }
 0x28f   : > { %1275 = vmax.xlane.f32.xlu1 %v5682_v51  ;;  %v1199_v52 = vpop.f32.mrf.mxu1 }
 0x290   : > { %v5693_v55 = vsel %vm471_vm3, %v1199_v52, -1e+09  ;;  %v5847_v52 = vpop.f32.mrf.mxu0 }
 0x291   : > { %1277 = vmax.xlane.f32.xlu0 %v5693_v55  ;;  %v4249_v56 = vpop.f32.mrf.mxu1 }
 0x292   : > { %v5713_v0 = vsel %vm7021_vm5, %v4249_v56, -1e+09 }
 0x293   : > { %1281 = vmax.xlane.f32.xlu1 %v5699_v59  ;;  %v1212_v60 = vpop.f32.mrf.mxu1 }
 0x294   : > { %v5726_v6 = vsel %vm474_vm6, %v1212_v60, -1e+09 }
 0x295   : > { %v4250_v62 = vpop.f32.mrf.mxu1 }
 0x296   : > { %v5743_v16 = vsel %vm477_vm8, %v4250_v62, -1e+09  ;;  %v5850_v62 = vpop.f32.mrf.mxu0 }
 0x297   : > { %1287 = vmax.xlane.f32.xlu1 %v5713_v0  ;;  %v1215_v2 = vpop.f32.mrf.mxu1 }
 0x298   : > { %v5754_v8 = vsel %vm475_vm9, %v1215_v2, -1e+09 }
 0x299   : > { %v4253_v5 = vpop.f32.mrf.mxu1 }
 0x29a   : > { %v5765_v19 = vsel %vm480_vm10, %v4253_v5, -1e+09  ;;  %v5852_v5 = vpop.f32.mrf.mxu0 }
 0x29b   : > { %1283 = vmax.xlane.f32.xlu1 %v5726_v6  ;;  %v1228_v9 = vpop.f32.mrf.mxu1 }
 0x29c   : > { %v5737_v14 = vsel %vm478_vm7, %v1228_v9, -1e+09 }
 0x29d   : > { %1291 = vmax.xlane.f32.xlu0 %v5737_v14  ;;  %v4254_v21 = vpop.f32.mrf.mxu1 }
 0x29e   : > { %v5776_v25 = vsel %vm481_vm11, %v4254_v21, -1e+09 }
 0x29f   : > { %1289 = vmax.xlane.f32.xlu1 %v5743_v16  ;;  %v1231_v26 = vpop.f32.mrf.mxu1 }
 0x2a0   : > { %v5787_v29 = vsel %vm479_vm12, %v1231_v26, -1e+09  ;;  %v5855_v26 = vpop.f32.mrf.mxu0 }
 0x2a1   : > { %v4257_v30 = vpop.f32.mrf.mxu1 }
 0x2a2   : > { %v5798_v32 = vsel %vm7000_vm13, %v4257_v30, -1e+09  ;;  %vm483_vm13 = vcmp.ge.s32.totalorder %v5819_v41, %v5659_v45 }
 0x2a3   : > { %1285 = vmax.xlane.f32.xlu1 %v5754_v8  ;;  %v1244_v34 = vpop.f32.mrf.mxu1 }
 0x2a4   : > { %v5811_v37 = vsel %vm482_vm14, %v1244_v34, -1e+09 }
 0x2a5   : > { %v4258_v39 = vpop.f32.mrf.mxu1 }
 0x2a6   : > { %v5824_v23 = vsel %vm485_vm15, %v4258_v39, -1e+09  ;;  %v5857_v39 = vpop.f32.mrf.mxu0 }
 0x2a7   : > { %1295 = vmax.xlane.f32.xlu1 %v5765_v19  ;;  %v1247_v42 = vpop.f32.mrf.mxu1 }
 0x2a8   : > { %v5834_v46 = vsel %vm483_vm13, %v1247_v42, -1e+09 }
 0x2ab   : > { %1297 = vmax.xlane.f32.xlu1 %v5776_v25 }
 0x2af   : > { %1293 = vmax.xlane.f32.xlu1 %v5787_v29 }
 0x2b3   : > { %2350 = vrot.lane.b32.xlu0 %v5524_v7, %s5180_s20  ;;  %1303 = vmax.xlane.f32.xlu1 %v5798_v32 }
 0x2b7   : > { %2346 = vrot.lane.b32.xlu0 %v5537_v17, %s5180_s20  ;;  %1299 = vmax.xlane.f32.xlu1 %v5811_v37 }
 0x2bb   : > { %2328 = vrot.lane.b32.xlu0 %v5483_v33, %s5180_s20  ;;  %1305 = vmax.xlane.f32.xlu1 %v5824_v23 }
 0x2bf   : > { %1301 = vmax.xlane.f32.xlu1 %v5834_v46 }
 0x2d0   : > { %2352 = vrot.lane.b32.xlu1 %v5491_v44, %s5180_s20 }
 0x2d4   : > { %2348 = vrot.lane.b32.xlu1 %v5497_v57, %s5180_s20 }
 0x2d8   : > { %2344 = vrot.lane.b32.xlu1 %v5513_v1, %s5180_s20 }
 0x314   : > { %v1280_v56 = vpop.xlane.xlu1 %1279 }
 0x315   : > { %v1309_v60 = vsub.f32 %v5669_v48, %v1280_v56  ;;  %v5860_v48 = vpop.f32.mrf.mxu0 }
 0x317   : > { %v1327_v2 = vmul.f32 1.442695, %v1309_v60  ;;  %v4221_v33 = vpop.f32.mrf.mxu0 }
 0x318   : > { %v1276_v9 = vpop.xlane.xlu1 %1275 }
 0x319   : > { %4733 = vpow2.f32 %v1327_v2  ;;  %v1307_v21 = vsub.f32 %v5682_v51, %v1276_v9  ;;  %v1052_v2 = vpop.f32.mrf.mxu0 }
 0x31a   : > { %v1278_v34 = vpop.xlane.xlu0 %1277 }
 0x31b   : > { %v1323_v30 = vmul.f32 1.442695, %v1307_v21  ;;  %v1308_v56 = vsub.f32 %v5693_v55, %v1278_v34  ;;  %v4222_v17 = vpop.f32.mrf.mxu0 }
 0x31c   : > { %v1282_v42 = vpop.xlane.xlu1 %1281 }
 0x31d   : > { %4735 = vpow2.f32 %v1323_v30  ;;  %v1310_v1 = vsub.f32 %v5699_v59, %v1282_v42  ;;  %v1325_v9 = vmul.f32 1.442695, %v1308_v56  ;;  %v1055_v7 = vpop.f32.mrf.mxu0 }
 0x31f   : > { %v1329_v60 = vmul.f32 1.442695, %v1310_v1  ;;  %v4225_v1 = vpop.f32.mrf.mxu0 }
 0x320   : > { %v1288_v57 = vpop.xlane.xlu1 %1287 }
 0x321   : > { %4737 = vpow2.f32 %v1329_v60  ;;  %v1313_v51 = vsub.f32 %v5713_v0, %v1288_v57  ;;  %v5871_v57 = vld [vmem:[%s6985_s4 + $0x2] ss:$0 sm:$0xff]  ;;  %v1068_v56 = vpop.f32.mrf.mxu0 }
 0x322   : > { %v1077_v60 = vadd.f32 %v4225_v1, %v5871_v57  ;;  %v1061_v58 = vadd.f32 %v4221_v33, %v5871_v57  ;;  %v1064_v1 = vadd.f32 %v4222_v17, %v5871_v57  ;;  %v1053_v17 = vadd.f32 %v5871_v57, %v1052_v2 }
 0x323   : > { %v1335_v21 = vmul.f32 1.442695, %v1313_v51 }
 0x324   : > { %v1284_v44 = vpop.xlane.xlu1 %1283 }
 0x325   : > { %4739 = vpow2.f32 %v1335_v21  ;;  %v1311_v30 = vsub.f32 %v5726_v6, %v1284_v44 }
 0x326   : > { %v5865_v59 = vpop.eup %4733  ;;  %4741 = vpow2.f32 %v1325_v9  ;;  %v1292_v42 = vpop.xlane.xlu0 %1291 }
 0x327   : > { %7088 = vst [vmem:[#allocation43_spill] sm:$0xff] %v5865_v59  ;;  %v1331_v55 = vmul.f32 1.442695, %v1311_v30  ;;  %1359 = vadd.xlane.f32.xlu0 %v5865_v59  ;;  %v4226_v9 = vpop.f32.mrf.mxu0  ;;  %v1069_v30 = vadd.f32 %v5871_v57, %v1068_v56  ;;  %v1315_v56 = vsub.f32 %v5737_v14, %v1292_v42 }
 0x328   : > { %v1290_v0 = vpop.xlane.xlu1 %1289  ;;  %v1080_v53 = vadd.f32 %v4226_v9, %v5871_v57 }
 0x329   : > { %4743 = vpow2.f32 %v1331_v55  ;;  %v1314_v34 = vsub.f32 %v5743_v16, %v1290_v0  ;;  %v1071_v16 = vpop.f32.mrf.mxu0 }
 0x32a   : > { %v5874_v44 = vpop.eup %4735  ;;  %v5876_v6 = vpop.permute.xlu0 %2350  ;;  %v1072_v59 = vadd.f32 %v5871_v57, %v1071_v16 }
 0x32b   : > { %7089 = vst [vmem:[#allocation44_spill] sm:$0xff] %v5874_v44  ;;  %v1337_v51 = vmul.f32 1.442695, %v1314_v34  ;;  %1355 = vadd.xlane.f32.xlu0 %v5874_v44  ;;  %v5889_v34 = vpack.c.bf16 %v1080_v53, %v1077_v60  ;;  %v5902_v60 = vpack.c.bf16 %v1064_v1, %v1061_v58 }
 0x32c   : > { %v1286_v21 = vpop.xlane.xlu1 %1285 }
 0x32d   : > { %4745 = vpow2.f32 %v1337_v51  ;;  %v1312_v55 = vsub.f32 %v5754_v8, %v1286_v21  ;;  %v5894_v8 = vpack.c.bf16 %v1072_v59, %v1069_v30  ;;  %4259 = vmatprep.subr.bf16.mxu0 %v5889_v34  ;;  %v1056_v21 = vadd.f32 %v5871_v57, %v1055_v7 }
 0x32e   : > { %v5883_v0 = vpop.eup %4737  ;;  %v5885_v38 = vpop.permute.xlu0 %2346  ;;  %4260 = vmatpush3.bf16.msra.mxu0 %v5889_v34  ;;  %v1045_v7 = vadd.f32 %v5852_v5, %v5871_v57  ;;  %v1037_v5 = vadd.f32 %v5871_v57, %v5855_v26  ;;  %v1029_v26 = vadd.f32 %v5843_v49, %v5871_v57  ;;  %v1021_v49 = vadd.f32 %v5871_v57, %v5845_v50  ;;  %v7094_v63 = vld [vmem:[#allocation43_spill] sm:$0xff] }
 0x32f   : > { %v1333_v44 = vmul.f32 1.442695, %v1312_v55  ;;  %1361 = vadd.xlane.f32.xlu1 %v5883_v0  ;;  %4261 = vmatprep.subr.bf16.mxu0 %v5894_v8  ;;  %v5919_v30 = vpack.c.bf16 %v1056_v21, %v1053_v17  ;;  %v1032_v17 = vadd.f32 %v5847_v52, %v5871_v57  ;;  %v1024_v52 = vadd.f32 %v5871_v57, %v5850_v62 }
 0x330   : > { %v1296_v51 = vpop.xlane.xlu1 %1295 }
 0x331   : > { %4747 = vpow2.f32 %v1333_v44  ;;  %v1317_v9 = vsub.f32 %v5765_v19, %v1296_v51  ;;  %v1339_v19 = vmul.f32 1.442695, %v1315_v56  ;;  %v1048_v44 = vadd.f32 %v5857_v39, %v5871_v57 }
 0x332   : > { %v5899_v33 = vpop.eup %4739  ;;  %v2329_v53 = vpop.permute.xlu0 %2328  ;;  %4262 = vmatpush3.bf16.msra.mxu0 %v5894_v8  ;;  %v1040_v56 = vadd.f32 %v5871_v57, %v5860_v48  ;;  %v5965_v50 = vpack.c.bf16 %v1024_v52, %v1021_v49 }
 0x333   : > { %v5906_v14 = vpop.eup %4741  ;;  %v1343_v59 = vmul.f32 1.442695, %v1317_v9  ;;  %1367 = vadd.xlane.f32.xlu0 %v5899_v33  ;;  %4411 = vmatprep.mubr.msk.bf16.mxu1 %vm1113_vm0, %v2329_v53  ;;  %v5929_v39 = vpack.c.bf16 %v1048_v44, %v1045_v7 }
 0x334   : > { %1357 = vadd.xlane.f32.xlu1 %v5906_v14  ;;  %v1298_v42 = vpop.xlane.xlu1 %1297  ;;  %4263 = vmatprep.subr.bf16.mxu0 %v5902_v60  ;;  %v5943_v48 = vpack.c.bf16 %v1040_v56, %v1037_v5  ;;  %7091 = vst [vmem:[#allocation46_spill] sm:$0xff] %v5965_v50 }
 0x335   : > { %4749 = vpow2.f32 %v1343_v59  ;;  %v1318_v2 = vsub.f32 %v5776_v25, %v1298_v42  ;;  %v5953_v42 = vpack.c.bf16 %v1032_v17, %v1029_v26 }
 0x336   : > { %v5913_v58 = vpop.eup %4743  ;;  %4751 = vpow2.f32 %v1339_v19  ;;  %4264 = vmatpush3.bf16.msra.mxu0 %v5902_v60 }
 0x337   : > { %v1345_v55 = vmul.f32 1.442695, %v1318_v2  ;;  %1363 = vadd.xlane.f32.xlu0 %v5913_v58  ;;  %4265 = vmatprep.subr.bf16.mxu0 %v5919_v30  ;;  %7090 = vst [vmem:[#allocation45_spill] sm:$0xff] %v5953_v42 }
 0x338   : > { %v1294_v16 = vpop.xlane.xlu1 %1293 }
 0x339   : > { %4753 = vpow2.f32 %v1345_v55  ;;  %v1316_v25 = vsub.f32 %v5787_v29, %v1294_v16 }
 0x33a   : > { %v5925_v1 = vpop.eup %4745  ;;  %4266 = vmatpush3.bf16.msra.mxu0 %v5919_v30 }
 0x33b   : > { %v1341_v51 = vmul.f32 1.442695, %v1316_v25  ;;  %1369 = vadd.xlane.f32.xlu1 %v5925_v1  ;;  %4267 = vmatprep.subr.bf16.mxu0 %v5929_v39 }
 0x33c   : > { %v1304_v9 = vpop.xlane.xlu1 %1303 }
 0x33d   : > { %4755 = vpow2.f32 %v1341_v51  ;;  %v1321_v29 = vsub.f32 %v5798_v32, %v1304_v9  ;;  %v2394_v9 = vsel %vm1113_vm0, %v5876_v6, 0 }
 0x33e   : > { %v5937_v53 = vpop.eup %4747  ;;  %4268 = vmatpush3.bf16.msra.mxu0 %v5929_v39 }
 0x33f   : > { %v1351_v21 = vmul.f32 1.442695, %v1321_v29  ;;  %1365 = vadd.xlane.f32.xlu1 %v5937_v53  ;;  %4269 = vmatprep.subr.bf16.mxu0 %v5943_v48 }
 0x340   : > { %v1300_v59 = vpop.xlane.xlu1 %1299 }
 0x341   : > { %4757 = vpow2.f32 %v1351_v21  ;;  %v1319_v32 = vsub.f32 %v5811_v37, %v1300_v59 }
 0x342   : > { %v5949_v19 = vpop.eup %4749  ;;  %4270 = vmatpush3.bf16.msra.mxu0 %v5943_v48 }
 0x343   : > { %v1347_v2 = vmul.f32 1.442695, %v1319_v32  ;;  %1375 = vadd.xlane.f32.xlu0 %v5949_v19  ;;  %v5959_v44 = vpop.eup %4751  ;;  %4271 = vmatprep.subr.bf16.mxu0 %v5953_v42 }
 0x344   : > { %v1306_v7 = vpop.xlane.xlu1 %1305 }
 0x345   : > { %4759 = vpow2.f32 %v1347_v2  ;;  %v1322_v37 = vsub.f32 %v5824_v23, %v1306_v7 }
 0x346   : > { %v5963_v55 = vpop.eup %4753  ;;  %4272 = vmatpush3.bf16.msra.mxu0 %v5953_v42 }
 0x347   : > { %v1353_v62 = vmul.f32 1.442695, %v1322_v37  ;;  %1371 = vadd.xlane.f32.xlu0 %v5959_v44  ;;  %1377 = vadd.xlane.f32.xlu1 %v5963_v55 }
 0x348   : > { %v1302_v57 = vpop.xlane.xlu1 %1301  ;;  %4273 = vmatprep.subr.bf16.mxu0 %v5965_v50 }
 0x349   : > { %4761 = vpow2.f32 %v1353_v62  ;;  %v1320_v16 = vsub.f32 %v5834_v46, %v1302_v57 }
 0x34a   : > { %v5972_v23 = vpop.eup %4755  ;;  %4274 = vmatpush3.bf16.msra.mxu0 %v5965_v50 }
 0x34b   : > { %v1349_v25 = vmul.f32 1.442695, %v1320_v16  ;;  %1373 = vadd.xlane.f32.xlu1 %v5972_v23 }
 0x34c   : > { %v2353_v5 = vpop.permute.xlu1 %2352 }
 0x34d   : > { %4763 = vpow2.f32 %v1349_v25  ;;  %4598 = vmatprep.subr.msk.bf16.mxu1 %vm1113_vm0, %v2353_v5  ;;  %v2397_v56 = vsel %vm1113_vm0, %v2353_v5, 0 }
 0x34e   : > { %v5979_v51 = vpop.eup %4757  ;;  %4402 = vmatpush3.bf16.xpose.msra.mxu1 %v2397_v56 }
 0x34f   : > { %1383 = vadd.xlane.f32.xlu0 %v5979_v51  ;;  %4599 = vmatprep.subr.msk.bf16.mxu1 %vm1113_vm0, %v5876_v6  ;;  %v2388_v6 = vsel %vm1113_vm0, %v5885_v38, 0 }
 0x350   : > { %v2349_v26 = vpop.permute.xlu1 %2348 }
 0x351   : > { %v2391_v21 = vsel %vm1113_vm0, %v2349_v26, 0 }
 0x352   : > { %v5984_v46 = vpop.eup %4759 }
 0x353   : > { %1379 = vadd.xlane.f32.xlu0 %v5984_v46 }
 0x354   : > { %v2345_v59 = vpop.permute.xlu1 %2344 }
 0x355   : > { %v2385_v32 = vsel %vm1113_vm0, %v2345_v59, 0 }
 0x356   : > { %v5989_v29 = vpop.eup %4761  ;;  %4404 = vmatpush3.bf16.xpose.msra.mxu1 %v2394_v9 }
 0x357   : > { %1385 = vadd.xlane.f32.xlu1 %v5989_v29  ;;  %4600 = vmatprep.subr.msk.bf16.mxu1 %vm1113_vm0, %v2349_v26 }
 0x35a   : > { %v5993_v17 = vpop.eup %4763 }
 0x35b   : > { %1381 = vadd.xlane.f32.xlu1 %v5993_v17 }
 0x35e   : > { %4406 = vmatpush3.bf16.xpose.msra.mxu1 %v2391_v21 }
 0x35f   : > { %4601 = vmatprep.subr.msk.bf16.mxu1 %vm1113_vm0, %v5885_v38  ;;  %v4329_v38 = vpop.f32.mrf.mxu1 }
 0x360   : > { %v6030_v16 = vsel %vm472_vm1, %v4329_v38, -1e+09 }
 0x361   : > { %v1811_v49 = vpop.f32.mrf.mxu1 }
 0x362   : > { %v6024_v62 = vsel %vm470_vm2, %v1811_v49, -1e+09 }
 0x363   : > { %v4330_v52 = vpop.f32.mrf.mxu1 }
 0x364   : > { %v6036_v5 = vsel %vm473_vm4, %v4330_v52, -1e+09 }
 0x365   : > { %v1814_v2 = vpop.f32.mrf.mxu1 }
 0x366   : > { %4408 = vmatpush3.bf16.xpose.msra.mxu1 %v2388_v6  ;;  %v6018_v7 = vsel %vm471_vm3, %v1814_v2, -1e+09 }
 0x367   : > { %4602 = vmatprep.subr.msk.bf16.mxu1 %vm1113_vm0, %v2345_v59  ;;  %v4333_v37 = vpop.f32.mrf.mxu1 }
 0x368   : > { %v6056_v59 = vsel %vm7021_vm5, %v4333_v37, -1e+09  ;;  %vm7092_vm5 = vcmp.ge.s32.totalorder %v5782_v27, %v5659_v45 }
 0x369   : > { %2332 = vrot.lane.b32.xlu0 %v5549_v22, %s5180_s20  ;;  %v1827_v57 = vpop.f32.mrf.mxu1 }
 0x36a   : > { %v6042_v9 = vsel %vm474_vm6, %v1827_v57, -1e+09 }
 0x36b   : > { %v4334_v25 = vpop.f32.mrf.mxu1 }
 0x36c   : > { %2330 = vrot.lane.b32.xlu1 %v5517_v3, %s5180_s20 }
 0x36d   : > { %2336 = vrot.lane.b32.xlu0 %v5561_v28, %s5180_s20  ;;  %v1830_v56 = vpop.f32.mrf.mxu1 }
 0x36e   : > { %4410 = vmatpush3.bf16.xpose.msra.mxu1 %v2385_v32  ;;  %v6050_v21 = vsel %vm475_vm9, %v1830_v56, -1e+09 }
 0x36f   : > { %v4337_v26 = vpop.f32.mrf.mxu1 }
 0x370   : > { %2334 = vrot.lane.b32.xlu1 %v5531_v15, %s5180_s20  ;;  %v6074_v37 = vsel %vm480_vm10, %v4337_v26, -1e+09 }
 0x371   : > { %2340 = vrot.lane.b32.xlu0 %v5585_v40, %s5180_s20  ;;  %v1843_v6 = vpop.f32.mrf.mxu1 }
 0x372   : > { %v6062_v38 = vsel %vm478_vm7, %v1843_v6, -1e+09 }
 0x373   : > { %v4338_v32 = vpop.f32.mrf.mxu1 }
 0x374   : > { %2338 = vrot.lane.b32.xlu1 %v5545_v20, %s5180_s20 }
 0x375   : > { %v1846_v49 = vpop.f32.mrf.mxu1 }
 0x376   : > { %v6068_v2 = vsel %vm479_vm12, %v1846_v49, -1e+09 }
 0x377   : > { %v4341_v57 = vpop.f32.mrf.mxu1 }
 0x379   : > { %v1859_v56 = vpop.f32.mrf.mxu1 }
 0x37a   : > { %v6086_v26 = vsel %vm482_vm14, %v1859_v56, -1e+09  ;;  %v6104_v56 = vsel %vm7092_vm5, %v4341_v57, -1e+09  ;;  %v7093_v57 = vld [vmem:[#allocation44_spill] sm:$0xff] }
 0x37b   : > { %v4342_v49 = vpop.f32.mrf.mxu1 }
 0x37d   : > { %v1862_v24 = vpop.f32.mrf.mxu1 }
 0x390   : > { %1892 = vmax.xlane.f32.xlu0 %v6018_v7 }
 0x398   : > { %1890 = vmax.xlane.f32.xlu1 %v6024_v62 }
 0x39c   : > { %1894 = vmax.xlane.f32.xlu1 %v6030_v16 }
 0x3a0   : > { %1896 = vmax.xlane.f32.xlu1 %v6036_v5 }
 0x3a4   : > { %1898 = vmax.xlane.f32.xlu1 %v6042_v9 }
 0x3a6   : > { %2342 = vrot.lane.b32.xlu0 %v5580_v36, %s5180_s20  ;;  %v6080_v36 = vsel %vm481_vm11, %v4338_v32, -1e+09  ;;  %v6092_v32 = vsel %vm483_vm13, %v1862_v24, -1e+09 }
 0x3a8   : > { %1900 = vmax.xlane.f32.xlu1 %v6050_v21 }
 0x3ac   : > { %1902 = vmax.xlane.f32.xlu1 %v6056_v59 }
 0x3b0   : > { %1906 = vmax.xlane.f32.xlu1 %v6062_v38  ;;  %v1360_v52 = vpop.xlane.xlu0 %1359 }
 0x3b4   : > { %1908 = vmax.xlane.f32.xlu1 %v6068_v2  ;;  %v1356_v54 = vpop.xlane.xlu0 %1355 }
 0x3b8   : > { %1910 = vmax.xlane.f32.xlu1 %v6074_v37  ;;  %v1362_v6 = vpop.xlane.xlu1 %1361 }
 0x3b9   : > { %4765 = vrcp.f32 %v1362_v6 }
 0x3ba   : > { %4767 = vrcp.f32 %v1356_v54 }
 0x3bb   : > { %4769 = vrcp.f32 %v1360_v52 }
 0x3bc   : > { %1912 = vmax.xlane.f32.xlu1 %v6080_v36  ;;  %v1368_v11 = vpop.xlane.xlu0 %1367 }
 0x3bd   : > { %v1358_v13 = vpop.xlane.xlu1 %1357 }
 0x3be   : > { %4771 = vrcp.f32 %v1358_v13  ;;  %v6098_v13 = vsel %vm477_vm8, %v4334_v25, -1e+09  ;;  %v6110_v25 = vsel %vm485_vm15, %v4342_v49, -1e+09 }
 0x3c0   : > { %1914 = vmax.xlane.f32.xlu1 %v6086_v26  ;;  %v1364_v54 = vpop.xlane.xlu0 %1363 }
 0x3c4   : > { %1916 = vmax.xlane.f32.xlu1 %v6092_v32  ;;  %v1370_v52 = vpop.xlane.xlu1 %1369 }
 0x3c5   : > { %1904 = vmax.xlane.f32.xlu0 %v6098_v13  ;;  %4773 = vrcp.f32 %v1370_v52 }
 0x3c6   : > { %4775 = vrcp.f32 %v1364_v54  ;;  %v4766_v24 = vpop.eup %4765 }
 0x3c7   : > { %4777 = vrcp.f32 %v1368_v11  ;;  %v4768_v41 = vpop.eup %4767  ;;  %v1406_v52 = vmul.f32 %v4766_v24, %v5883_v0 }
 0x3c8   : > { %1918 = vmax.xlane.f32.xlu1 %v6104_v56  ;;  %v1366_v6 = vpop.xlane.xlu1 %1365  ;;  %v4770_v31 = vpop.eup %4769  ;;  %v1403_v54 = vmul.f32 %v4768_v41, %v7093_v57 }
 0x3c9   : > { %4779 = vrcp.f32 %v1366_v6  ;;  %v1405_v20 = vmul.f32 %v4770_v31, %v7094_v63 }
 0x3cb   : > { %v4772_v18 = vpop.eup %4771  ;;  %v1420_v6 = vpack.c.bf16 %v1406_v52, %v1405_v20 }
 0x3cc   : > { %v1376_v27 = vpop.xlane.xlu0 %1375  ;;  %1920 = vmax.xlane.f32.xlu1 %v6110_v25  ;;  %v1404_v11 = vmul.f32 %v4772_v18, %v5906_v14 }
 0x3ce   : > { %v1419_v4 = vpack.c.bf16 %v1404_v11, %v1403_v54 }
 0x3d0   : > { %4275 = vmatprep.mubr.bf16.mxu0 %v1419_v4  ;;  %v1372_v15 = vpop.xlane.xlu0 %1371  ;;  %v1378_v12 = vpop.xlane.xlu1 %1377 }
 0x3d1   : > { %4276 = vmatmul.mubr.bf16.vlgmr.msra.gmra.mxu0 %v1420_v6  ;;  %4781 = vrcp.f32 %v1378_v12 }
 0x3d2   : > { %v4774_v49 = vpop.eup %4773  ;;  %4783 = vrcp.f32 %v1372_v15 }
 0x3d3   : > { %v4776_v35 = vpop.eup %4775  ;;  %4785 = vrcp.f32 %v1376_v27  ;;  %v1410_v41 = vmul.f32 %v4774_v49, %v5925_v1 }
 0x3d4   : > { %v1374_v0 = vpop.xlane.xlu1 %1373  ;;  %v4778_v24 = vpop.eup %4777  ;;  %v1407_v18 = vmul.f32 %v4776_v35, %v5913_v58 }
 0x3d5   : > { %4787 = vrcp.f32 %v1374_v0  ;;  %v1409_v20 = vmul.f32 %v4778_v24, %v5899_v33 }
 0x3d6   : > { %v4780_v3 = vpop.eup %4779 }
 0x3d7   : > { %v1408_v63 = vmul.f32 %v4780_v3, %v5937_v53  ;;  %v1422_v14 = vpack.c.bf16 %v1410_v41, %v1409_v20 }
 0x3d8   : > { %v1384_v31 = vpop.xlane.xlu0 %1383 }
 0x3d9   : > { %v1421_v4 = vpack.c.bf16 %v1408_v63, %v1407_v18 }
 0x3db   : > { %4279 = vmatprep.mubr.bf16.mxu0 %v1421_v4  ;;  %2064 = vrot.lane.b32.xlu0 %v5889_v34, %s5179_s6 }
 0x3dc   : > { %4280 = vmatmul.mubr.bf16.gmra.mxu0 %v1422_v14  ;;  %v1380_v27 = vpop.xlane.xlu0 %1379 }
 0x3dd   : > { %2062 = vrot.lane.b32.xlu1 %v5894_v8, %s5179_s6 }
 0x3de   : > { %v4782_v15 = vpop.eup %4781 }
 0x3df   : > { %2060 = vrot.lane.b32.xlu0 %v5902_v60, %s5179_s6  ;;  %v4784_v12 = vpop.eup %4783  ;;  %v1414_v58 = vmul.f32 %v4782_v15, %v5963_v55 }
 0x3e0   : > { %v1386_v3 = vpop.xlane.xlu1 %1385  ;;  %v4786_v35 = vpop.eup %4785  ;;  %v1411_v1 = vmul.f32 %v4784_v12, %v5959_v44  ;;  %v4725_v12 = vld [vmem:[#allocation8 + $0xc8] sm:$0xff]  }
 0x3e1   : > { %2056 = vrot.lane.b32.xlu1 %v5929_v39, %s5179_s6  ;;  %4789 = vrcp.f32 %v1386_v3  ;;  %v1413_v57 = vmul.f32 %v4786_v35, %v5949_v19  ;;  %v2333_v55 = vpop.permute.xlu0 %2332  ;;  %4291 = vmatprep.subr.bf16.mxu0 %v4725_v12 }
 0x3e2   : > { %v4788_v33 = vpop.eup %4787  ;;  %4791 = vrcp.f32 %v1380_v27  ;;  %4292 = vmatpush3.bf16.msra.mxu0 %v4725_v12 }
 0x3e3   : > { %v1412_v53 = vmul.f32 %v4788_v33, %v5972_v23  ;;  %2058 = vrot.lane.b32.xlu0 %v5919_v30, %s5179_s6  ;;  %4793 = vrcp.f32 %v1384_v31  ;;  %v1424_v11 = vpack.c.bf16 %v1414_v58, %v1413_v57 }
 0x3e4   : > { %v1382_v52 = vpop.xlane.xlu1 %1381 }
 0x3e5   : > { %4795 = vrcp.f32 %v1382_v52  ;;  %v1423_v54 = vpack.c.bf16 %v1412_v53, %v1411_v1  ;;  %2054 = vrot.lane.b32.xlu1 %v5943_v48, %s5179_s6  ;;  %v2337_v0 = vpop.permute.xlu0 %2336 }
 0x3e7   : > { %4283 = vmatprep.mubr.bf16.mxu0 %v1423_v54  ;;  %2052 = vrot.lane.b32.xlu0 %v5953_v42, %s5179_s6 }
 0x3e8   : > { %4284 = vmatmul.mubr.bf16.gmra.mxu0 %v1424_v11  ;;  %v2331_v44 = vpop.permute.xlu1 %2330 }
 0x3e9   : > { %4412 = vmatmul.mubr.msk.bf16.vlgmr.msra.gmra.mxu1 %vm1113_vm0, %v2331_v44  ;;  %v2341_v15 = vpop.permute.xlu0 %2340 }
 0x3ea   : > { %4415 = vmatprep.mubr.msk.bf16.mxu1 %vm1113_vm0, %v2333_v55 }
 0x3ec   : > { %v2335_v19 = vpop.permute.xlu1 %2334 }
 0x3ee   : > { %v4790_v23 = vpop.eup %4789 }
 0x3ef   : > { %v4792_v6 = vpop.eup %4791  ;;  %v1418_v41 = vmul.f32 %v4790_v23, %v5989_v29  ;;  %v4726_v29 = vld [vmem:[#allocation8 + $0xc0] sm:$0xff]  }
 0x3f0   : > { %v4794_v49 = vpop.eup %4793  ;;  %v1415_v18 = vmul.f32 %v4792_v6, %v5984_v46  ;;  %v2339_v14 = vpop.permute.xlu1 %2338  ;;  %4293 = vmatprep.subr.bf16.mxu0 %v4726_v29 }
 0x3f1   : > { %4416 = vmatmul.mubr.msk.bf16.gmra.mxu1 %vm1113_vm0, %v2335_v19  ;;  %v1417_v20 = vmul.f32 %v4794_v49, %v5979_v51  ;;  %4294 = vmatpush3.bf16.msra.mxu0 %v4726_v29 }
 0x3f2   : > { %v4796_v24 = vpop.eup %4795  ;;  %4419 = vmatprep.mubr.msk.bf16.mxu1 %vm1113_vm0, %v2337_v0 }
 0x3f3   : > { %v1416_v63 = vmul.f32 %v4796_v24, %v5993_v17  ;;  %v1426_v31 = vpack.c.bf16 %v1418_v41, %v1417_v20 }
 0x3f5   : > { %v1425_v4 = vpack.c.bf16 %v1416_v63, %v1415_v18 }
 0x3f7   : > { %4287 = vmatprep.mubr.bf16.mxu0 %v1425_v4 }
 0x3f8   : > { %4288 = vmatmul.mubr.bf16.gmra.mxu0 %v1426_v31 }
 0x3f9   : > { %4420 = vmatmul.mubr.msk.bf16.gmra.mxu1 %vm1113_vm0, %v2339_v14 }
 0x3fa   : > { %4423 = vmatprep.mubr.msk.bf16.mxu1 %vm1113_vm0, %v2341_v15 }
 0x419   : > { %v1893_v46 = vpop.xlane.xlu0 %1892 }
 0x41a   : > { %v1923_v57 = vsub.f32 %v6018_v7, %v1893_v46 }
 0x41c   : > { %v1940_v44 = vmul.f32 1.442695, %v1923_v57 }
 0x41d   : > { %v2343_v17 = vpop.permute.xlu0 %2342 }
 0x41e   : > { %4424 = vmatmul.mubr.msk.bf16.gmra.mxu1 %vm1113_vm0, %v2343_v17 }
 0x421   : > { %v1891_v51 = vpop.xlane.xlu1 %1890 }
 0x422   : > { %v1922_v3 = vsub.f32 %v6024_v62, %v1891_v51 }
 0x424   : > { %v1938_v1 = vmul.f32 1.442695, %v1922_v3 }
 0x425   : > { %v1895_v27 = vpop.xlane.xlu1 %1894 }
 0x426   : > { %v1924_v35 = vsub.f32 %v6030_v16, %v1895_v27 }
 0x428   : > { %v1942_v33 = vmul.f32 1.442695, %v1924_v35 }
 0x429   : > { %v1897_v58 = vpop.xlane.xlu1 %1896 }
 0x42a   : > { %4797 = vpow2.f32 %v1942_v33  ;;  %v1925_v53 = vsub.f32 %v6036_v5, %v1897_v58 }
 0x42b   : > { %4799 = vpow2.f32 %v1938_v1 }
 0x42c   : > { %v1944_v54 = vmul.f32 1.442695, %v1925_v53 }
 0x42d   : > { %v1899_v52 = vpop.xlane.xlu1 %1898 }
 0x42e   : > { %4801 = vpow2.f32 %v1944_v54  ;;  %v1926_v16 = vsub.f32 %v6042_v9, %v1899_v52 }
 0x42f   : > { %4803 = vpow2.f32 %v1940_v44  ;;  %v7096_v44 = vld [vmem:[#allocation20_spill] sm:$0xff] }
 0x430   : > { %v1946_v49 = vmul.f32 1.442695, %v1926_v16  ;;  %v7100_v16 = vld [vmem:[#allocation29_spill] sm:$0xff] }
 0x431   : > { %v1901_v11 = vpop.xlane.xlu1 %1900 }
 0x432   : > { %v1927_v55 = vsub.f32 %v6050_v21, %v1901_v11  ;;  %v7095_v11 = vld [vmem:[#allocation24_spill] sm:$0xff] }
 0x434   : > { %v1948_v23 = vmul.f32 1.442695, %v1927_v55  ;;  %v7097_v55 = vld [vmem:[#allocation22_spill] sm:$0xff] }
 0x435   : > { %v1903_v62 = vpop.xlane.xlu1 %1902 }
 0x436   : > { %v1928_v6 = vsub.f32 %v6056_v59, %v1903_v62  ;;  %4805 = vpow2.f32 %v1948_v23  ;;  %v7098_v23 = vld [vmem:[#allocation27_spill] sm:$0xff]  ;;  %v7099_v62 = vld [vmem:[#allocation21_spill] sm:$0xff] }
 0x437   : > { %v6157_v19 = vpop.eup %4797 }
 0x438   : > { %v1950_v5 = vmul.f32 1.442695, %v1928_v6  ;;  %1974 = vadd.xlane.f32.xlu1 %v6157_v19  ;;  %v6160_v0 = vpop.eup %4799  ;;  %v7101_v6 = vld [vmem:[#allocation23_spill] sm:$0xff] }
 0x439   : > { %v1907_v7 = vpop.xlane.xlu1 %1906 }
 0x43a   : > { %4807 = vpow2.f32 %v1950_v5  ;;  %v1930_v33 = vsub.f32 %v6062_v38, %v1907_v7  ;;  %v7102_v5 = vld [vmem:[#allocation19_spill] sm:$0xff]  ;;  %v7103_v7 = vld [vmem:[#allocation25_spill] sm:$0xff] }
 0x43b   : > { %4809 = vpow2.f32 %v1946_v49  ;;  %v6164_v9 = vpop.eup %4801 }
 0x43c   : > { %1970 = vadd.xlane.f32.xlu1 %v6160_v0  ;;  %v6167_v18 = vpop.eup %4803 }
 0x43d   : > { %v1909_v21 = vpop.xlane.xlu1 %1908 }
 0x43e   : > { %v1931_v24 = vsub.f32 %v6068_v2, %v1909_v21 }
 0x440   : > { %v1956_v59 = vmul.f32 1.442695, %v1931_v24  ;;  %1976 = vadd.xlane.f32.xlu1 %v6164_v9 }
 0x441   : > { %v1911_v41 = vpop.xlane.xlu1 %1910 }
 0x442   : > { %4811 = vpow2.f32 %v1956_v59  ;;  %v1932_v29 = vsub.f32 %v6074_v37, %v1911_v41  ;;  %v1954_v37 = vmul.f32 1.442695, %v1930_v33 }
 0x443   : > { %v6170_v20 = vpop.eup %4805 }
 0x444   : > { %1972 = vadd.xlane.f32.xlu1 %v6167_v18  ;;  %v1958_v58 = vmul.f32 1.442695, %v1932_v29 }
 0x445   : > { %v1913_v63 = vpop.xlane.xlu1 %1912 }
 0x447   : > { %v6172_v4 = vpop.eup %4807 }
 0x448   : > { %1980 = vadd.xlane.f32.xlu1 %v6170_v20  ;;  %1982 = vadd.xlane.f32.xlu0 %v6172_v4  ;;  %v6176_v31 = vpop.eup %4809 }
 0x449   : > { %v1915_v2 = vpop.xlane.xlu1 %1914 }
 0x44a   : > { %v1934_v27 = vsub.f32 %v6086_v26, %v1915_v2 }
 0x44c   : > { %1978 = vadd.xlane.f32.xlu0 %v6176_v31  ;;  %v1962_v53 = vmul.f32 1.442695, %v1934_v27 }
 0x44d   : > { %v6179_v14 = vpop.xlane.xlu1 %1916 }
 0x44e   : > { %v1905_v15 = vpop.xlane.xlu0 %1904 }
 0x44f   : > { %v6181_v12 = vpop.eup %4811  ;;  %v1929_v46 = vsub.f32 %v6098_v13, %v1905_v15  ;;  %v1933_v13 = vsub.f32 %v6080_v36, %v1913_v63 }
 0x450   : > { %1988 = vadd.xlane.f32.xlu1 %v6181_v12 }
 0x451   : > { %v1952_v17 = vmul.f32 1.442695, %v1929_v46  ;;  %v1919_v51 = vpop.xlane.xlu1 %1918  ;;  %v1960_v52 = vmul.f32 1.442695, %v1933_v13 }
 0x452   : > { %v1936_v3 = vsub.f32 %v6104_v56, %v1919_v51  ;;  %v2065_v35 = vpop.permute.xlu0 %2064 }
 0x453   : > { %4813 = vpow2.f32 %v1952_v17  ;;  %4343 = vmatprep.subr.bf16.mxu0 %v2065_v35 }
 0x454   : > { %v1966_v1 = vmul.f32 1.442695, %v1936_v3 }
 0x455   : > { %v1921_v24 = vpop.xlane.xlu1 %1920 }
 0x456   : > { %4815 = vpow2.f32 %v1966_v1  ;;  %v1937_v63 = vsub.f32 %v6110_v25, %v1921_v24 }
 0x457   : > { %4817 = vpow2.f32 %v1958_v58 }
 0x458   : > { %4819 = vpow2.f32 %v1962_v53  ;;  %v1968_v29 = vmul.f32 1.442695, %v1937_v63 }
 0x459   : > { %4821 = vpow2.f32 %v1954_v37  ;;  %v2063_v46 = vpop.permute.xlu1 %2062 }
 0x45a   : > { %4823 = vpow2.f32 %v1960_v52 }
 0x45b   : > { %4825 = vpow2.f32 %v1968_v29 }
 0x460   : > { %v6190_v26 = vpop.eup %4813 }
 0x461   : > { %1984 = vadd.xlane.f32.xlu0 %v6190_v26 }
 0x463   : > { %v6193_v56 = vpop.eup %4815 }
 0x464   : > { %v6195_v38 = vpop.eup %4817  ;;  %1998 = vadd.xlane.f32.xlu1 %v6193_v56 }
 0x465   : > { %1990 = vadd.xlane.f32.xlu0 %v6195_v38  ;;  %v6199_v57 = vpop.eup %4819 }
 0x466   : > { %v6201_v54 = vpop.eup %4821 }
 0x467   : > { %v6205_v36 = vpop.eup %4823 }
 0x468   : > { %1994 = vadd.xlane.f32.xlu1 %v6199_v57  ;;  %v6241_v13 = vpop.eup %4825 }
 0x469   : > { %1986 = vadd.xlane.f32.xlu0 %v6201_v54 }
 0x46d   : > { %1992 = vadd.xlane.f32.xlu0 %v6205_v36 }
 0x479   : > { %2050 = vrot.lane.b32.xlu1 %v5965_v50, %s5179_s6 }
 0x47d   : > { %2979 = vrot.lane.b32.xlu1 %v7095_v11, %s5181_s27 }
 0x481   : > { %2977 = vrot.lane.b32.xlu1 %v7096_v44, %s5181_s27 }
 0x483   : > { %2981 = vrot.lane.b32.xlu0 %v7097_v55, %s5181_s27 }
 0x485   : > { %2973 = vrot.lane.b32.xlu1 %v7098_v23, %s5181_s27 }
 0x487   : > { %2975 = vrot.lane.b32.xlu0 %v7099_v62, %s5181_s27 }
 0x489   : > { %2969 = vrot.lane.b32.xlu1 %v7100_v16, %s5181_s27 }
 0x48b   : > { %2971 = vrot.lane.b32.xlu0 %v7101_v6, %s5181_s27 }
 0x48d   : > { %2951 = vrot.lane.b32.xlu1 %v7102_v5, %s5181_s27 }
 0x48f   : > { %2967 = vrot.lane.b32.xlu0 %v7103_v7, %s5181_s27 }
 0x491   : > { %v4277_v49 = vpop.f32.mrf.mxu0  ;;  %2955 = vrot.lane.b32.xlu1 %v5549_v22, %s5181_s27  ;;  %v1935_v22 = vsub.f32 %v6092_v32, %v6179_v14  ;;  %v2057_v32 = vpop.permute.xlu1 %2056 }
 0x493   : > { %v1461_v21 = vpop.f32.mrf.mxu0  ;;  %v1964_v25 = vmul.f32 1.442695, %v1935_v22 }
 0x495   : > { %v4278_v59 = vpop.f32.mrf.mxu0  ;;  %2959 = vrot.lane.b32.xlu1 %v5561_v28, %s5181_s27  ;;  %v2061_v28 = vpop.permute.xlu0 %2060  ;;  %4827 = vpow2.f32 %v1964_v25  ;;  %v7104_v25 = vld [vmem:[#allocation26_spill] sm:$0xff] }
 0x496   : > { %v1525_v15 = vpack.c.bf16 %v4278_v59, %v4277_v49  ;;  %v2055_v53 = vpop.permute.xlu1 %2054 }
 0x497   : > { %v1464_v41 = vpop.f32.mrf.mxu0 }
 0x498   : > { %v1524_v2 = vpack.c.bf16 %v1464_v41, %v1461_v21 }
 0x499   : > { %2963 = vrot.lane.b32.xlu1 %v5585_v40, %s5181_s27  ;;  %v2059_v33 = vpop.permute.xlu0 %2058 }
 0x49a   : > { %4295 = vmatprep.mubr.msk.bf16.mxu0 %vm1113_vm0, %v1524_v2 }
 0x49b   : > { %4296 = vmatmul.mubr.msk.bf16.vlgmr.msra.gmra.mxu0 %vm1113_vm0, %v1525_v15 }
 0x49c   : > { %4344 = vmatpush3.bf16.msra.mxu0 %v2065_v35  ;;  %v4281_v17 = vpop.f32.mrf.mxu0 }
 0x49d   : > { %4345 = vmatprep.subr.bf16.mxu0 %v2063_v46  ;;  %v2053_v55 = vpop.permute.xlu0 %2052 }
 0x49e   : > { %v1477_v51 = vpop.f32.mrf.mxu0 }
 0x4a0   : > { %4346 = vmatpush3.bf16.msra.mxu0 %v2063_v46  ;;  %v4282_v27 = vpop.f32.mrf.mxu0 }
 0x4a1   : > { %4347 = vmatprep.subr.bf16.mxu0 %v2061_v28  ;;  %v1527_v58 = vpack.c.bf16 %v4282_v27, %v4281_v17 }
 0x4a2   : > { %v1480_v40 = vpop.f32.mrf.mxu0  ;;  %v6246_v62 = vpop.eup %4827 }
 0x4a3   : > { %v1526_v3 = vpack.c.bf16 %v1480_v40, %v1477_v51 }
 0x4a4   : > { %4348 = vmatpush3.bf16.msra.mxu0 %v2061_v28 }
 0x4a5   : > { %4349 = vmatprep.subr.bf16.mxu0 %v2059_v33  ;;  %4299 = vmatprep.mubr.msk.bf16.mxu0 %vm1113_vm0, %v1526_v3 }
 0x4a6   : > { %4300 = vmatmul.mubr.msk.bf16.gmra.mxu0 %vm1113_vm0, %v1527_v58  ;;  %v7106_v58 = vld [vmem:[#allocation28_spill] sm:$0xff] }
 0x4a8   : > { %4350 = vmatpush3.bf16.msra.mxu0 %v2059_v33  ;;  %v4285_v14 = vpop.f32.mrf.mxu0 }
 0x4a9   : > { %4351 = vmatprep.subr.bf16.mxu0 %v2057_v32  ;;  %v4413_v35 = vpop.f32.mrf.mxu1 }
 0x4aa   : > { %v1493_v1 = vpop.f32.mrf.mxu0  ;;  %v6262_v2 = vsel %vm472_vm1, %v4413_v35, -1e+09  ;;  %v4728_v35 = vld [vmem:[#allocation8 + $0xd0] sm:$0xff]  }
 0x4ab   : > { %v6243_v52 = vpop.f32.mrf.mxu1 }
 0x4ac   : > { %4352 = vmatpush3.bf16.msra.mxu0 %v2057_v32  ;;  %v4286_v37 = vpop.f32.mrf.mxu0 }
 0x4ad   : > { %4353 = vmatprep.subr.bf16.mxu0 %v2055_v53  ;;  %v1529_v23 = vpack.c.bf16 %v4286_v37, %v4285_v14  ;;  %v4414_v16 = vpop.f32.mrf.mxu1 }
 0x4ae   : > { %v1496_v11 = vpop.f32.mrf.mxu0  ;;  %2000 = vadd.xlane.f32.xlu0 %v6241_v13  ;;  %v6270_v46 = vsel %vm473_vm4, %v4414_v16, -1e+09 }
 0x4af   : > { %v1528_v44 = vpack.c.bf16 %v1496_v11, %v1493_v1  ;;  %v2445_v6 = vpop.f32.mrf.mxu1 }
 0x4b0   : > { %4354 = vmatpush3.bf16.msra.mxu0 %v2055_v53  ;;  %v6256_v21 = vsel %vm471_vm3, %v2445_v6, -1e+09  ;;  %v7108_v53 = vld [vmem:[#allocation30_spill] sm:$0xff] }
 0x4b1   : > { %4355 = vmatprep.subr.bf16.mxu0 %v2053_v55  ;;  %4303 = vmatprep.mubr.msk.bf16.mxu0 %vm1113_vm0, %v1528_v44  ;;  %v6251_v7 = vpop.f32.mrf.mxu1 }
 0x4b2   : > { %4304 = vmatmul.mubr.msk.bf16.gmra.mxu0 %vm1113_vm0, %v1529_v23  ;;  %1996 = vadd.xlane.f32.xlu0 %v6246_v62 }
 0x4b3   : > { %v2458_v59 = vpop.f32.mrf.mxu1 }
 0x4b4   : > { %4356 = vmatpush3.bf16.msra.mxu0 %v2053_v55  ;;  %v6276_v51 = vsel %vm474_vm6, %v2458_v59, -1e+09 }
 0x4b5   : > { %v4418_v22 = vpop.f32.mrf.mxu1 }
 0x4b6   : > { %v6292_v1 = vsel %vm477_vm8, %v4418_v22, -1e+09 }
 0x4b7   : > { %v2461_v17 = vpop.f32.mrf.mxu1 }
 0x4b8   : > { %v4289_v5 = vpop.f32.mrf.mxu0  ;;  %v6284_v33 = vsel %vm475_vm9, %v2461_v17, -1e+09 }
 0x4b9   : > { %v4421_v27 = vpop.f32.mrf.mxu1 }
 0x4ba   : > { %v1509_v49 = vpop.f32.mrf.mxu0 }
 0x4bb   : > { %v2474_v32 = vpop.f32.mrf.mxu1 }
 0x4bc   : > { %v4290_v24 = vpop.f32.mrf.mxu0  ;;  %v6300_v44 = vsel %vm478_vm7, %v2474_v32, -1e+09 }
 0x4bd   : > { %2523 = vmax.xlane.f32.xlu1 %v6256_v21  ;;  %v1531_v15 = vpack.c.bf16 %v4290_v24, %v4289_v5  ;;  %v4422_v37 = vpop.f32.mrf.mxu1  ;;  %v6312_v24 = vsel %vm480_vm10, %v4421_v27, -1e+09 }
 0x4be   : > { %v1512_v41 = vpop.f32.mrf.mxu0 }
 0x4bf   : > { %v1530_v63 = vpack.c.bf16 %v1512_v41, %v1509_v49  ;;  %v2477_v55 = vpop.f32.mrf.mxu1 }
 0x4c0   : > { %v6306_v16 = vsel %vm479_vm12, %v2477_v55, -1e+09 }
 0x4c1   : > { %4307 = vmatprep.mubr.msk.bf16.mxu0 %vm1113_vm0, %v1530_v63  ;;  %2525 = vmax.xlane.f32.xlu1 %v6262_v2  ;;  %v1975_v29 = vpop.xlane.xlu1 %1974 }
 0x4c2   : > { %4308 = vmatmul.mubr.msk.bf16.gmra.mxu0 %vm1113_vm0, %v1531_v15 }
 0x4c5   : > { %2527 = vmax.xlane.f32.xlu1 %v6270_v46  ;;  %v1971_v28 = vpop.xlane.xlu1 %1970 }
 0x4c6   : > { %4829 = vrcp.f32 %v1971_v28  ;;  %v6320_v28 = vsel %vm481_vm11, %v4422_v37, -1e+09 }
 0x4c8   : > { %2953 = vrot.lane.b32.xlu0 %v7104_v25, %s5181_s27 }
 0x4c9   : > { %2529 = vmax.xlane.f32.xlu1 %v6276_v51  ;;  %v1977_v40 = vpop.xlane.xlu1 %1976 }
 0x4cc   : > { %2957 = vrot.lane.b32.xlu0 %v7106_v58, %s5181_s27 }
 0x4cd   : > { %2531 = vmax.xlane.f32.xlu1 %v6284_v33  ;;  %v1973_v14 = vpop.xlane.xlu1 %1972 }
 0x4ce   : > { %4831 = vrcp.f32 %v1973_v14 }
 0x4cf   : > { %4833 = vrcp.f32 %v1977_v40 }
 0x4d0   : > { %2961 = vrot.lane.b32.xlu0 %v7108_v53, %s5181_s27 }
 0x4d1   : > { %2535 = vmax.xlane.f32.xlu1 %v6292_v1  ;;  %v1983_v59 = vpop.xlane.xlu0 %1982 }
 0x4d3   : > { %v4830_v6 = vpop.eup %4829 }
 0x4d4   : > { %v2018_v41 = vmul.f32 %v4830_v6, %v6160_v0  ;;  %v1981_v0 = vpop.xlane.xlu1 %1980  ;;  %v4727_v6 = vld [vmem:[#allocation8 + $0xd8] sm:$0xff]  }
 0x4d5   : > { %2537 = vmax.xlane.f32.xlu1 %v6300_v44  ;;  %v1979_v27 = vpop.xlane.xlu0 %1978 }
 0x4d6   : > { %4835 = vrcp.f32 %v1979_v27 }
 0x4d7   : > { %4837 = vrcp.f32 %v1975_v29 }
 0x4d8   : > { %4839 = vrcp.f32 %v1981_v0 }
 0x4d9   : > { %2539 = vmax.xlane.f32.xlu1 %v6306_v16  ;;  %v1989_v55 = vpop.xlane.xlu1 %1988 }
 0x4db   : > { %v4832_v5 = vpop.eup %4831 }
 0x4dc   : > { %v2019_v63 = vmul.f32 %v4832_v5, %v6167_v18 }
 0x4dd   : > { %2541 = vmax.xlane.f32.xlu1 %v6312_v24 }
 0x4de   : > { %v4425_v15 = vpop.f32.mrf.mxu1  ;;  %v2034_v22 = vpack.c.bf16 %v2019_v63, %v2018_v41 }
 0x4df   : > { %v6340_v5 = vsel %vm7092_vm5, %v4425_v15, -1e+09 }
 0x4e0   : > { %4359 = vmatprep.mubr.bf16.mxu0 %v2034_v22  ;;  %v2490_v25 = vpop.f32.mrf.mxu1  ;;  %v6349_v22 = vsel %vm470_vm2, %v6243_v52, -1e+09 }
 0x4e1   : > { %2543 = vmax.xlane.f32.xlu1 %v6320_v28  ;;  %v6328_v18 = vsel %vm482_vm14, %v2490_v25, -1e+09  ;;  %v4834_v25 = vpop.eup %4833 }
 0x4e2   : > { %v6323_v58 = vpop.f32.mrf.mxu1 }
 0x4e3   : > { %v4836_v15 = vpop.eup %4835 }
 0x4e4   : > { %v2493_v14 = vpop.f32.mrf.mxu1  ;;  %v2022_v32 = vmul.f32 %v4836_v15, %v6176_v31 }
 0x4e5   : > { %2545 = vmax.xlane.f32.xlu1 %v6328_v18  ;;  %v6334_v37 = vsel %vm483_vm13, %v2493_v14, -1e+09  ;;  %v4838_v14 = vpop.eup %4837 }
 0x4e6   : > { %v2020_v17 = vmul.f32 %v4838_v14, %v6157_v19 }
 0x4e9   : > { %2547 = vmax.xlane.f32.xlu1 %v6334_v37 }
 0x4ea   : > { %v1985_v40 = vpop.xlane.xlu0 %1984 }
 0x4eb   : > { %4841 = vrcp.f32 %v1985_v40  ;;  %v4840_v40 = vpop.eup %4839 }
 0x4ec   : > { %4843 = vrcp.f32 %v1983_v59  ;;  %v2021_v59 = vmul.f32 %v4834_v25, %v6164_v9 }
 0x4ed   : > { %2549 = vmax.xlane.f32.xlu1 %v6340_v5  ;;  %v6343_v41 = vpop.xlane.xlu1 %1998  ;;  %4845 = vrcp.f32 %v1989_v55  ;;  %v2023_v55 = vmul.f32 %v4840_v40, %v6170_v20 }
 0x4ee   : > { %v1991_v29 = vpop.xlane.xlu0 %1990  ;;  %v2035_v49 = vpack.c.bf16 %v2021_v59, %v2020_v17 }
 0x4ef   : > { %2521 = vmax.xlane.f32.xlu0 %v6349_v22  ;;  %v2036_v11 = vpack.c.bf16 %v2023_v55, %v2022_v32 }
 0x4f1   : > { %v6352_v27 = vpop.xlane.xlu1 %1994 }
 0x4f2   : > { %v1987_v0 = vpop.xlane.xlu0 %1986 }
 0x4f3   : > { %4847 = vrcp.f32 %v1987_v0 }
 0x4f4   : > { %4849 = vrcp.f32 %v1991_v29 }
 0x4f5   : > { %v2051_v53 = vpop.permute.xlu1 %2050 }
 0x4f6   : > { %v1993_v52 = vpop.xlane.xlu0 %1992  ;;  %4357 = vmatprep.subr.bf16.mxu0 %v2051_v53 }
 0x4f7   : > { %4851 = vrcp.f32 %v1993_v52  ;;  %4358 = vmatpush3.bf16.msra.mxu0 %v2051_v53 }
 0x4f8   : > { %4375 = vmatprep.subr.bf16.mxu0 %v4727_v6  ;;  %v4842_v23 = vpop.eup %4841 }
 0x4f9   : > { %v2980_v0 = vpop.permute.xlu1 %2979  ;;  %v4844_v29 = vpop.eup %4843  ;;  %v2025_v19 = vmul.f32 %v4842_v23, %v6190_v26 }
 0x4fa   : > { %v2982_v9 = vpop.permute.xlu0 %2981  ;;  %4360 = vmatmul.mubr.bf16.vlgmr.msra.gmra.mxu0 %v2035_v49  ;;  %v4846_v17 = vpop.eup %4845  ;;  %v2024_v49 = vmul.f32 %v4844_v29, %v6172_v4  ;;  %v3026_v23 = vsel %vm1113_vm0, %v2980_v0, 0  ;;  %v7117_v4 = vld [vmem:[#allocation31_spill] sm:$0xff] }
 0x4fb   : > { %v3029_v31 = vsel %vm1113_vm0, %v2982_v9, 0  ;;  %4363 = vmatprep.mubr.bf16.mxu0 %v2036_v11  ;;  %4603 = vmatprep.subr.msk.bf16.mxu1 %vm1113_vm0, %v2982_v9  ;;  %v2027_v15 = vmul.f32 %v4846_v17, %v6181_v12  ;;  %v7118_v9 = vld [vmem:[#allocation32_spill] sm:$0xff] }
 0x4fc   : > { %4480 = vmatpush3.bf16.xpose.msra.mxu1 %v3029_v31  ;;  %4376 = vmatpush3.bf16.msra.mxu0 %v4727_v6  ;;  %v2037_v53 = vpack.c.bf16 %v2025_v19, %v2024_v49  ;;  %vm7119_vm5 = vcmp.ge.s32.totalorder %v7118_v9, %v5659_v45 }
 0x4fd   : > { %4604 = vmatprep.subr.msk.bf16.mxu1 %vm1113_vm0, %v2980_v0  ;;  %v2978_v20 = vpop.permute.xlu1 %2977  ;;  %4377 = vmatprep.subr.bf16.mxu0 %v4728_v35  ;;  %v6390_v29 = vsel %vm7119_vm5, %v6251_v7, -1e+09 }
 0x4fe   : > { %2687 = vrot.lane.b32.xlu1 %v5889_v34, %s5180_s20  ;;  %v3023_v52 = vsel %vm1113_vm0, %v2978_v20, 0  ;;  %v2976_v55 = vpop.permute.xlu0 %2975 }
 0x500   : > { %v4848_v32 = vpop.eup %4847  ;;  %4378 = vmatpush3.bf16.msra.mxu0 %v4728_v35 }
 0x501   : > { %v2974_v11 = vpop.permute.xlu1 %2973  ;;  %v2026_v25 = vmul.f32 %v4848_v32, %v6201_v54  ;;  %v4850_v26 = vpop.eup %4849 }
 0x502   : > { %2685 = vrot.lane.b32.xlu1 %v5894_v8, %s5180_s20  ;;  %4364 = vmatmul.mubr.bf16.gmra.mxu0 %v2037_v53  ;;  %v2028_v40 = vmul.f32 %v4850_v26, %v6195_v38  ;;  %v3020_v38 = vsel %vm1113_vm0, %v2976_v55, 0  ;;  %v2972_v0 = vpop.permute.xlu0 %2971 }
 0x503   : > { %v2038_v6 = vpack.c.bf16 %v2027_v15, %v2026_v25  ;;  %v3014_v31 = vsel %vm1113_vm0, %v2972_v0, 0 }
 0x504   : > { %v4852_v14 = vpop.eup %4851  ;;  %4482 = vmatpush3.bf16.xpose.msra.mxu1 %v3026_v23 }
 0x505   : > { %2965 = vrot.lane.b32.xlu0 %v7117_v4, %s5181_s27  ;;  %4367 = vmatprep.mubr.bf16.mxu0 %v2038_v6  ;;  %v2970_v35 = vpop.permute.xlu1 %2969  ;;  %v2029_v54 = vmul.f32 %v4852_v14, %v6205_v36  ;;  %v3017_v36 = vsel %vm1113_vm0, %v2974_v11, 0 }
 0x506   : > { %4605 = vmatprep.subr.msk.bf16.mxu1 %vm1113_vm0, %v2978_v20  ;;  %2681 = vrot.lane.b32.xlu1 %v5919_v30, %s5180_s20  ;;  %v6399_v20 = vsel %vm485_vm15, %v6323_v58, -1e+09  ;;  %v3011_v17 = vsel %vm1113_vm0, %v2970_v35, 0  ;;  %v2968_v49 = vpop.permute.xlu0 %2967 }
 0x507   : > { %v2039_v12 = vpack.c.bf16 %v2029_v54, %v2028_v40  ;;  %v3008_v7 = vsel %vm1113_vm0, %v2968_v49, 0 }
 0x509   : > { %v2952_v59 = vpop.permute.xlu1 %2951 }
 0x50a   : > { %2675 = vrot.lane.b32.xlu1 %v5953_v42, %s5180_s20  ;;  %4368 = vmatmul.mubr.bf16.gmra.mxu0 %v2039_v12 }
 0x50b   : > { %4495 = vmatprep.mubr.msk.bf16.mxu1 %vm1113_vm0, %v2952_v59 }
 0x50c   : > { %4484 = vmatpush3.bf16.xpose.msra.mxu1 %v3023_v52 }
 0x50d   : > { %4606 = vmatprep.subr.msk.bf16.mxu1 %vm1113_vm0, %v2976_v55  ;;  %v2956_v32 = vpop.permute.xlu1 %2955 }
 0x514   : > { %4486 = vmatpush3.bf16.xpose.msra.mxu1 %v3020_v38 }
 0x515   : > { %4607 = vmatprep.subr.msk.bf16.mxu1 %vm1113_vm0, %v2974_v11  ;;  %v2960_v11 = vpop.permute.xlu1 %2959 }
 0x519   : > { %v2964_v15 = vpop.permute.xlu1 %2963 }
 0x51c   : > { %4488 = vmatpush3.bf16.xpose.msra.mxu1 %v3017_v36 }
 0x51d   : > { %4608 = vmatprep.subr.msk.bf16.mxu1 %vm1113_vm0, %v2972_v0 }
 0x524   : > { %2533 = vmax.xlane.f32.xlu0 %v6390_v29  ;;  %4490 = vmatpush3.bf16.xpose.msra.mxu1 %v3014_v31 }
 0x525   : > { %4609 = vmatprep.subr.msk.bf16.mxu1 %vm1113_vm0, %v2970_v35 }
 0x528   : > { %2551 = vmax.xlane.f32.xlu0 %v6399_v20 }
 0x52c   : > { %4492 = vmatpush3.bf16.xpose.msra.mxu1 %v3011_v17 }
 0x52d   : > { %4610 = vmatprep.subr.msk.bf16.mxu1 %vm1113_vm0, %v2968_v49 }
 0x534   : > { %4494 = vmatpush3.bf16.xpose.msra.mxu1 %v3008_v7 }
 0x537   : > { %v2001_v53 = vpop.xlane.xlu0 %2000 }
 0x538   : > { %4853 = vrcp.f32 %v2001_v53 }
 0x539   : > { %4855 = vrcp.f32 %v6352_v27 }
 0x53a   : > { %4857 = vrcp.f32 %v6343_v41 }
 0x53b   : > { %v1997_v58 = vpop.xlane.xlu0 %1996 }
 0x53c   : > { %4859 = vrcp.f32 %v1997_v58 }
 0x53e   : > { %2683 = vrot.lane.b32.xlu0 %v5902_v60, %s5180_s20 }
 0x53f   : > { %v2954_v25 = vpop.permute.xlu0 %2953 }
 0x540   : > { %4496 = vmatmul.mubr.msk.bf16.vlgmr.msra.gmra.mxu1 %vm1113_vm0, %v2954_v25 }
 0x541   : > { %4499 = vmatprep.mubr.msk.bf16.mxu1 %vm1113_vm0, %v2956_v32 }
 0x542   : > { %2679 = vrot.lane.b32.xlu0 %v5929_v39, %s5180_s20 }
 0x543   : > { %v2958_v23 = vpop.permute.xlu0 %2957 }
 0x545   : > { %v4854_v26 = vpop.eup %4853 }
 0x546   : > { %2677 = vrot.lane.b32.xlu0 %v5943_v48, %s5180_s20  ;;  %v2524_v41 = vpop.xlane.xlu1 %2523  ;;  %v4856_v27 = vpop.eup %4855  ;;  %v2033_v4 = vmul.f32 %v4854_v26, %v6241_v13 }
 0x547   : > { %v4858_v6 = vpop.eup %4857  ;;  %v2030_v40 = vmul.f32 %v4856_v27, %v6199_v57  ;;  %v2962_v38 = vpop.permute.xlu0 %2961 }
 0x548   : > { %4500 = vmatmul.mubr.msk.bf16.gmra.mxu1 %vm1113_vm0, %v2958_v23  ;;  %v2032_v12 = vmul.f32 %v4858_v6, %v6193_v56  ;;  %v2554_v23 = vsub.f32 %v6256_v21, %v2524_v41 }
 0x549   : > { %v4860_v14 = vpop.eup %4859  ;;  %4503 = vmatprep.mubr.msk.bf16.mxu1 %vm1113_vm0, %v2960_v11 }
 0x54a   : > { %v2526_v35 = vpop.xlane.xlu1 %2525  ;;  %v2031_v54 = vmul.f32 %v4860_v14, %v6246_v62  ;;  %v2041_v52 = vpack.c.bf16 %v2033_v4, %v2032_v12  ;;  %v2571_v14 = vmul.f32 1.442695, %v2554_v23 }
 0x54b   : > { %v2555_v36 = vsub.f32 %v6262_v2, %v2526_v35 }
 0x54c   : > { %v2040_v59 = vpack.c.bf16 %v2031_v54, %v2030_v40 }
 0x54d   : > { %v2573_v0 = vmul.f32 1.442695, %v2555_v36 }
 0x54e   : > { %4371 = vmatprep.mubr.bf16.mxu0 %v2040_v59  ;;  %v2528_v55 = vpop.xlane.xlu1 %2527 }
 0x54f   : > { %4372 = vmatmul.mubr.bf16.gmra.mxu0 %v2041_v52  ;;  %4861 = vpow2.f32 %v2573_v0  ;;  %v2556_v11 = vsub.f32 %v6270_v46, %v2528_v55 }
 0x550   : > { %4504 = vmatmul.mubr.msk.bf16.gmra.mxu1 %vm1113_vm0, %v2962_v38 }
 0x551   : > { %4507 = vmatprep.mubr.msk.bf16.mxu1 %vm1113_vm0, %v2964_v15  ;;  %v2575_v6 = vmul.f32 1.442695, %v2556_v11 }
 0x552   : > { %v6424_v13 = vpop.xlane.xlu1 %2529 }
 0x556   : > { %v2532_v57 = vpop.xlane.xlu1 %2531 }
 0x557   : > { %v2558_v4 = vsub.f32 %v6284_v33, %v2532_v57 }
 0x559   : > { %v2579_v46 = vmul.f32 1.442695, %v2558_v4 }
 0x55a   : > { %v6426_v62 = vpop.xlane.xlu1 %2535 }
 0x55b   : > { %v6447_v35 = vpop.f32.mrf.mxu0 }
 0x55c   : > { %v6430_v17 = vpop.eup %4861 }
 0x55d   : > { %v6450_v40 = vpop.f32.mrf.mxu0 }
 0x55e   : > { %v6428_v56 = vpop.xlane.xlu1 %2537 }
 0x55f   : > { %v6455_v12 = vpop.f32.mrf.mxu0 }
 0x561   : > { %v6461_v55 = vpop.f32.mrf.mxu0 }
 0x562   : > { %v2540_v31 = vpop.xlane.xlu1 %2539 }
 0x565   : > { %2605 = vadd.xlane.f32.xlu0 %v6430_v17 }
 0x566   : > { %v6433_v2 = vpop.xlane.xlu1 %2541 }
 0x56a   : > { %v6435_v49 = vpop.xlane.xlu1 %2543 }
 0x56e   : > { %v6437_v7 = vpop.xlane.xlu1 %2545 }
 0x572   : > { %v2548_v32 = vpop.xlane.xlu1 %2547 }
 0x573   : > { %v2566_v33 = vsub.f32 %v6334_v37, %v2548_v32 }
 0x575   : > { %v2595_v38 = vmul.f32 1.442695, %v2566_v33 }
 0x576   : > { %v2550_v53 = vpop.xlane.xlu1 %2549 }
 0x577   : > { %v2567_v21 = vsub.f32 %v6340_v5, %v2550_v53 }
 0x578   : > { %v2522_v58 = vpop.xlane.xlu0 %2521 }
 0x579   : > { %v2553_v25 = vsub.f32 %v6349_v22, %v2522_v58  ;;  %v2562_v22 = vsub.f32 %v6306_v16, %v2540_v31  ;;  %v2597_v59 = vmul.f32 1.442695, %v2567_v21  ;;  %v6464_v16 = vpop.f32.mrf.mxu0 }
 0x57a   : > { %v6441_v15 = vpop.permute.xlu1 %2687 }
 0x57b   : > { %v2569_v26 = vmul.f32 1.442695, %v2553_v25  ;;  %4427 = vmatprep.subr.bf16.mxu0 %v6441_v15  ;;  %v2587_v54 = vmul.f32 1.442695, %v2562_v22  ;;  %v6469_v36 = vpop.f32.mrf.mxu0 }
 0x57c   : > { %v2966_v27 = vpop.permute.xlu0 %2965 }
 0x57d   : > { %4863 = vpow2.f32 %v2569_v26  ;;  %4508 = vmatmul.mubr.msk.bf16.gmra.mxu1 %vm1113_vm0, %v2966_v27  ;;  %v6474_v37 = vpop.f32.mrf.mxu0 }
 0x57e   : > { %4865 = vpow2.f32 %v2575_v6  ;;  %v2557_v6 = vsub.f32 %v6276_v51, %v6424_v13  ;;  %v2561_v51 = vsub.f32 %v6300_v44, %v6428_v56  ;;  %v2565_v44 = vsub.f32 %v6328_v18, %v6437_v7 }
 0x57f   : > { %4867 = vpow2.f32 %v2571_v14  ;;  %v6479_v31 = vpop.f32.mrf.mxu0 }
 0x580   : > { %4869 = vpow2.f32 %v2579_v46  ;;  %v2577_v22 = vmul.f32 1.442695, %v2557_v6 }
 0x581   : > { %4871 = vpow2.f32 %v2587_v54  ;;  %v6483_v53 = vpop.f32.mrf.mxu0  ;;  %v2560_v54 = vsub.f32 %v6292_v1, %v6426_v62  ;;  %v2585_v62 = vmul.f32 1.442695, %v2561_v51 }
 0x582   : > { %4873 = vpow2.f32 %v2597_v59  ;;  %v2563_v59 = vsub.f32 %v6312_v24, %v6433_v2 }
 0x583   : > { %4875 = vpow2.f32 %v2595_v38  ;;  %v6488_v11 = vpop.f32.mrf.mxu0  ;;  %v2583_v33 = vmul.f32 1.442695, %v2560_v54 }
 0x585   : > { %v6491_v25 = vpop.f32.mrf.mxu0 }
 0x587   : > { %v6493_v26 = vpop.f32.mrf.mxu0 }
 0x589   : > { %v6495_v27 = vpop.f32.mrf.mxu0 }
 0x58a   : > { %v6453_v41 = vpop.eup %4863  ;;  %7121 = vst [vmem:[#allocation44_spill] sm:$0xff] %v6495_v27 }
 0x58b   : > { %2601 = vadd.xlane.f32.xlu0 %v6453_v41  ;;  %v6459_v52 = vpop.eup %4865  ;;  %v6500_v4 = vpop.f32.mrf.mxu0 }
 0x58c   : > { %v6466_v5 = vpop.eup %4867  ;;  %7122 = vst [vmem:[#allocation43_spill] sm:$0xff] %v6500_v4 }
 0x58d   : > { %v6471_v0 = vpop.eup %4869  ;;  %v6504_v21 = vpop.f32.mrf.mxu0 }
 0x58e   : > { %v6476_v57 = vpop.eup %4871  ;;  %7123 = vst [vmem:[#allocation24_spill] sm:$0xff] %v6504_v21 }
 0x58f   : > { %2607 = vadd.xlane.f32.xlu0 %v6459_v52  ;;  %v6481_v32 = vpop.eup %4873  ;;  %v6508_v38 = vpop.f32.mrf.mxu0 }
 0x590   : > { %v6486_v58 = vpop.eup %4875  ;;  %7124 = vst [vmem:[#allocation20_spill] sm:$0xff] %v6508_v38 }
 0x593   : > { %2603 = vadd.xlane.f32.xlu0 %v6466_v5 }
 0x597   : > { %2611 = vadd.xlane.f32.xlu0 %v6471_v0 }
 0x59b   : > { %2619 = vadd.xlane.f32.xlu0 %v6476_v57 }
 0x59f   : > { %2629 = vadd.xlane.f32.xlu0 %v6481_v32 }
 0x5a3   : > { %2627 = vadd.xlane.f32.xlu0 %v6486_v58 }
 0x5ad   : > { %v2534_v23 = vpop.xlane.xlu0 %2533 }
 0x5ae   : > { %v2559_v14 = vsub.f32 %v6390_v29, %v2534_v23  ;;  %v2589_v29 = vmul.f32 1.442695, %v2563_v59  ;;  %v2564_v23 = vsub.f32 %v6320_v28, %v6435_v49  ;;  %v2686_v49 = vpop.permute.xlu1 %2685  ;;  %v2593_v59 = vmul.f32 1.442695, %v2565_v44 }
 0x5b0   : > { %v2581_v46 = vmul.f32 1.442695, %v2559_v14 }
 0x5b2   : > { %4877 = vpow2.f32 %v2581_v46  ;;  %v2591_v46 = vmul.f32 1.442695, %v2564_v23 }
 0x5b3   : > { %4879 = vpow2.f32 %v2577_v22 }
 0x5b4   : > { %4881 = vpow2.f32 %v2583_v33  ;;  %v2552_v33 = vpop.xlane.xlu0 %2551 }
 0x5b5   : > { %4883 = vpow2.f32 %v2589_v29  ;;  %v2568_v51 = vsub.f32 %v6399_v20, %v2552_v33 }
 0x5b6   : > { %4885 = vpow2.f32 %v2585_v62 }
 0x5b7   : > { %4887 = vpow2.f32 %v2591_v46  ;;  %v2599_v62 = vmul.f32 1.442695, %v2568_v51 }
 0x5b8   : > { %4889 = vpow2.f32 %v2593_v59 }
 0x5b9   : > { %2673 = vrot.lane.b32.xlu0 %v5965_v50, %s5180_s20  ;;  %4891 = vpow2.f32 %v2599_v62 }
 0x5ba   : > { %v4361_v13 = vpop.f32.mrf.mxu0 }
 0x5bc   : > { %v2108_v1 = vpop.f32.mrf.mxu0 }
 0x5be   : > { %v4362_v6 = vpop.f32.mrf.mxu0 }
 0x5bf   : > { %v6516_v14 = vpop.eup %4877  ;;  %v2172_v56 = vpack.c.bf16 %v4362_v6, %v4361_v13  ;;  %v2684_v13 = vpop.permute.xlu0 %2683 }
 0x5c0   : > { %2613 = vadd.xlane.f32.xlu1 %v6516_v14  ;;  %v2111_v24 = vpop.f32.mrf.mxu0  ;;  %v6521_v54 = vpop.eup %4879 }
 0x5c1   : > { %v2171_v2 = vpack.c.bf16 %v2111_v24, %v2108_v1  ;;  %v6528_v7 = vpop.eup %4881  ;;  %v2682_v24 = vpop.permute.xlu1 %2681 }
 0x5c2   : > { %v4365_v22 = vpop.f32.mrf.mxu0 }
 0x5c3   : > { %4379 = vmatprep.mubr.msk.bf16.mxu0 %vm1113_vm0, %v2171_v2  ;;  %v2680_v44 = vpop.permute.xlu0 %2679 }
 0x5c4   : > { %v2124_v28 = vpop.f32.mrf.mxu0  ;;  %4380 = vmatmul.mubr.msk.bf16.vlgmr.msra.gmra.mxu0 %vm1113_vm0, %v2172_v56  ;;  %2609 = vadd.xlane.f32.xlu1 %v6521_v54 }
 0x5c5   : > { %4428 = vmatpush3.bf16.msra.mxu0 %v6441_v15  ;;  %v6531_v15 = vpop.eup %4883  ;;  %v2676_v51 = vpop.permute.xlu1 %2675 }
 0x5c6   : > { %4429 = vmatprep.subr.bf16.mxu0 %v2686_v49  ;;  %v4366_v18 = vpop.f32.mrf.mxu0  ;;  %v6536_v46 = vpop.eup %4885 }
 0x5c7   : > { %v2174_v23 = vpack.c.bf16 %v4366_v18, %v4365_v22 }
 0x5c8   : > { %v2127_v29 = vpop.f32.mrf.mxu0  ;;  %2615 = vadd.xlane.f32.xlu1 %v6528_v7 }
 0x5c9   : > { %v2173_v1 = vpack.c.bf16 %v2127_v29, %v2124_v28  ;;  %4430 = vmatpush3.bf16.msra.mxu0 %v2686_v49  ;;  %v6539_v28 = vpop.eup %4887  ;;  %v2678_v49 = vpop.permute.xlu0 %2677 }
 0x5ca   : > { %4431 = vmatprep.subr.bf16.mxu0 %v2684_v13  ;;  %v4369_v6 = vpop.f32.mrf.mxu0  ;;  %v6544_v59 = vpop.eup %4889 }
 0x5cb   : > { %4383 = vmatprep.mubr.msk.bf16.mxu0 %vm1113_vm0, %v2173_v1  ;;  %v6547_v18 = vpop.eup %4891 }
 0x5cc   : > { %v2140_v20 = vpop.f32.mrf.mxu0  ;;  %4384 = vmatmul.mubr.msk.bf16.gmra.mxu0 %vm1113_vm0, %v2174_v23  ;;  %2621 = vadd.xlane.f32.xlu1 %v6531_v15 }
 0x5cd   : > { %4432 = vmatpush3.bf16.msra.mxu0 %v2684_v13 }
 0x5ce   : > { %4433 = vmatprep.subr.bf16.mxu0 %v2682_v24  ;;  %v4370_v2 = vpop.f32.mrf.mxu0 }
 0x5cf   : > { %v2176_v33 = vpack.c.bf16 %v4370_v2, %v4369_v6 }
 0x5d0   : > { %v2143_v56 = vpop.f32.mrf.mxu0  ;;  %2617 = vadd.xlane.f32.xlu1 %v6536_v46 }
 0x5d1   : > { %v2175_v22 = vpack.c.bf16 %v2143_v56, %v2140_v20  ;;  %4434 = vmatpush3.bf16.msra.mxu0 %v2682_v24 }
 0x5d2   : > { %4435 = vmatprep.subr.bf16.mxu0 %v2680_v44 }
 0x5d3   : > { %4387 = vmatprep.mubr.msk.bf16.mxu0 %vm1113_vm0, %v2175_v22 }
 0x5d4   : > { %4388 = vmatmul.mubr.msk.bf16.gmra.mxu0 %vm1113_vm0, %v2176_v33  ;;  %2623 = vadd.xlane.f32.xlu1 %v6539_v28 }
 0x5d5   : > { %4436 = vmatpush3.bf16.msra.mxu0 %v2680_v44 }
 0x5d6   : > { %4437 = vmatprep.subr.bf16.mxu0 %v2678_v49 }
 0x5d8   : > { %2625 = vadd.xlane.f32.xlu1 %v6544_v59 }
 0x5d9   : > { %4438 = vmatpush3.bf16.msra.mxu0 %v2678_v49 }
 0x5da   : > { %4439 = vmatprep.subr.bf16.mxu0 %v2676_v51 }
 0x5dc   : > { %2631 = vadd.xlane.f32.xlu1 %v6547_v18 }
 0x5dd   : > { %4440 = vmatpush3.bf16.msra.mxu0 %v2676_v51 }
 0x5ee   : > { %v2606_v33 = vpop.xlane.xlu0 %2605 }
 0x600   : > { %v4497_v29 = vpop.f32.mrf.mxu1 }
 0x601   : > { %v6565_v2 = vsel %vm472_vm1, %v4497_v29, -1e+09  ;;  %vm7125_vm1 = vmmov %vm7119_vm5 }
 0x602   : > { %v3065_v13 = vpop.f32.mrf.mxu1 }
 0x603   : > { %v6553_v1 = vsel %vm470_vm2, %v3065_v13, -1e+09 }
 0x604   : > { %v4498_v62 = vpop.f32.mrf.mxu1  ;;  %3144 = vmax.xlane.f32.xlu1 %v6553_v1 }
 0x605   : > { %v6571_v56 = vsel %vm473_vm4, %v4498_v62, -1e+09 }
 0x606   : > { %v3068_v23 = vpop.f32.mrf.mxu1 }
 0x607   : > { %v6559_v6 = vsel %vm471_vm3, %v3068_v23, -1e+09 }
 0x608   : > { %v4501_v20 = vpop.f32.mrf.mxu1  ;;  %3146 = vmax.xlane.f32.xlu1 %v6559_v6 }
 0x609   : > { %v6589_v62 = vsel %vm7125_vm1, %v4501_v20, -1e+09 }
 0x60a   : > { %v3081_v24 = vpop.f32.mrf.mxu1 }
 0x60b   : > { %v6583_v49 = vsel %vm474_vm6, %v3081_v24, -1e+09 }
 0x60c   : > { %v4502_v63 = vpop.f32.mrf.mxu1  ;;  %3148 = vmax.xlane.f32.xlu1 %v6565_v2 }
 0x60d   : > { %v6597_v24 = vsel %vm477_vm8, %v4502_v63, -1e+09 }
 0x60e   : > { %v3084_v44 = vpop.f32.mrf.mxu1 }
 0x60f   : > { %v6576_v47 = vsel %vm475_vm9, %v3084_v44, -1e+09  ;;  %v4373_v22 = vpop.f32.mrf.mxu0 }
 0x610   : > { %3150 = vmax.xlane.f32.xlu1 %v6571_v56  ;;  %3154 = vmax.xlane.f32.xlu0 %v6576_v47  ;;  %v4505_v51 = vpop.f32.mrf.mxu1 }
 0x611   : > { %v2156_v43 = vpop.f32.mrf.mxu0  ;;  %v6615_v61 = vsel %vm480_vm10, %v4505_v51, -1e+09 }
 0x612   : > { %v3097_v44 = vpop.f32.mrf.mxu1 }
 0x613   : > { %v4374_v10 = vpop.f32.mrf.mxu0  ;;  %v6603_v20 = vsel %vm478_vm7, %v3097_v44, -1e+09 }
 0x614   : > { %v2602_v29 = vpop.xlane.xlu0 %2601  ;;  %3152 = vmax.xlane.f32.xlu1 %v6583_v49  ;;  %v2178_v23 = vpack.c.bf16 %v4374_v10, %v4373_v22 }
 0x615   : > { %v2159_v3 = vpop.f32.mrf.mxu0  ;;  %4893 = vrcp.f32 %v2602_v29 }
 0x616   : > { %v2177_v13 = vpack.c.bf16 %v2159_v3, %v2156_v43  ;;  %v4506_v43 = vpop.f32.mrf.mxu1 }
 0x617   : > { %v6623_v9 = vsel %vm481_vm11, %v4506_v43, -1e+09 }
 0x618   : > { %4391 = vmatprep.mubr.msk.bf16.mxu0 %vm1113_vm0, %v2177_v13  ;;  %v2608_v50 = vpop.xlane.xlu0 %2607  ;;  %3156 = vmax.xlane.f32.xlu1 %v6589_v62  ;;  %v3100_v22 = vpop.f32.mrf.mxu1 }
 0x619   : > { %4392 = vmatmul.mubr.msk.bf16.gmra.mxu0 %vm1113_vm0, %v2178_v23  ;;  %v6609_v63 = vsel %vm479_vm12, %v3100_v22, -1e+09 }
 0x61c   : > { %v2604_v3 = vpop.xlane.xlu0 %2603  ;;  %3158 = vmax.xlane.f32.xlu1 %v6597_v24 }
 0x61d   : > { %4895 = vrcp.f32 %v2604_v3 }
 0x61e   : > { %4897 = vrcp.f32 %v2608_v50 }
 0x61f   : > { %4899 = vrcp.f32 %v2606_v33 }
 0x620   : > { %v2612_v10 = vpop.xlane.xlu0 %2611  ;;  %3160 = vmax.xlane.f32.xlu1 %v6603_v20 }
 0x621   : > { %4901 = vrcp.f32 %v2612_v10 }
 0x622   : > { %v4894_v44 = vpop.eup %4893 }
 0x623   : > { %v2649_v22 = vmul.f32 %v4894_v44, %v6453_v41  ;;  %v7131_v41 = vld [vmem:[#allocation39_spill] sm:$0xff] }
 0x624   : > { %v2620_v29 = vpop.xlane.xlu0 %2619  ;;  %3162 = vmax.xlane.f32.xlu1 %v6609_v63  ;;  %vm7132_vm2 = vcmp.ge.s32.totalorder %v7131_v41, %v5659_v45 }
 0x628   : > { %3164 = vmax.xlane.f32.xlu1 %v6615_v61  ;;  %v6618_v50 = vpop.xlane.xlu0 %2629 }
 0x62a   : > { %v4896_v3 = vpop.eup %4895 }
 0x62b   : > { %v2650_v13 = vmul.f32 %v4896_v3, %v6466_v5  ;;  %v4898_v42 = vpop.eup %4897 }
 0x62c   : > { %3166 = vmax.xlane.f32.xlu1 %v6623_v9  ;;  %v2628_v51 = vpop.xlane.xlu0 %2627  ;;  %v4900_v38 = vpop.eup %4899  ;;  %v2652_v21 = vmul.f32 %v4898_v42, %v6459_v52 }
 0x62d   : > { %v2665_v23 = vpack.c.bf16 %v2650_v13, %v2649_v22  ;;  %v2651_v27 = vmul.f32 %v4900_v38, %v6430_v17  ;;  %v4730_v13 = vld [vmem:[#allocation8 + $0xe0] sm:$0xff]  }
 0x62e   : > { %v4902_v45 = vpop.eup %4901 }
 0x62f   : > { %4443 = vmatprep.mubr.bf16.mxu0 %v2665_v23  ;;  %v2666_v43 = vpack.c.bf16 %v2652_v21, %v2651_v27  ;;  %v4729_v21 = vld [vmem:[#allocation8 + $0xe8] sm:$0xff]  }
 0x630   : > { %v2674_v4 = vpop.permute.xlu0 %2673 }
 0x631   : > { %4441 = vmatprep.subr.bf16.mxu0 %v2674_v4 }
 0x632   : > { %4442 = vmatpush3.bf16.msra.mxu0 %v2674_v4 }
 0x633   : > { %4459 = vmatprep.subr.bf16.mxu0 %v4729_v21 }
 0x635   : > { %4444 = vmatmul.mubr.bf16.vlgmr.msra.gmra.mxu0 %v2666_v43 }
 0x636   : > { %4460 = vmatpush3.bf16.msra.mxu0 %v4729_v21 }
 0x637   : > { %4461 = vmatprep.subr.bf16.mxu0 %v4730_v13 }
 0x63a   : > { %4462 = vmatpush3.bf16.msra.mxu0 %v4730_v13 }
 0x63d   : > { %v4509_v33 = vpop.f32.mrf.mxu1 }
 0x63e   : > { %v6633_v5 = vsel %vm7132_vm2, %v4509_v33, -1e+09 }
 0x63f   : > { %v3113_v44 = vpop.f32.mrf.mxu1  ;;  %3172 = vmax.xlane.f32.xlu0 %v6633_v5 }
 0x640   : > { %v6639_v42 = vsel %vm482_vm14, %v3113_v44, -1e+09  ;;  %v2654_v44 = vmul.f32 %v4902_v45, %v6471_v0 }
 0x641   : > { %v4510_v52 = vpop.f32.mrf.mxu1  ;;  %3168 = vmax.xlane.f32.xlu1 %v6639_v42 }
 0x642   : > { %v6651_v38 = vsel %vm485_vm15, %v4510_v52, -1e+09 }
 0x643   : > { %v3116_v17 = vpop.f32.mrf.mxu1 }
 0x644   : > { %v6645_v4 = vsel %vm483_vm13, %v3116_v17, -1e+09 }
 0x645   : > { %3170 = vmax.xlane.f32.xlu1 %v6645_v4 }
 0x649   : > { %3174 = vmax.xlane.f32.xlu1 %v6651_v38  ;;  %v2614_v22 = vpop.xlane.xlu1 %2613 }
 0x64d   : > { %v2610_v23 = vpop.xlane.xlu1 %2609 }
 0x64e   : > { %4903 = vrcp.f32 %v2610_v23 }
 0x64f   : > { %4905 = vrcp.f32 %v2614_v22 }
 0x651   : > { %v2616_v43 = vpop.xlane.xlu1 %2615 }
 0x652   : > { %4907 = vrcp.f32 %v2616_v43 }
 0x653   : > { %4909 = vrcp.f32 %v2620_v29 }
 0x655   : > { %3310 = vrot.lane.b32.xlu0 %v5889_v34, %s5181_s27  ;;  %v2622_v33 = vpop.xlane.xlu1 %2621 }
 0x659   : > { %3306 = vrot.lane.b32.xlu0 %v5902_v60, %s5181_s27  ;;  %v2618_v19 = vpop.xlane.xlu1 %2617 }
 0x65a   : > { %4911 = vrcp.f32 %v2618_v19  ;;  %3308 = vrot.lane.b32.xlu1 %v5894_v8, %s5181_s27 }
 0x65b   : > { %v4904_v10 = vpop.eup %4903  ;;  %4913 = vrcp.f32 %v2622_v33 }
 0x65c   : > { %v2653_v41 = vmul.f32 %v4904_v10, %v6521_v54  ;;  %v4906_v3 = vpop.eup %4905 }
 0x65d   : > { %3304 = vrot.lane.b32.xlu0 %v5919_v30, %s5181_s27  ;;  %v2624_v34 = vpop.xlane.xlu1 %2623  ;;  %v2655_v8 = vmul.f32 %v4906_v3, %v6516_v14 }
 0x65e   : > { %4915 = vrcp.f32 %v2624_v34  ;;  %3302 = vrot.lane.b32.xlu1 %v5929_v39, %s5181_s27  ;;  %v2667_v60 = vpack.c.bf16 %v2654_v44, %v2653_v41 }
 0x65f   : > { %v4908_v29 = vpop.eup %4907  ;;  %4917 = vrcp.f32 %v2628_v51 }
 0x660   : > { %4447 = vmatprep.mubr.bf16.mxu0 %v2667_v60  ;;  %v2656_v52 = vmul.f32 %v4908_v29, %v6528_v7  ;;  %v4910_v30 = vpop.eup %4909 }
 0x661   : > { %v2626_v54 = vpop.xlane.xlu1 %2625  ;;  %v2658_v21 = vmul.f32 %v4910_v30, %v6476_v57 }
 0x662   : > { %4919 = vrcp.f32 %v2626_v54  ;;  %v2668_v0 = vpack.c.bf16 %v2656_v52, %v2655_v8 }
 0x663   : > { %4921 = vrcp.f32 %v6618_v50 }
 0x664   : > { %4448 = vmatmul.mubr.bf16.gmra.mxu0 %v2668_v0 }
 0x665   : > { %v2632_v17 = vpop.xlane.xlu1 %2631 }
 0x666   : > { %4923 = vrcp.f32 %v2632_v17 }
 0x667   : > { %v4912_v27 = vpop.eup %4911 }
 0x668   : > { %v2657_v39 = vmul.f32 %v4912_v27, %v6536_v46  ;;  %v4914_v51 = vpop.eup %4913 }
 0x669   : > { %v2659_v14 = vmul.f32 %v4914_v51, %v6531_v15  ;;  %v6680_v15 = vld [vmem:[%s6985_s4 + $0x3] ss:$0 sm:$0xff] }
 0x66a   : > { %v2669_v22 = vpack.c.bf16 %v2658_v21, %v2657_v39  ;;  %v1666_v29 = vadd.f32 %v6680_v15, %v6461_v55  ;;  %v1669_v0 = vadd.f32 %v6680_v15, %v6469_v36  ;;  %v1672_v27 = vadd.f32 %v6474_v37, %v6680_v15 }
 0x66b   : > { %v4916_v13 = vpop.eup %4915  ;;  %v1670_v21 = vadd.f32 %v6680_v15, %v6479_v31  ;;  %v1675_v36 = vadd.f32 %v6483_v53, %v6680_v15 }
 0x66c   : > { %4451 = vmatprep.mubr.bf16.mxu0 %v2669_v22  ;;  %v2660_v7 = vmul.f32 %v4916_v13, %v6539_v28  ;;  %v4918_v23 = vpop.eup %4917  ;;  %v1667_v28 = vadd.f32 %v6447_v35, %v6680_v15  ;;  %v1671_v35 = vadd.f32 %v6464_v16, %v6680_v15 }
 0x66d   : > { %v2662_v45 = vmul.f32 %v4918_v23, %v6486_v58  ;;  %v1665_v58 = vadd.f32 %v6680_v15, %v6450_v40 }
 0x66e   : > { %v2670_v43 = vpack.c.bf16 %v2660_v7, %v2659_v14  ;;  %v1673_v7 = vadd.f32 %v6680_v15, %v6488_v11 }
 0x66f   : > { %v4920_v50 = vpop.eup %4919 }
 0x670   : > { %4452 = vmatmul.mubr.bf16.gmra.mxu0 %v2670_v43  ;;  %v2661_v33 = vmul.f32 %v4920_v50, %v6544_v59  ;;  %v4922_v19 = vpop.eup %4921 }
 0x671   : > { %v2663_v57 = vmul.f32 %v4922_v19, %v6481_v32  ;;  %v1668_v32 = vadd.f32 %v6455_v12, %v6680_v15 }
 0x672   : > { %v2671_v46 = vpack.c.bf16 %v2662_v45, %v2661_v33  ;;  %v1676_v33 = vadd.f32 %v6491_v25, %v6680_v15 }
 0x673   : > { %v4924_v10 = vpop.eup %4923 }
 0x674   : > { %4455 = vmatprep.mubr.bf16.mxu0 %v2671_v46  ;;  %v2664_v41 = vmul.f32 %v4924_v10, %v6547_v18  ;;  %v1674_v46 = vadd.f32 %v6680_v15, %v6493_v26 }
 0x676   : > { %v2672_v44 = vpack.c.bf16 %v2664_v41, %v2663_v57 }
 0x678   : > { %4456 = vmatmul.mubr.bf16.gmra.mxu0 %v2672_v44 }
 0x684   : > { %v4381_v59 = vpop.f32.mrf.mxu0 }
 0x685   : > { %v6686_v3 = vadd.f32 %v4381_v59, %v1667_v28 }
 0x686   : > { %v2249_v34 = vpop.f32.mrf.mxu0 }
 0x687   : > { %v6690_v18 = vadd.f32 %v2249_v34, %v1665_v58 }
 0x688   : > { %v4382_v60 = vpop.f32.mrf.mxu0 }
 0x689   : > { %v6694_v8 = vadd.f32 %v4382_v60, %v1668_v32 }
 0x68a   : > { %v2252_v52 = vpop.f32.mrf.mxu0 }
 0x68b   : > { %v6698_v54 = vadd.f32 %v2252_v52, %v1666_v29 }
 0x68c   : > { %v4385_v40 = vpop.f32.mrf.mxu0 }
 0x68d   : > { %v6702_v30 = vadd.f32 %v4385_v40, %v1671_v35  ;;  %v3145_v12 = vpop.xlane.xlu1 %3144 }
 0x68e   : > { %v2265_v17 = vpop.f32.mrf.mxu0  ;;  %v3176_v43 = vsub.f32 %v6553_v1, %v3145_v12 }
 0x68f   : > { %v6706_v55 = vadd.f32 %v2265_v17, %v1669_v0 }
 0x690   : > { %v4386_v39 = vpop.f32.mrf.mxu0  ;;  %v3192_v57 = vmul.f32 1.442695, %v3176_v43 }
 0x691   : > { %v6710_v16 = vadd.f32 %v4386_v39, %v1672_v27  ;;  %v3147_v51 = vpop.xlane.xlu1 %3146 }
 0x692   : > { %v2268_v22 = vpop.f32.mrf.mxu0  ;;  %v3177_v44 = vsub.f32 %v6559_v6, %v3147_v51 }
 0x693   : > { %v6714_v13 = vadd.f32 %v2268_v22, %v1670_v21 }
 0x694   : > { %v4389_v14 = vpop.f32.mrf.mxu0  ;;  %v3194_v58 = vmul.f32 1.442695, %v3177_v44  ;;  %v7135_v44 = vld [vmem:[#allocation44_spill] sm:$0xff] }
 0x695   : > { %v6718_v37 = vadd.f32 %v4389_v14, %v1675_v36  ;;  %v3149_v23 = vpop.xlane.xlu1 %3148 }
 0x696   : > { %v3178_v31 = vsub.f32 %v6565_v2, %v3149_v23  ;;  %v2281_v50 = vpop.f32.mrf.mxu0 }
 0x697   : > { %v6724_v45 = vadd.f32 %v2281_v50, %v1673_v7 }
 0x698   : > { %v3196_v53 = vmul.f32 1.442695, %v3178_v31  ;;  %v4390_v19 = vpop.f32.mrf.mxu0 }
 0x699   : > { %v6728_v10 = vadd.f32 %v4390_v19, %v1676_v33  ;;  %v3151_v11 = vpop.xlane.xlu1 %3150  ;;  %v3155_v28 = vpop.xlane.xlu0 %3154 }
 0x69a   : > { %4925 = vpow2.f32 %v3196_v53  ;;  %v3179_v1 = vsub.f32 %v6571_v56, %v3151_v11  ;;  %v2284_v41 = vpop.f32.mrf.mxu0  ;;  %v3181_v34 = vsub.f32 %v6576_v47, %v3155_v28 }
 0x69b   : > { %v6731_v2 = vadd.f32 %v2284_v41, %v1674_v46  ;;  %4927 = vpow2.f32 %v3192_v57 }
 0x69c   : > { %v3198_v59 = vmul.f32 1.442695, %v3179_v1  ;;  %v3202_v56 = vmul.f32 1.442695, %v3181_v34 }
 0x69d   : > { %v3153_v25 = vpop.xlane.xlu1 %3152 }
 0x69e   : > { %4929 = vpow2.f32 %v3198_v59  ;;  %v3180_v32 = vsub.f32 %v6583_v49, %v3153_v25  ;;  %v1679_v25 = vadd.f32 %v7135_v44, %v6680_v15  ;;  %v7136_v59 = vld [vmem:[#allocation43_spill] sm:$0xff] }
 0x69f   : > { %4931 = vpow2.f32 %v3194_v58  ;;  %v1677_v58 = vadd.f32 %v6680_v15, %v7136_v59 }
 0x6a0   : > { %v3200_v35 = vmul.f32 1.442695, %v3180_v32  ;;  %v7137_v32 = vld [vmem:[#allocation24_spill] sm:$0xff] }
 0x6a1   : > { %v3157_v26 = vpop.xlane.xlu1 %3156 }
 0x6a2   : > { %v3182_v60 = vsub.f32 %v6589_v62, %v3157_v26 }
 0x6a4   : > { %v3204_v29 = vmul.f32 1.442695, %v3182_v60  ;;  %v1680_v60 = vadd.f32 %v7137_v32, %v6680_v15 }
 0x6a5   : > { %v3159_v52 = vpop.xlane.xlu1 %3158 }
 0x6a6   : > { %4933 = vpow2.f32 %v3204_v29  ;;  %v3183_v6 = vsub.f32 %v6597_v24, %v3159_v52  ;;  %v7138_v52 = vld [vmem:[#allocation20_spill] sm:$0xff] }
 0x6a7   : > { %v6738_v40 = vpop.eup %4925  ;;  %4935 = vpow2.f32 %v3202_v56 }
 0x6a8   : > { %3228 = vadd.xlane.f32.xlu1 %v6738_v40  ;;  %4937 = vpow2.f32 %v3200_v35  ;;  %v3206_v0 = vmul.f32 1.442695, %v3183_v6  ;;  %v6742_v12 = vpop.eup %4927  ;;  %v1678_v35 = vadd.f32 %v6680_v15, %v7138_v52 }
 0x6a9   : > { %v3161_v47 = vpop.xlane.xlu1 %3160 }
 0x6aa   : > { %v3184_v49 = vsub.f32 %v6603_v20, %v3161_v47  ;;  %4939 = vpow2.f32 %v3206_v0  ;;  %v7139_v47 = vld [vmem:[#allocation45_spill] sm:$0xff] }
 0x6ab   : > { %v6746_v24 = vpop.eup %4929 }
 0x6ac   : > { %3224 = vadd.xlane.f32.xlu1 %v6742_v12  ;;  %v3208_v62 = vmul.f32 1.442695, %v3184_v49  ;;  %v6749_v51 = vpop.eup %4931 }
 0x6ad   : > { %v3163_v17 = vpop.xlane.xlu1 %3162 }
 0x6ae   : > { %v3185_v27 = vsub.f32 %v6609_v63, %v3163_v17  ;;  %4941 = vpow2.f32 %v3208_v62 }
 0x6b0   : > { %v3210_v39 = vmul.f32 1.442695, %v3185_v27  ;;  %3230 = vadd.xlane.f32.xlu1 %v6746_v24 }
 0x6b1   : > { %v3165_v21 = vpop.xlane.xlu1 %3164 }
 0x6b2   : > { %4943 = vpow2.f32 %v3210_v39  ;;  %v3186_v20 = vsub.f32 %v6615_v61, %v3165_v21 }
 0x6b3   : > { %v6752_v22 = vpop.eup %4933 }
 0x6b4   : > { %v3212_v36 = vmul.f32 1.442695, %v3186_v20  ;;  %3226 = vadd.xlane.f32.xlu1 %v6749_v51  ;;  %3236 = vadd.xlane.f32.xlu0 %v6752_v22  ;;  %v6756_v14 = vpop.eup %4935 }
 0x6b5   : > { %v3167_v63 = vpop.xlane.xlu1 %3166  ;;  %v6759_v23 = vpop.eup %4937 }
 0x6b6   : > { %4945 = vpow2.f32 %v3212_v36  ;;  %v3187_v7 = vsub.f32 %v6623_v9, %v3167_v63 }
 0x6b7   : > { %v6763_v61 = vpop.eup %4939 }
 0x6b8   : > { %v3214_v43 = vmul.f32 1.442695, %v3187_v7  ;;  %3234 = vadd.xlane.f32.xlu1 %v6756_v14  ;;  %3232 = vadd.xlane.f32.xlu0 %v6759_v23 }
 0x6ba   : > { %4947 = vpow2.f32 %v3214_v43 }
 0x6bb   : > { %v6766_v31 = vpop.eup %4941 }
 0x6bc   : > { %3238 = vadd.xlane.f32.xlu0 %v6763_v61 }
 0x6bf   : > { %v6768_v50 = vpop.eup %4943 }
 0x6c0   : > { %3240 = vadd.xlane.f32.xlu0 %v6766_v31  ;;  %3242 = vadd.xlane.f32.xlu1 %v6768_v50 }
 0x6c3   : > { %v6772_v9 = vpop.eup %4945 }
 0x6c4   : > { %3244 = vadd.xlane.f32.xlu0 %v6772_v9 }
 0x6c7   : > { %v6775_v33 = vpop.eup %4947 }
 0x6c8   : > { %v3173_v53 = vpop.xlane.xlu0 %3172  ;;  %3246 = vadd.xlane.f32.xlu0 %v6775_v33 }
 0x6c9   : > { %v3190_v27 = vsub.f32 %v6633_v5, %v3173_v53 }
 0x6ca   : > { %v3169_v19 = vpop.xlane.xlu1 %3168 }
 0x6cb   : > { %v3188_v0 = vsub.f32 %v6639_v42, %v3169_v19  ;;  %v3220_v21 = vmul.f32 1.442695, %v3190_v27 }
 0x6cc   : > { %v3311_v46 = vpop.permute.xlu0 %3310 }
 0x6cd   : > { %4511 = vmatprep.subr.bf16.mxu0 %v3311_v46  ;;  %4563 = vmatprep.subr.bf16.mxu1 %v3311_v46  ;;  %v3216_v39 = vmul.f32 1.442695, %v3188_v0 }
 0x6ce   : > { %4571 = vmatpush3.bf16.msra.mxu1 %v3311_v46  ;;  %v3171_v11 = vpop.xlane.xlu1 %3170 }
 0x6cf   : > { %4949 = vpow2.f32 %v3216_v39  ;;  %v3189_v15 = vsub.f32 %v6645_v4, %v3171_v11 }
 0x6d0   : > { %v3307_v1 = vpop.permute.xlu0 %3306  ;;  %4951 = vpow2.f32 %v3220_v21 }
 0x6d1   : > { %3300 = vrot.lane.b32.xlu1 %v5943_v48, %s5181_s27  ;;  %v3218_v20 = vmul.f32 1.442695, %v3189_v15 }
 0x6d2   : > { %v3175_v57 = vpop.xlane.xlu1 %3174 }
 0x6d3   : > { %v3191_v36 = vsub.f32 %v6651_v38, %v3175_v57  ;;  %4953 = vpow2.f32 %v3218_v20  ;;  %v7140_v57 = vld [vmem:[#allocation46_spill] sm:$0xff] }
 0x6d4   : > { %v3305_v48 = vpop.permute.xlu0 %3304 }
 0x6d5   : > { %v3222_v42 = vmul.f32 1.442695, %v3191_v36 }
 0x6d6   : > { %v3309_v41 = vpop.permute.xlu1 %3308 }
 0x6d7   : > { %4564 = vmatprep.subr.bf16.mxu1 %v3309_v41  ;;  %4955 = vpow2.f32 %v3222_v42 }
 0x6d8   : > { %4572 = vmatpush3.bf16.msra.mxu1 %v3309_v41 }
 0x6d9   : > { %v4393_v28 = vpop.f32.mrf.mxu0  ;;  %4565 = vmatprep.subr.bf16.mxu1 %v3307_v1 }
 0x6da   : > { %v6784_v34 = vadd.f32 %v4393_v28, %v1679_v25  ;;  %v3303_v62 = vpop.permute.xlu1 %3302 }
 0x6db   : > { %v2297_v26 = vpop.f32.mrf.mxu0 }
 0x6dc   : > { %v6788_v29 = vadd.f32 %v2297_v26, %v1677_v58  ;;  %4573 = vmatpush3.bf16.msra.mxu1 %v3307_v1  ;;  %v6802_v63 = vpop.eup %4949 }
 0x6dd   : > { %v4394_v56 = vpop.f32.mrf.mxu0  ;;  %4566 = vmatprep.subr.bf16.mxu1 %v3305_v48  ;;  %v6805_v5 = vpop.eup %4951 }
 0x6de   : > { %v6792_v6 = vadd.f32 %v4394_v56, %v1680_v60  ;;  %3298 = vrot.lane.b32.xlu0 %v7139_v47, %s5181_s27 }
 0x6df   : > { %v2300_v49 = vpop.f32.mrf.mxu0 }
 0x6e0   : > { %v6797_v17 = vadd.f32 %v2300_v49, %v1678_v35  ;;  %4574 = vmatpush3.bf16.msra.mxu1 %v3305_v48  ;;  %v6808_v4 = vpop.eup %4953 }
 0x6e1   : > { %4567 = vmatprep.subr.bf16.mxu1 %v3303_v62 }
 0x6e4   : > { %4575 = vmatpush3.bf16.msra.mxu1 %v3303_v62  ;;  %v6813_v38 = vpop.eup %4955 }
 0x6f5   : > { %v4445_v7 = vpop.f32.mrf.mxu0  ;;  %3248 = vadd.xlane.f32.xlu1 %v6802_v63 }
 0x6f7   : > { %v2731_v43 = vpop.f32.mrf.mxu0 }
 0x6f9   : > { %v4446_v53 = vpop.f32.mrf.mxu0  ;;  %3252 = vadd.xlane.f32.xlu1 %v6805_v5 }
 0x6fa   : > { %v2795_v44 = vpack.c.bf16 %v4446_v53, %v4445_v7 }
 0x6fb   : > { %v2734_v19 = vpop.f32.mrf.mxu0 }
 0x6fc   : > { %v2794_v11 = vpack.c.bf16 %v2734_v19, %v2731_v43 }
 0x6fd   : > { %3250 = vadd.xlane.f32.xlu0 %v6808_v4 }
 0x6fe   : > { %4463 = vmatprep.mubr.msk.bf16.mxu0 %vm1113_vm0, %v2794_v11 }
 0x6ff   : > { %4464 = vmatmul.mubr.msk.bf16.vlgmr.msra.gmra.mxu0 %vm1113_vm0, %v2795_v44 }
 0x700   : > { %4512 = vmatpush3.bf16.msra.mxu0 %v3311_v46 }
 0x701   : > { %4513 = vmatprep.subr.bf16.mxu0 %v3309_v41  ;;  %3254 = vadd.xlane.f32.xlu0 %v6813_v38 }
 0x704   : > { %4514 = vmatpush3.bf16.msra.mxu0 %v3309_v41 }
 0x705   : > { %4515 = vmatprep.subr.bf16.mxu0 %v3307_v1 }
 0x708   : > { %4516 = vmatpush3.bf16.msra.mxu0 %v3307_v1 }
 0x709   : > { %4517 = vmatprep.subr.bf16.mxu0 %v3305_v48 }
 0x70a   : > { %3296 = vrot.lane.b32.xlu1 %v7140_v57, %s5181_s27 }
 0x70c   : > { %4518 = vmatpush3.bf16.msra.mxu0 %v3305_v48 }
 0x70d   : > { %4519 = vmatprep.subr.bf16.mxu0 %v3303_v62 }
 0x710   : > { %4520 = vmatpush3.bf16.msra.mxu0 %v3303_v62 }
 0x724   : > { %v4449_v25 = vpop.f32.mrf.mxu0 }
 0x726   : > { %v2747_v28 = vpop.f32.mrf.mxu0 }
 0x728   : > { %v4450_v59 = vpop.f32.mrf.mxu0 }
 0x729   : > { %v2797_v32 = vpack.c.bf16 %v4450_v59, %v4449_v25 }
 0x72a   : > { %v2750_v58 = vpop.f32.mrf.mxu0 }
 0x72b   : > { %v2796_v26 = vpack.c.bf16 %v2750_v58, %v2747_v28 }
 0x72d   : > { %4467 = vmatprep.mubr.msk.bf16.mxu0 %vm1113_vm0, %v2796_v26 }
 0x72e   : > { %4468 = vmatmul.mubr.msk.bf16.gmra.mxu0 %vm1113_vm0, %v2797_v32 }
 0x730   : > { %v4453_v46 = vpop.f32.mrf.mxu0 }
 0x731   : > { %v3229_v41 = vpop.xlane.xlu1 %3228 }
 0x732   : > { %v2763_v1 = vpop.f32.mrf.mxu0 }
 0x734   : > { %v4454_v60 = vpop.f32.mrf.mxu0 }
 0x735   : > { %v3225_v56 = vpop.xlane.xlu1 %3224  ;;  %v2799_v48 = vpack.c.bf16 %v4454_v60, %v4453_v46 }
 0x736   : > { %v2766_v52 = vpop.f32.mrf.mxu0  ;;  %4957 = vrcp.f32 %v3225_v56 }
 0x737   : > { %v2798_v35 = vpack.c.bf16 %v2766_v52, %v2763_v1 }
 0x738   : > { %v4457_v47 = vpop.f32.mrf.mxu0 }
 0x739   : > { %4471 = vmatprep.mubr.msk.bf16.mxu0 %vm1113_vm0, %v2798_v35  ;;  %v3231_v0 = vpop.xlane.xlu1 %3230 }
 0x73a   : > { %v2779_v49 = vpop.f32.mrf.mxu0  ;;  %4472 = vmatmul.mubr.msk.bf16.gmra.mxu0 %vm1113_vm0, %v2799_v48 }
 0x73c   : > { %v4458_v62 = vpop.f32.mrf.mxu0 }
 0x73d   : > { %v3237_v27 = vpop.xlane.xlu0 %3236  ;;  %v3227_v39 = vpop.xlane.xlu1 %3226  ;;  %v2801_v20 = vpack.c.bf16 %v4458_v62, %v4457_v47 }
 0x73e   : > { %v2782_v21 = vpop.f32.mrf.mxu0  ;;  %4959 = vrcp.f32 %v3227_v39 }
 0x73f   : > { %v2800_v15 = vpack.c.bf16 %v2782_v21, %v2779_v49 }
 0x741   : > { %4475 = vmatprep.mubr.msk.bf16.mxu0 %vm1113_vm0, %v2800_v15  ;;  %v3233_v36 = vpop.xlane.xlu0 %3232  ;;  %v3235_v42 = vpop.xlane.xlu1 %3234 }
 0x742   : > { %4476 = vmatmul.mubr.msk.bf16.gmra.mxu0 %vm1113_vm0, %v2801_v20 }
 0x743   : > { %v4958_v19 = vpop.eup %4957 }
 0x744   : > { %v3272_v25 = vmul.f32 %v4958_v19, %v6742_v12 }
 0x745   : > { %v3239_v7 = vpop.xlane.xlu0 %3238 }
 0x749   : > { %v3241_v43 = vpop.xlane.xlu0 %3240  ;;  %v3243_v53 = vpop.xlane.xlu1 %3242 }
 0x74a   : > { %4961 = vrcp.f32 %v3241_v43 }
 0x74b   : > { %4963 = vrcp.f32 %v3243_v53  ;;  %v4960_v11 = vpop.eup %4959 }
 0x74c   : > { %v3273_v28 = vmul.f32 %v4960_v11, %v6749_v51  ;;  %4965 = vrcp.f32 %v3229_v41 }
 0x74d   : > { %v3245_v44 = vpop.xlane.xlu0 %3244  ;;  %v3301_v57 = vpop.permute.xlu1 %3300  ;;  %4967 = vrcp.f32 %v3231_v0 }
 0x74e   : > { %4521 = vmatprep.subr.bf16.mxu0 %v3301_v57  ;;  %4568 = vmatprep.subr.bf16.mxu1 %v3301_v57  ;;  %v3288_v59 = vpack.c.bf16 %v3273_v28, %v3272_v25  ;;  %4969 = vrcp.f32 %v3233_v36  ;;  %v4731_v36 = vld [vmem:[#allocation8 + $0xf8] sm:$0xff]  }
 0x74f   : > { %4522 = vmatpush3.bf16.msra.mxu0 %v3301_v57  ;;  %4576 = vmatpush3.bf16.msra.mxu1 %v3301_v57 }
 0x750   : > { %4527 = vmatprep.mubr.bf16.mxu0 %v3288_v59 }
 0x751   : > { %v3247_v58 = vpop.xlane.xlu0 %3246 }
 0x752   : > { %4971 = vrcp.f32 %v3247_v58 }
 0x753   : > { %4973 = vrcp.f32 %v3235_v42 }
 0x754   : > { %4975 = vrcp.f32 %v3245_v44 }
 0x755   : > { %v3299_v26 = vpop.permute.xlu0 %3298  ;;  %4977 = vrcp.f32 %v3239_v7 }
 0x756   : > { %4523 = vmatprep.subr.bf16.mxu0 %v3299_v26  ;;  %4569 = vmatprep.subr.bf16.mxu1 %v3299_v26  ;;  %4979 = vrcp.f32 %v3237_v27 }
 0x757   : > { %v4962_v32 = vpop.eup %4961  ;;  %4524 = vmatpush3.bf16.msra.mxu0 %v3299_v26  ;;  %4577 = vmatpush3.bf16.msra.mxu1 %v3299_v26 }
 0x758   : > { %v4964_v46 = vpop.eup %4963  ;;  %v3280_v1 = vmul.f32 %v4962_v32, %v6766_v31 }
 0x759   : > { %v3281_v12 = vmul.f32 %v4964_v46, %v6768_v50  ;;  %v4966_v56 = vpop.eup %4965 }
 0x75a   : > { %v4968_v52 = vpop.eup %4967  ;;  %v3274_v15 = vmul.f32 %v4966_v56, %v6738_v40 }
 0x75b   : > { %v3292_v60 = vpack.c.bf16 %v3281_v12, %v3280_v1  ;;  %v4970_v35 = vpop.eup %4969  ;;  %v3275_v50 = vmul.f32 %v4968_v52, %v6746_v24 }
 0x75c   : > { %v3276_v39 = vmul.f32 %v4970_v35, %v6759_v23 }
 0x75d   : > { %4535 = vmatprep.mubr.bf16.mxu1 %v3292_v60  ;;  %v3289_v20 = vpack.c.bf16 %v3275_v50, %v3274_v15 }
 0x75f   : > { %v4972_v48 = vpop.eup %4971 }
 0x760   : > { %v4974_v49 = vpop.eup %4973  ;;  %v3283_v41 = vmul.f32 %v4972_v48, %v6775_v33 }
 0x761   : > { %v4976_v31 = vpop.eup %4975  ;;  %v3277_v21 = vmul.f32 %v4974_v49, %v6756_v14 }
 0x762   : > { %v3282_v27 = vmul.f32 %v4976_v31, %v6772_v9  ;;  %v4978_v33 = vpop.eup %4977 }
 0x763   : > { %v3290_v7 = vpack.c.bf16 %v3277_v21, %v3276_v39  ;;  %v4980_v14 = vpop.eup %4979  ;;  %v3279_v40 = vmul.f32 %v4978_v33, %v6763_v61 }
 0x764   : > { %v3293_v24 = vpack.c.bf16 %v3283_v41, %v3282_v27  ;;  %v3278_v23 = vmul.f32 %v4980_v14, %v6752_v22 }
 0x766   : > { %v3291_v9 = vpack.c.bf16 %v3279_v40, %v3278_v23 }
 0x77e   : > { %v3249_v51 = vpop.xlane.xlu1 %3248 }
 0x77f   : > { %4981 = vrcp.f32 %v3249_v51 }
 0x782   : > { %v3253_v47 = vpop.xlane.xlu1 %3252 }
 0x786   : > { %v3251_v0 = vpop.xlane.xlu0 %3250  ;;  %v3297_v62 = vpop.permute.xlu1 %3296 }
 0x787   : > { %4983 = vrcp.f32 %v3251_v0  ;;  %4525 = vmatprep.subr.bf16.mxu0 %v3297_v62  ;;  %4570 = vmatprep.subr.bf16.mxu1 %v3297_v62 }
 0x788   : > { %4526 = vmatpush3.bf16.msra.mxu0 %v3297_v62  ;;  %4578 = vmatpush3.bf16.msra.mxu1 %v3297_v62  ;;  %4985 = vrcp.f32 %v3253_v47 }
 0x789   : > { %4543 = vmatprep.subr.bf16.mxu0 %v4731_v36 }
 0x78a   : > { %v3255_v42 = vpop.xlane.xlu0 %3254 }
 0x78b   : > { %4987 = vrcp.f32 %v3255_v42  ;;  %4528 = vmatmul.mubr.bf16.vlgmr.msra.gmra.mxu0 %v3289_v20  ;;  %4536 = vmatmul.mubr.bf16.vlgmr.msra.gmra.mxu1 %v3293_v24 }
 0x78c   : > { %4531 = vmatprep.mubr.bf16.mxu0 %v3290_v7  ;;  %4544 = vmatpush3.bf16.msra.mxu0 %v4731_v36  ;;  %v4982_v43 = vpop.eup %4981 }
 0x78d   : > { %v3284_v19 = vmul.f32 %v4982_v43, %v6802_v63 }
 0x793   : > { %4532 = vmatmul.mubr.bf16.gmra.mxu0 %v3291_v9 }
 0x794   : > { %v4984_v53 = vpop.eup %4983 }
 0x795   : > { %v3285_v11 = vmul.f32 %v4984_v53, %v6808_v4  ;;  %v4986_v44 = vpop.eup %4985 }
 0x796   : > { %v3286_v28 = vmul.f32 %v4986_v44, %v6805_v5  ;;  %v4732_v5 = vld [vmem:[#allocation8 + $0xf0] sm:$0xff]  }
 0x797   : > { %v3294_v57 = vpack.c.bf16 %v3285_v11, %v3284_v19  ;;  %4545 = vmatprep.subr.bf16.mxu0 %v4732_v5 }
 0x798   : > { %v4988_v25 = vpop.eup %4987  ;;  %4546 = vmatpush3.bf16.msra.mxu0 %v4732_v5 }
 0x799   : > { %4539 = vmatprep.mubr.bf16.mxu1 %v3294_v57  ;;  %v3287_v59 = vmul.f32 %v4988_v25, %v6813_v38 }
 0x79b   : > { %v3295_v61 = vpack.c.bf16 %v3287_v59, %v3286_v28 }
 0x79d   : > { %4540 = vmatmul.mubr.bf16.gmra.mxu1 %v3295_v61 }
 0x7bf   : > { %v4465_v58 = vpop.f32.mrf.mxu0 }
 0x7c0   : > { %v6841_v22 = vadd.f32 %v4465_v58, %v6686_v3 }
 0x7c1   : > { %v2872_v26 = vpop.f32.mrf.mxu0 }
 0x7c2   : > { %v6844_v32 = vadd.f32 %v2872_v26, %v6690_v18 }
 0x7c3   : > { %v4466_v63 = vpop.f32.mrf.mxu0 }
 0x7c4   : > { %v6847_v4 = vadd.f32 %v4466_v63, %v6694_v8 }
 0x7c5   : > { %v2875_v46 = vpop.f32.mrf.mxu0 }
 0x7c6   : > { %v6850_v1 = vadd.f32 %v2875_v46, %v6698_v54 }
 0x7ee   : > { %v4469_v38 = vpop.f32.mrf.mxu0 }
 0x7ef   : > { %v6853_v12 = vadd.f32 %v4469_v38, %v6702_v30 }
 0x7f0   : > { %v2888_v3 = vpop.f32.mrf.mxu0 }
 0x7f1   : > { %v6856_v60 = vadd.f32 %v2888_v3, %v6706_v55 }
 0x7f2   : > { %v4470_v18 = vpop.f32.mrf.mxu0 }
 0x7f3   : > { %v6859_v51 = vadd.f32 %v4470_v18, %v6710_v16 }
 0x7f4   : > { %v2891_v8 = vpop.f32.mrf.mxu0 }
 0x7f5   : > { %v6862_v56 = vadd.f32 %v2891_v8, %v6714_v13 }
 0x7fa   : > { %v4473_v54 = vpop.f32.mrf.mxu0 }
 0x7fb   : > { %v6865_v52 = vadd.f32 %v4473_v54, %v6718_v37 }
 0x7fc   : > { %v2904_v35 = vpop.f32.mrf.mxu0 }
 0x7fd   : > { %v6868_v30 = vadd.f32 %v2904_v35, %v6724_v45 }
 0x7fe   : > { %v4474_v48 = vpop.f32.mrf.mxu0 }
 0x7ff   : > { %v6871_v55 = vadd.f32 %v4474_v48, %v6728_v10 }
 0x800   : > { %v2907_v47 = vpop.f32.mrf.mxu0 }
 0x801   : > { %v6874_v16 = vadd.f32 %v2907_v47, %v6731_v2 }
 0x802   : > { %v4477_v49 = vpop.f32.mrf.mxu0 }
 0x803   : > { %v6877_v13 = vadd.f32 %v4477_v49, %v6784_v34 }
 0x804   : > { %v2920_v31 = vpop.f32.mrf.mxu0 }
 0x805   : > { %v6880_v37 = vadd.f32 %v2920_v31, %v6788_v29 }
 0x806   : > { %v4478_v50 = vpop.f32.mrf.mxu0 }
 0x807   : > { %v6883_v45 = vadd.f32 %v4478_v50, %v6792_v6 }
 0x808   : > { %v6885_v41 = vpop.f32.mrf.mxu0 }
 0x84b   : > { %v4529_v10 = vpop.f32.mrf.mxu0  ;;  %v4537_v0 = vpop.f32.mrf.mxu1 }
 0x84d   : > { %v3354_v62 = vpop.f32.mrf.mxu0  ;;  %v3386_v2 = vpop.f32.mrf.mxu1 }
 0x84f   : > { %v4530_v39 = vpop.f32.mrf.mxu0  ;;  %v4538_v20 = vpop.f32.mrf.mxu1 }
 0x850   : > { %v3418_v27 = vpack.c.bf16 %v4530_v39, %v4529_v10  ;;  %v3422_v9 = vpack.c.bf16 %v4538_v20, %v4537_v0 }
 0x851   : > { %v3357_v21 = vpop.f32.mrf.mxu0  ;;  %v3389_v6 = vpop.f32.mrf.mxu1 }
 0x852   : > { %v3417_v15 = vpack.c.bf16 %v3357_v21, %v3354_v62  ;;  %v3421_v7 = vpack.c.bf16 %v3389_v6, %v3386_v2 }
 0x853   : > { %v4533_v34 = vpop.f32.mrf.mxu0 }
 0x854   : > { %4547 = vmatprep.mubr.msk.bf16.mxu0 %vm1113_vm0, %v3417_v15 }
 0x855   : > { %v3370_v29 = vpop.f32.mrf.mxu0  ;;  %4548 = vmatmul.mubr.msk.bf16.vlgmr.msra.gmra.mxu0 %vm1113_vm0, %v3418_v27 }
 0x857   : > { %v4534_v24 = vpop.f32.mrf.mxu0 }
 0x858   : > { %v3420_v42 = vpack.c.bf16 %v4534_v24, %v4533_v34 }
 0x859   : > { %v3373_v36 = vpop.f32.mrf.mxu0 }
 0x85a   : > { %v3419_v33 = vpack.c.bf16 %v3373_v36, %v3370_v29 }
 0x85c   : > { %4551 = vmatprep.mubr.msk.bf16.mxu0 %vm1113_vm0, %v3419_v33 }
 0x85d   : > { %v4541_v14 = vpop.f32.mrf.mxu1  ;;  %4552 = vmatmul.mubr.msk.bf16.gmra.mxu0 %vm1113_vm0, %v3420_v42 }
 0x85e   : > { %4555 = vmatprep.mubr.msk.bf16.mxu0 %vm1113_vm0, %v3421_v7 }
 0x85f   : > { %v3402_v40 = vpop.f32.mrf.mxu1 }
 0x861   : > { %v4542_v23 = vpop.f32.mrf.mxu1 }
 0x862   : > { %v3424_v19 = vpack.c.bf16 %v4542_v23, %v4541_v14 }
 0x863   : > { %v3405_v43 = vpop.f32.mrf.mxu1 }
 0x864   : > { %v3423_v53 = vpack.c.bf16 %v3405_v43, %v3402_v40 }
 0x865   : > { %4556 = vmatmul.mubr.msk.bf16.gmra.mxu0 %vm1113_vm0, %v3422_v9 }
 0x866   : > { %4559 = vmatprep.mubr.msk.bf16.mxu0 %vm1113_vm0, %v3423_v53 }
 0x86d   : > { %4560 = vmatmul.mubr.msk.bf16.gmra.mxu0 %vm1113_vm0, %v3424_v19 }
 0x915   : > { %v4549_v11 = vpop.f32.mrf.mxu0 }
 0x916   : > { %v3560_v44 = vadd.f32 %v4549_v11, %v6841_v22 }
 0x917   : > { %v3495_v57 = vpop.f32.mrf.mxu0 }
 0x918   : > { %3576 = vst [vmem:[%s6897_s7 + $0x10] sm:$0xff] %v3560_v44  ;;  %v3558_v25 = vadd.f32 %v3495_v57, %v6844_v32 }
 0x919   : > { %v4550_v28 = vpop.f32.mrf.mxu0 }
 0x91a   : > { %3574 = vst [vmem:[%s6897_s7] sm:$0xff] %v3558_v25  ;;  %v3561_v59 = vadd.f32 %v4550_v28, %v6847_v4 }
 0x91b   : > { %v3498_v61 = vpop.f32.mrf.mxu0 }
 0x91c   : > { %3577 = vst [vmem:[%s6897_s7 + $0x18] sm:$0xff] %v3561_v59  ;;  %v3559_v58 = vadd.f32 %v3498_v61, %v6850_v1 }
 0x91d   : > { %v4553_v22 = vpop.f32.mrf.mxu0 }
 0x91e   : > { %3575 = vst [vmem:[%s6897_s7 + $0x8] sm:$0xff] %v3559_v58  ;;  %v3564_v26 = vadd.f32 %v4553_v22, %v6853_v12 }
 0x91f   : > { %v3511_v63 = vpop.f32.mrf.mxu0 }
 0x920   : > { %3580 = vst [vmem:[%s6897_s7 + $0x30] sm:$0xff] %v3564_v26  ;;  %v3562_v32 = vadd.f32 %v3511_v63, %v6856_v60 }
 0x921   : > { %v4554_v46 = vpop.f32.mrf.mxu0 }
 0x922   : > { %3578 = vst [vmem:[%s6897_s7 + $0x20] sm:$0xff] %v3562_v32  ;;  %v3565_v4 = vadd.f32 %v4554_v46, %v6859_v51 }
 0x923   : > { %v3514_v5 = vpop.f32.mrf.mxu0 }
 0x924   : > { %3581 = vst [vmem:[%s6897_s7 + $0x38] sm:$0xff] %v3565_v4  ;;  %v3563_v1 = vadd.f32 %v3514_v5, %v6862_v56 }
 0x925   : > { %v4557_v38 = vpop.f32.mrf.mxu0 }
 0x926   : > { %3579 = vst [vmem:[%s6897_s7 + $0x28] sm:$0xff] %v3563_v1  ;;  %v3568_v12 = vadd.f32 %v4557_v38, %v6865_v52 }
 0x927   : > { %v3527_v3 = vpop.f32.mrf.mxu0 }
 0x928   : > { %3584 = vst [vmem:[%s6897_s7 + $0x50] sm:$0xff] %v3568_v12  ;;  %v3566_v60 = vadd.f32 %v3527_v3, %v6868_v30 }
 0x929   : > { %v4558_v18 = vpop.f32.mrf.mxu0 }
 0x92a   : > { %3582 = vst [vmem:[%s6897_s7 + $0x40] sm:$0xff] %v3566_v60  ;;  %v3569_v51 = vadd.f32 %v4558_v18, %v6871_v55  ;;  %v2948_v55 = vadd.f32 %v6885_v41, %v6797_v17 }
 0x92b   : > { %v3530_v8 = vpop.f32.mrf.mxu0 }
 0x92c   : > { %3585 = vst [vmem:[%s6897_s7 + $0x58] sm:$0xff] %v3569_v51  ;;  %v3567_v56 = vadd.f32 %v3530_v8, %v6874_v16 }
 0x92d   : > { %v4561_v54 = vpop.f32.mrf.mxu0 }
 0x92e   : > { %3583 = vst [vmem:[%s6897_s7 + $0x48] sm:$0xff] %v3567_v56  ;;  %v3572_v52 = vadd.f32 %v4561_v54, %v6877_v13 }
 0x92f   : > { %v3543_v35 = vpop.f32.mrf.mxu0 }
 0x930   : > { %3588 = vst [vmem:[%s6897_s7 + $0x70] sm:$0xff] %v3572_v52  ;;  %v3570_v30 = vadd.f32 %v3543_v35, %v6880_v37 }
 0x931   : > { %v4562_v48 = vpop.f32.mrf.mxu0 }
 0x932   : > { %3586 = vst [vmem:[%s6897_s7 + $0x60] sm:$0xff] %v3570_v30  ;;  %v3573_v47 = vadd.f32 %v4562_v48, %v6883_v45 }
 0x933   : > { %v3546_v16 = vpop.f32.mrf.mxu0 }
 0x934   : > { %3589 = vst [vmem:[%s6897_s7 + $0x78] sm:$0xff] %v3573_v47  ;;  %v3571_v49 = vadd.f32 %v3546_v16, %v2948_v55 }
 0x936   : > { %3587 = vst [vmem:[%s6897_s7 + $0x68] sm:$0xff] %v3571_v49 }
 0x937   : > { %5112 = shalt.err (!%p5109_p5)
}
 0x938   : > { %s5113_s23 = scalar_lea.hbm %s6934_s17, 2048  ;;  %s5117_s25 = scalar_lea.hbm %s6986_s5, 4096 }
 0x939   : > { %p5114_p9 = scmp.ne.s32.totalorder %s6934_s17, %s5113_s23  ;;  %p5118_p11 = scmp.lt.s32.totalorder %s6934_s17, %s6986_s5 }
 0x93a   : > { %p5119_p6 = scmp.lt.s32.totalorder %s5117_s25, %s5113_s23 }
 0x93b   : > { %p5115_p10 = pnand %p5114_p9, %p7141_p3 }
 0x93c   : > { %p5120_p12 = por %p5119_p6, %p5118_p11 }
 0x93d   : > { %p5116_p8 = pneg %p5115_p10 }
 0x93f   : > { %p5121_p2 = pnand %p5120_p12, %p5116_p8 }
 0x941   : > { %5124 = shalt.err (!%p5121_p2)
}
 0x942   : > { %s5183_s24 = smov 128   ;;  %s5184_s28 = smov 8  }
 0x943   : > { %4621 = dma.vmem_to_hbm [thread:$0]  (%p7141_p3), %s6936_s12, 2048, %s6934_s17, %s3591_s14, %s5183_s24, %s5183_s24, %s5184_s28  }
 0x944 PF: > { %s3619_s9 = sand.u32 1, %s5159_s18   ;;  %p7142_p7 = scmp.ne.s32.totalorder %s7053_s10, 0 }
 0x945   : > { %p7143_p4 = scmp.ge.s32.totalorder %s5171_s21, 2  ;;  %s3620_s7 = scalar_lea.sflag [#allocation4], %s3619_s9 }
 0x947   : > { %p4638_p0 = pnand %p7143_p4, %p7142_p7 }
 0x949   : > { %p4639_p13 = pneg %p4638_p0 }
 0x94b   : > { %5154 = dma.done.wait (%p4639_p13), %s3620_s7, 2048  }
 0x94c   : > { %5156 = vsyncadd (%p4639_p13), %s3620_s7, 4294965248  ;;  %s7144_s21 = sld [smem:[#allocation16_spill]]  ;;  %s7147_s18 = smov %s5163_s19 }
 0x94d   : > { %s7145_s30 = sld [smem:[#allocation15_spill]] }
 0x94e   : > { %s7146_s20 = sld [smem:[#allocation17_spill]] }
 0x952   : > { %p22_p1 = scmp.ge.s32.totalorder %s7144_s21, 4  }
 0x953   : > { %s7148_s19 = smov %s7145_s30 }
 0x954   :  { %24 = sbr.rel (!%p22_p1) target bundleno = 10 (0xa), region = 119 }
 0x959   :  { %3625 = vsyncpa [#allocation3], 1 }
 0x95a   :  { %3627 = vsyncpa [#allocation3 + $0x1], 1 }
 0x95b   :  { %3628 = vsyncpa [#allocation6], 1 }
 0x95c   :  { %3630 = vsyncpa [#allocation6 + $0x1], 1 }
 0x95d   :  { %3631 = vsyncpa [#allocation9], 1 }
 0x95e   :  { %3632 = vsyncpa [#allocation4], 1 }
 0x95f   :  { %3634 = vsyncpa [#allocation4 + $0x1], 1 }

</bundles_post_ra>
